<compile_context>
chip_gen: v7x
topology: tpu7x:2x2x1
jax: 0.10.0
libtpu: 0.0.40
codegen_flags: <defaults>
</compile_context>

<pallas_src>
import functools
import numpy as np
import jax
import jax.numpy as jnp
from jax.experimental import pallas as pl
from jax.experimental.pallas import tpu as pltpu

EPS = 1e-5
LANE = 128                       # lane-dense output-channel granule
MAX_COUT_TILE = 512              # keeps per-step VMEM bounded (v7x: 64 MiB physical)
VMEM_LIMIT = 64 * 1024 * 1024


def _round_up(x, m):
    return (x + m - 1) // m * m


def _cout_tile(cp):
    if cp <= MAX_COUT_TILE:
        return cp
    for t in (512, 384, 256, 128):
        if cp % t == 0:
            return t
    return 128


def _bn_affine(g, b, m, v):
    scale = (g / jnp.sqrt(v + EPS)).astype(jnp.float32)
    shift = (b - m * scale).astype(jnp.float32)
    return scale.reshape(1, -1), shift.reshape(1, -1)


# ---------------------------------------------------------------------------
# static geometry / layout prep (trace-time only)
# ---------------------------------------------------------------------------

def _prep_conv1_input(x, stride):
    """x: (N,H,W,C) f32.  Returns phase-stacked flat input, validity mask, geometry."""
    N, H, W, C = x.shape
    Ho = (H + 2 - 3) // stride + 1
    Wo = (W + 2 - 3) // stride + 1
    pitch = Wo + 2                              # flat row pitch shared by all layouts
    Lout = Ho * pitch                           # flat rows per image (cols >= Wo are junk)
    D = (-(pitch + 1)) % 16                     # extra top rows so the h write is aligned
    Rh = (Ho + 3) * pitch + D                   # rows of the padded flat h layout

    if stride == 1:
        Hp, Wp = H + 3, W + 2                   # pad (top 1, bottom 2), (left 1, right 1)
        xp = jnp.pad(x, ((0, 0), (1, 2), (1, 1), (0, 0)))
        x_ph = xp.reshape(N, 1, Hp * Wp, C)
        P, R = 1, Hp * Wp
        phase_ij = [(0, 0)]
    elif stride == 2:
        Hp, Wp = 2 * (Ho + 2), 2 * pitch        # even sizes with spare zero rows/cols
        xp = jnp.pad(x, ((0, 0), (1, Hp - H - 1), (1, Wp - W - 1), (0, 0)))
        Hh, Wq = Hp // 2, Wp // 2               # Wq == pitch
        x_ph = (xp.reshape(N, Hh, 2, Wq, 2, C)
                  .transpose(0, 2, 4, 1, 3, 5)  # (N, pi, pj, Hh, Wq, C)
                  .reshape(N, 4, Hh * Wq, C))
        P, R = 4, Hh * Wq
        phase_ij = [(0, 0), (0, 1), (1, 0), (1, 1)]
    else:
        raise NotImplementedError("stride must be 1 or 2")

    # {0,1} mask: 1 inside the original image, 0 on the padding ring / spare rows.
    r = np.arange(R)
    masks = []
    for (pi, pj) in phase_ij:
        hh = stride * (r // pitch) + pi
        ww = stride * (r % pitch) + pj
        masks.append(((hh >= 1) & (hh <= H) & (ww >= 1) & (ww <= W)).astype(np.float32))
    imask = jnp.asarray(np.stack(masks, 0)[:, :, None])            # (P, R, 1)

    # tap plan: tap t = kh*3+kw  ->  (phase index, flat row offset)
    taps = []
    for kh in range(3):
        for kw in range(3):
            if stride == 1:
                taps.append((0, kh * pitch + kw))
            else:
                taps.append(((kh % 2) * 2 + (kw % 2), (kh // 2) * pitch + (kw // 2)))
    sc_tap = (0, pitch + 1) if stride == 1 else (3, 0)              # 1x1 shortcut "tap"

    geom = dict(N=N, H=H, W=W, C=C, Ho=Ho, Wo=Wo, pitch=pitch, Lout=Lout,
                D=D, Rh=Rh, P=P, R=R, taps=taps, sc_tap=sc_tap)
    return x_ph, imask, geom


def _out_col_mask(pitch, Wo, Lout):
    g = np.arange(Lout)
    return jnp.asarray(((g % pitch) < Wo).astype(np.float32)[:, None])   # (Lout, 1)


# ---------------------------------------------------------------------------
# Pallas kernels
# ---------------------------------------------------------------------------

def _make_conv1_kernel(taps, write_off, Lout, has_shortcut, sc_tap):
    """bn1+relu -> 3x3 conv (stride folded into the tap plan) -> bn2+relu,
       plus (optionally) the fused 1x1 convShortcut.  Writes h in conv2's padded layout."""

    def body(x_ref, imask_ref, s1_ref, sh1_ref, w1_ref, s2_ref, sh2_ref, omask_ref, *rest):
        if has_shortcut:
            ws_ref, h_ref, res_ref, a_scr = rest
        else:
            h_ref, a_scr = rest
            ws_ref = res_ref = None

        # fused bn1 + relu on the raw input; re-zero the padding ring; bf16 MXU operands
        a = jnp.maximum(x_ref[0] * s1_ref[...] + sh1_ref[...], 0.0) * imask_ref[...]
        a_scr[...] = a.astype(jnp.bfloat16)

        acc = None
        for t, (p, off) in enumerate(taps):          # 9 implicit-GEMM taps
            d = jnp.dot(a_scr[p, off:off + Lout, :], w1_ref[t],
                        preferred_element_type=jnp.float32)
            acc = d if acc is None else acc + d

        hv = jnp.maximum(acc * s2_ref[...] + sh2_ref[...], 0.0) * omask_ref[...]

        # emit the zero-padded flat layout conv2 consumes (aligned offset store)
        h_ref[...] = jnp.zeros(h_ref.shape, h_ref.dtype)
        h_ref[0, write_off:write_off + Lout, :] = hv.astype(h_ref.dtype)

        if has_shortcut:                             # fused 1x1 strided convShortcut
            sp, soff = sc_tap
            res_ref[0] = jnp.dot(a_scr[sp, soff:soff + Lout, :], ws_ref[...],
                                 preferred_element_type=jnp.float32)

    return body


def _make_conv2_kernel(tap_offsets, Lout):
    """3x3 stride-1 conv on the padded h layout, fused with the residual add."""

    def body(h_ref, w2_ref, res_ref, o_ref):
        acc = res_ref[0]                             # start from the residual
        for t, off in enumerate(tap_offsets):
            acc = acc + jnp.dot(h_ref[0, off:off + Lout, :], w2_ref[t],
                                preferred_element_type=jnp.float32)
        o_ref[0] = acc

    return body


# ---------------------------------------------------------------------------
# pallas_call wrappers
# ---------------------------------------------------------------------------

def _conv1_pallas(x_ph, imask, s1, sh1, w1_flat, s2, sh2, omask, geom, ws_flat=None):
    N, P, R, Cin = x_ph.shape
    Cp = w1_flat.shape[-1]
    Ct = _cout_tile(Cp)
    nj = Cp // Ct
    pitch, Lout, Rh, D = geom['pitch'], geom['Lout'], geom['Rh'], geom['D']
    has_sc = ws_flat is not None

    kernel = _make_conv1_kernel(geom['taps'], D + pitch + 1, Lout, has_sc, geom['sc_tap'])

    in_specs = [
        pl.BlockSpec((1, P, R, Cin), lambda n, j: (n, 0, 0, 0)),
        pl.BlockSpec((P, R, 1), lambda n, j: (0, 0, 0)),
        pl.BlockSpec((1, Cin), lambda n, j: (0, 0)),
        pl.BlockSpec((1, Cin), lambda n, j: (0, 0)),
        pl.BlockSpec((9, Cin, Ct), lambda n, j: (0, 0, j)),
        pl.BlockSpec((1, Ct), lambda n, j: (0, j)),
        pl.BlockSpec((1, Ct), lambda n, j: (0, j)),
        pl.BlockSpec((Lout, 1), lambda n, j: (0, 0)),
    ]
    args = [x_ph, imask, s1, sh1, w1_flat, s2, sh2, omask]
    out_shapes = [jax.ShapeDtypeStruct((N, Rh, Cp), jnp.bfloat16)]
    out_specs = [pl.BlockSpec((1, Rh, Ct), lambda n, j: (n, 0, j))]
    if has_sc:
        in_specs.append(pl.BlockSpec((Cin, Ct), lambda n, j: (0, j)))
        args.append(ws_flat)
        out_shapes.append(jax.ShapeDtypeStruct((N, Lout, Cp), jnp.float32))
        out_specs.append(pl.BlockSpec((1, Lout, Ct), lambda n, j: (n, 0, j)))

    outs = pl.pallas_call(
        kernel,
        out_shape=tuple(out_shapes),
        grid_spec=pltpu.PrefetchScalarGridSpec(
            num_scalar_prefetch=0,
            grid=(N, nj),
            in_specs=in_specs,
            out_specs=out_specs,
            scratch_shapes=[pltpu.VMEM((P, R, Cin), jnp.bfloat16)],
        ),
        compiler_params=pltpu.CompilerParams(
            dimension_semantics=("parallel", "parallel"),
            vmem_limit_bytes=VMEM_LIMIT,
        ),
    )(*args)
    return (outs[0], outs[1]) if has_sc else (outs[0], None)


def _conv2_pallas(h_pad, w2_flat, res_flat, geom):
    N, Rh, Cp = h_pad.shape
    Ct = _cout_tile(Cp)
    nj = Cp // Ct
    pitch, Lout, D = geom['pitch'], geom['Lout'], geom['D']
    tap_offsets = [D + kh * pitch + kw for kh in range(3) for kw in range(3)]
    kernel = _make_conv2_kernel(tap_offsets, Lout)

    return pl.pallas_call(
        kernel,
        out_shape=jax.ShapeDtypeStruct((N, Lout, Cp), jnp.float32),
        grid_spec=pltpu.PrefetchScalarGridSpec(
            num_scalar_prefetch=0,
            grid=(N, nj),
            in_specs=[
                pl.BlockSpec((1, Rh, Cp), lambda n, j: (n, 0, 0)),
                pl.BlockSpec((9, Cp, Ct), lambda n, j: (0, 0, j)),
                pl.BlockSpec((1, Lout, Ct), lambda n, j: (n, 0, j)),
            ],
            out_specs=pl.BlockSpec((1, Lout, Ct), lambda n, j: (n, 0, j)),
        ),
        compiler_params=pltpu.CompilerParams(
            dimension_semantics=("parallel", "parallel"),
            vmem_limit_bytes=VMEM_LIMIT,
        ),
    )(h_pad, w2_flat, res_flat)


# ---------------------------------------------------------------------------
# BasicBlock forward
# ---------------------------------------------------------------------------

def basic_block_forward_nhwc(x, params, stride):
    """x: (N,H,W,Cin) f32 -> (N,Ho,Wo,Cout) f32  (inference BN, droprate=0)."""
    x = x.astype(jnp.float32)
    N, H, W, Cin = x.shape
    w1, w2 = params['conv1_w'], params['conv2_w']
    Cout = w1.shape[-1]
    equal = (Cin == Cout)
    assert equal or ('convs_w' in params)
    assert not (equal and stride != 1), "identity shortcut requires stride == 1"

    Cp = _round_up(Cout, LANE)                      # lane-dense output channels

    x_ph, imask, geom = _prep_conv1_input(x, stride)
    Ho, Wo, pitch = geom['Ho'], geom['Wo'], geom['pitch']

    s1, sh1 = _bn_affine(params['bn1_g'], params['bn1_b'], params['bn1_m'], params['bn1_v'])
    s2, sh2 = _bn_affine(params['bn2_g'], params['bn2_b'], params['bn2_m'], params['bn2_v'])
    s2 = jnp.pad(s2, ((0, 0), (0, Cp - Cout)))
    sh2 = jnp.pad(sh2, ((0, 0), (0, Cp - Cout)))

    w1_flat = jnp.pad(w1.reshape(9, Cin, Cout),
                      ((0, 0), (0, 0), (0, Cp - Cout))).astype(jnp.bfloat16)
    w2_flat = jnp.pad(w2.reshape(9, Cout, Cout),
                      ((0, 0), (0, Cp - Cout), (0, Cp - Cout))).astype(jnp.bfloat16)
    ws_flat = None
    if not equal:
        ws_flat = jnp.pad(params['convs_w'].reshape(Cin, Cout),
                          ((0, 0), (0, Cp - Cout))).astype(jnp.bfloat16)

    omask = _out_col_mask(pitch, Wo, geom['Lout'])

    h_pad, res = _conv1_pallas(x_ph, imask, s1, sh1, w1_flat, s2, sh2, omask, geom,
                               ws_flat=ws_flat)
    if equal:
        # identity residual, laid out like the conv2 output (pitch = W+2), channel-padded
        res = jnp.pad(x, ((0, 0), (0, 0), (0, pitch - W), (0, Cp - Cout))
                      ).reshape(N, H * pitch, Cp)

    out_flat = _conv2_pallas(h_pad, w2_flat, res, geom)
    return out_flat.reshape(N, Ho, pitch, Cp)[:, :, :Wo, :Cout]


@functools.partial(jax.jit, static_argnums=(2,))
def basic_block_forward(x_nchw, params, stride):
    x = jnp.transpose(x_nchw, (0, 2, 3, 1))
    out = basic_block_forward_nhwc(x, params, stride)
    return jnp.transpose(out, (0, 3, 1, 2))


# ---------------------------------------------------------------------------
# references & init
# ---------------------------------------------------------------------------

def _ref_forward(x_nchw, params, stride, matmul_dtype):
    x = jnp.transpose(x_nchw, (0, 2, 3, 1)).astype(jnp.float32)
    Cin = x.shape[-1]
    Cout = params['conv1_w'].shape[-1]
    equal = (Cin == Cout)
    s1, sh1 = _bn_affine(params['bn1_g'], params['bn1_b'], params['bn1_m'], params['bn1_v'])
    s2, sh2 = _bn_affine(params['bn2_g'], params['bn2_b'], params['bn2_m'], params['bn2_v'])

    def conv(t, w, s, pad):
        return jax.lax.conv_general_dilated(
            t.astype(matmul_dtype), w.astype(matmul_dtype), (s, s),
            ((pad, pad), (pad, pad)),
            dimension_numbers=('NHWC', 'HWIO', 'NHWC'),
            preferred_element_type=jnp.float32)

    a1 = jnp.maximum(x * s1 + sh1, 0.0)
    h = conv(a1, params['conv1_w'], stride, 1)
    h = jnp.maximum(h * s2 + sh2, 0.0)
    out = conv(h, params['conv2_w'], 1, 1)
    res = x if equal else conv(a1, params['convs_w'], stride, 0)
    return jnp.transpose(out + res, (0, 3, 1, 2))


def init_params(key, in_planes, out_planes):
    ks = jax.random.split(key, 12)

    def u(k, shape, scale=0.3):
        return (jax.random.uniform(k, shape, jnp.float32) - 0.5) * 2.0 * scale

    p = {
        'conv1_w': u(ks[0], (3, 3, in_planes, out_planes)),
        'conv2_w': u(ks[1], (3, 3, out_planes, out_planes)),
        'bn1_g': 1.0 + 0.1 * u(ks[2], (in_planes,)),
        'bn1_b': 0.1 * u(ks[3], (in_planes,)),
        'bn1_m': 0.1 * u(ks[4], (in_planes,)),
        'bn1_v': 1.0 + 0.1 * jnp.abs(u(ks[5], (in_planes,))),
        'bn2_g': 1.0 + 0.1 * u(ks[6], (out_planes,)),
        'bn2_b': 0.1 * u(ks[7], (out_planes,)),
        'bn2_m': 0.1 * u(ks[8], (out_planes,)),
        'bn2_v': 1.0 + 0.1 * jnp.abs(u(ks[9], (out_planes,))),
    }
    if in_planes != out_planes:
        p['convs_w'] = u(ks[10], (1, 1, in_planes, out_planes))
    return p


# ---------------------------------------------------------------------------
# main
# ---------------------------------------------------------------------------

if __name__ == "__main__":
    key = jax.random.PRNGKey(0)
    k_x1, k_x2, k_p1, k_p2 = jax.random.split(key, 4)

    # Case A: in_planes != out_planes (convShortcut), stride 2.
    x1 = jax.random.normal(k_x1, (2, 4, 16, 16), jnp.float32)   # NCHW
    pA = init_params(k_p1, 4, 8)
    outA = basic_block_forward(x1, pA, 2)
    refA_bf16 = _ref_forward(x1, pA, 2, jnp.bfloat16)
    refA_f32 = _ref_forward(x1, pA, 2, jnp.float32)

    # Case B: in_planes == out_planes (identity shortcut), stride 1.
    x2 = jax.random.normal(k_x2, (2, 8, 8, 8), jnp.float32)     # NCHW
    pB = init_params(k_p2, 8, 8)
    outB = basic_block_forward(x2, pB, 1)
    refB_bf16 = _ref_forward(x2, pB, 1, jnp.bfloat16)
    refB_f32 = _ref_forward(x2, pB, 1, jnp.float32)

    jax.block_until_ready((outA, outB))

    assert outA.shape == (2, 8, 8, 8), outA.shape
    assert outB.shape == (2, 8, 8, 8), outB.shape
    # tight check against a reference using the same bf16 MXU operands
    assert jnp.allclose(outA, refA_bf16, atol=5e-3, rtol=5e-3), \
        float(jnp.max(jnp.abs(outA - refA_bf16)))
    assert jnp.allclose(outB, refB_bf16, atol=5e-3, rtol=5e-3), \
        float(jnp.max(jnp.abs(outB - refB_bf16)))
    # loose sanity check against a pure-f32 reference (bf16 quantisation slack)
    assert jnp.allclose(outA, refA_f32, atol=5e-2, rtol=5e-2), \
        float(jnp.max(jnp.abs(outA - refA_f32)))
    assert jnp.allclose(outB, refB_f32, atol=5e-2, rtol=5e-2), \
        float(jnp.max(jnp.abs(outB - refB_f32)))

    print("KERNEL_OK")
</pallas_src>

<mosaic_0001>
module attributes {stable_mosaic.version = 11 : i64} {
  func.func @body(%arg0: i32, %arg1: i32, %arg2: memref<1x115x128xbf16, #tpu.memory_space<vmem>>, %arg3: memref<9x128x128xbf16, #tpu.memory_space<vmem>>, %arg4: memref<1x80x128xf32, #tpu.memory_space<vmem>>, %arg5: memref<1x80x128xf32, #tpu.memory_space<vmem>>) attributes {dimension_semantics = [#tpu.dimension_semantics<parallel>, #tpu.dimension_semantics<parallel>], iteration_bounds = array<i64: 2, 1>, scalar_prefetch = 0 : i64, scratch_operands = 0 : i64, tpu.core_type = #tpu.core_type<tc>, window_params = [{transform_indices = @transform_0, window_bounds = array<i64: 1, 115, 128>}, {transform_indices = @transform_1, window_bounds = array<i64: 9, 128, 128>}, {transform_indices = @transform_2, window_bounds = array<i64: 1, 80, 128>}, {transform_indices = @transform_3, window_bounds = array<i64: 1, 80, 128>}]} {
    %c0 = arith.constant 0 : index
    %c0_0 = arith.constant 0 : index
    %c0_1 = arith.constant 0 : index
    %0 = vector.load %arg4[%c0, %c0_0, %c0_1] : memref<1x80x128xf32, #tpu.memory_space<vmem>>, vector<1x80x128xf32>
    %1 = vector.shape_cast %0 : vector<1x80x128xf32> to vector<80x128xf32>
    %c0_2 = arith.constant 0 : index
    %c5 = arith.constant 5 : index
    %c0_3 = arith.constant 0 : index
    %2 = vector.load %arg2[%c0_2, %c5, %c0_3] : memref<1x115x128xbf16, #tpu.memory_space<vmem>>, vector<1x80x128xbf16>
    %3 = vector.shape_cast %2 : vector<1x80x128xbf16> to vector<80x128xbf16>
    %c0_4 = arith.constant 0 : index
    %c0_5 = arith.constant 0 : index
    %c0_6 = arith.constant 0 : index
    %4 = vector.load %arg3[%c0_4, %c0_5, %c0_6] : memref<9x128x128xbf16, #tpu.memory_space<vmem>>, vector<1x128x128xbf16>
    %5 = vector.shape_cast %4 : vector<1x128x128xbf16> to vector<128x128xbf16>
    %cst = arith.constant dense<0.000000e+00> : vector<80x128xf32>
    %6 = tpu.matmul %3, %5, %cst {dimension_numbers = #tpu.dot_dimension_numbers<[1], [0], [0], [1], [0, 0, 1, 1], [], []>} : vector<80x128xbf16>, vector<128x128xbf16>, vector<80x128xf32> -> vector<80x128xf32>
    %7 = arith.addf %1, %6 : vector<80x128xf32>
    %c0_7 = arith.constant 0 : index
    %c6 = arith.constant 6 : index
    %c0_8 = arith.constant 0 : index
    %8 = vector.load %arg2[%c0_7, %c6, %c0_8] : memref<1x115x128xbf16, #tpu.memory_space<vmem>>, vector<1x80x128xbf16>
    %9 = vector.shape_cast %8 : vector<1x80x128xbf16> to vector<80x128xbf16>
    %c1 = arith.constant 1 : index
    %c0_9 = arith.constant 0 : index
    %c0_10 = arith.constant 0 : index
    %10 = vector.load %arg3[%c1, %c0_9, %c0_10] : memref<9x128x128xbf16, #tpu.memory_space<vmem>>, vector<1x128x128xbf16>
    %11 = vector.shape_cast %10 : vector<1x128x128xbf16> to vector<128x128xbf16>
    %cst_11 = arith.constant dense<0.000000e+00> : vector<80x128xf32>
    %12 = tpu.matmul %9, %11, %cst_11 {dimension_numbers = #tpu.dot_dimension_numbers<[1], [0], [0], [1], [0, 0, 1, 1], [], []>} : vector<80x128xbf16>, vector<128x128xbf16>, vector<80x128xf32> -> vector<80x128xf32>
    %13 = arith.addf %7, %12 : vector<80x128xf32>
    %c0_12 = arith.constant 0 : index
    %c7 = arith.constant 7 : index
    %c0_13 = arith.constant 0 : index
    %14 = vector.load %arg2[%c0_12, %c7, %c0_13] : memref<1x115x128xbf16, #tpu.memory_space<vmem>>, vector<1x80x128xbf16>
    %15 = vector.shape_cast %14 : vector<1x80x128xbf16> to vector<80x128xbf16>
    %c2 = arith.constant 2 : index
    %c0_14 = arith.constant 0 : index
    %c0_15 = arith.constant 0 : index
    %16 = vector.load %arg3[%c2, %c0_14, %c0_15] : memref<9x128x128xbf16, #tpu.memory_space<vmem>>, vector<1x128x128xbf16>
    %17 = vector.shape_cast %16 : vector<1x128x128xbf16> to vector<128x128xbf16>
    %cst_16 = arith.constant dense<0.000000e+00> : vector<80x128xf32>
    %18 = tpu.matmul %15, %17, %cst_16 {dimension_numbers = #tpu.dot_dimension_numbers<[1], [0], [0], [1], [0, 0, 1, 1], [], []>} : vector<80x128xbf16>, vector<128x128xbf16>, vector<80x128xf32> -> vector<80x128xf32>
    %19 = arith.addf %13, %18 : vector<80x128xf32>
    %c0_17 = arith.constant 0 : index
    %c15 = arith.constant 15 : index
    %c0_18 = arith.constant 0 : index
    %20 = vector.load %arg2[%c0_17, %c15, %c0_18] : memref<1x115x128xbf16, #tpu.memory_space<vmem>>, vector<1x80x128xbf16>
    %21 = vector.shape_cast %20 : vector<1x80x128xbf16> to vector<80x128xbf16>
    %c3 = arith.constant 3 : index
    %c0_19 = arith.constant 0 : index
    %c0_20 = arith.constant 0 : index
    %22 = vector.load %arg3[%c3, %c0_19, %c0_20] : memref<9x128x128xbf16, #tpu.memory_space<vmem>>, vector<1x128x128xbf16>
    %23 = vector.shape_cast %22 : vector<1x128x128xbf16> to vector<128x128xbf16>
    %cst_21 = arith.constant dense<0.000000e+00> : vector<80x128xf32>
    %24 = tpu.matmul %21, %23, %cst_21 {dimension_numbers = #tpu.dot_dimension_numbers<[1], [0], [0], [1], [0, 0, 1, 1], [], []>} : vector<80x128xbf16>, vector<128x128xbf16>, vector<80x128xf32> -> vector<80x128xf32>
    %25 = arith.addf %19, %24 : vector<80x128xf32>
    %c0_22 = arith.constant 0 : index
    %c16 = arith.constant 16 : index
    %c0_23 = arith.constant 0 : index
    %26 = vector.load %arg2[%c0_22, %c16, %c0_23] : memref<1x115x128xbf16, #tpu.memory_space<vmem>>, vector<1x80x128xbf16>
    %27 = vector.shape_cast %26 : vector<1x80x128xbf16> to vector<80x128xbf16>
    %c4 = arith.constant 4 : index
    %c0_24 = arith.constant 0 : index
    %c0_25 = arith.constant 0 : index
    %28 = vector.load %arg3[%c4, %c0_24, %c0_25] : memref<9x128x128xbf16, #tpu.memory_space<vmem>>, vector<1x128x128xbf16>
    %29 = vector.shape_cast %28 : vector<1x128x128xbf16> to vector<128x128xbf16>
    %cst_26 = arith.constant dense<0.000000e+00> : vector<80x128xf32>
    %30 = tpu.matmul %27, %29, %cst_26 {dimension_numbers = #tpu.dot_dimension_numbers<[1], [0], [0], [1], [0, 0, 1, 1], [], []>} : vector<80x128xbf16>, vector<128x128xbf16>, vector<80x128xf32> -> vector<80x128xf32>
    %31 = arith.addf %25, %30 : vector<80x128xf32>
    %c0_27 = arith.constant 0 : index
    %c17 = arith.constant 17 : index
    %c0_28 = arith.constant 0 : index
    %32 = vector.load %arg2[%c0_27, %c17, %c0_28] : memref<1x115x128xbf16, #tpu.memory_space<vmem>>, vector<1x80x128xbf16>
    %33 = vector.shape_cast %32 : vector<1x80x128xbf16> to vector<80x128xbf16>
    %c5_29 = arith.constant 5 : index
    %c0_30 = arith.constant 0 : index
    %c0_31 = arith.constant 0 : index
    %34 = vector.load %arg3[%c5_29, %c0_30, %c0_31] : memref<9x128x128xbf16, #tpu.memory_space<vmem>>, vector<1x128x128xbf16>
    %35 = vector.shape_cast %34 : vector<1x128x128xbf16> to vector<128x128xbf16>
    %cst_32 = arith.constant dense<0.000000e+00> : vector<80x128xf32>
    %36 = tpu.matmul %33, %35, %cst_32 {dimension_numbers = #tpu.dot_dimension_numbers<[1], [0], [0], [1], [0, 0, 1, 1], [], []>} : vector<80x128xbf16>, vector<128x128xbf16>, vector<80x128xf32> -> vector<80x128xf32>
    %37 = arith.addf %31, %36 : vector<80x128xf32>
    %c0_33 = arith.constant 0 : index
    %c25 = arith.constant 25 : index
    %c0_34 = arith.constant 0 : index
    %38 = vector.load %arg2[%c0_33, %c25, %c0_34] : memref<1x115x128xbf16, #tpu.memory_space<vmem>>, vector<1x80x128xbf16>
    %39 = vector.shape_cast %38 : vector<1x80x128xbf16> to vector<80x128xbf16>
    %c6_35 = arith.constant 6 : index
    %c0_36 = arith.constant 0 : index
    %c0_37 = arith.constant 0 : index
    %40 = vector.load %arg3[%c6_35, %c0_36, %c0_37] : memref<9x128x128xbf16, #tpu.memory_space<vmem>>, vector<1x128x128xbf16>
    %41 = vector.shape_cast %40 : vector<1x128x128xbf16> to vector<128x128xbf16>
    %cst_38 = arith.constant dense<0.000000e+00> : vector<80x128xf32>
    %42 = tpu.matmul %39, %41, %cst_38 {dimension_numbers = #tpu.dot_dimension_numbers<[1], [0], [0], [1], [0, 0, 1, 1], [], []>} : vector<80x128xbf16>, vector<128x128xbf16>, vector<80x128xf32> -> vector<80x128xf32>
    %43 = arith.addf %37, %42 : vector<80x128xf32>
    %c0_39 = arith.constant 0 : index
    %c26 = arith.constant 26 : index
    %c0_40 = arith.constant 0 : index
    %44 = vector.load %arg2[%c0_39, %c26, %c0_40] : memref<1x115x128xbf16, #tpu.memory_space<vmem>>, vector<1x80x128xbf16>
    %45 = vector.shape_cast %44 : vector<1x80x128xbf16> to vector<80x128xbf16>
    %c7_41 = arith.constant 7 : index
    %c0_42 = arith.constant 0 : index
    %c0_43 = arith.constant 0 : index
    %46 = vector.load %arg3[%c7_41, %c0_42, %c0_43] : memref<9x128x128xbf16, #tpu.memory_space<vmem>>, vector<1x128x128xbf16>
    %47 = vector.shape_cast %46 : vector<1x128x128xbf16> to vector<128x128xbf16>
    %cst_44 = arith.constant dense<0.000000e+00> : vector<80x128xf32>
    %48 = tpu.matmul %45, %47, %cst_44 {dimension_numbers = #tpu.dot_dimension_numbers<[1], [0], [0], [1], [0, 0, 1, 1], [], []>} : vector<80x128xbf16>, vector<128x128xbf16>, vector<80x128xf32> -> vector<80x128xf32>
    %49 = arith.addf %43, %48 : vector<80x128xf32>
    %c0_45 = arith.constant 0 : index
    %c27 = arith.constant 27 : index
    %c0_46 = arith.constant 0 : index
    %50 = vector.load %arg2[%c0_45, %c27, %c0_46] : memref<1x115x128xbf16, #tpu.memory_space<vmem>>, vector<1x80x128xbf16>
    %51 = vector.shape_cast %50 : vector<1x80x128xbf16> to vector<80x128xbf16>
    %c8 = arith.constant 8 : index
    %c0_47 = arith.constant 0 : index
    %c0_48 = arith.constant 0 : index
    %52 = vector.load %arg3[%c8, %c0_47, %c0_48] : memref<9x128x128xbf16, #tpu.memory_space<vmem>>, vector<1x128x128xbf16>
    %53 = vector.shape_cast %52 : vector<1x128x128xbf16> to vector<128x128xbf16>
    %cst_49 = arith.constant dense<0.000000e+00> : vector<80x128xf32>
    %54 = tpu.matmul %51, %53, %cst_49 {dimension_numbers = #tpu.dot_dimension_numbers<[1], [0], [0], [1], [0, 0, 1, 1], [], []>} : vector<80x128xbf16>, vector<128x128xbf16>, vector<80x128xf32> -> vector<80x128xf32>
    %55 = arith.addf %49, %54 : vector<80x128xf32>
    %c0_50 = arith.constant 0 : index
    %c0_51 = arith.constant 0 : index
    %c0_52 = arith.constant 0 : index
    %56 = vector.load %arg5[%c0_50, %c0_51, %c0_52] : memref<1x80x128xf32, #tpu.memory_space<vmem>>, vector<1x80x128xf32>
    %57 = vector.shape_cast %56 : vector<1x80x128xf32> to vector<80x128xf32>
    %58 = vector.shape_cast %55 : vector<80x128xf32> to vector<1x80x128xf32>
    tpu.vector_store %arg5[%c0_50, %c0_51, %c0_52], %58 {strides = array<i32>} : memref<1x80x128xf32, #tpu.memory_space<vmem>>, vector<1x80x128xf32>,
    return
  }
  func.func @transform_0(%arg0: i32, %arg1: i32) -> (i32, i32, i32) {
    %c0_i32 = arith.constant 0 : i32
    %c0_i32_0 = arith.constant 0 : i32
    %c0_i32_1 = arith.constant 0 : i32
    return %arg0, %c0_i32, %c0_i32_0 : i32, i32, i32
  }
  func.func @transform_1(%arg0: i32, %arg1: i32) -> (i32, i32, i32) {
    %c0_i32 = arith.constant 0 : i32
    %c0_i32_0 = arith.constant 0 : i32
    %c0_i32_1 = arith.constant 0 : i32
    return %c0_i32, %c0_i32_0, %arg1 : i32, i32, i32
  }
  func.func @transform_2(%arg0: i32, %arg1: i32) -> (i32, i32, i32) {
    %c0_i32 = arith.constant 0 : i32
    %c0_i32_0 = arith.constant 0 : i32
    return %arg0, %c0_i32, %arg1 : i32, i32, i32
  }
  func.func @transform_3(%arg0: i32, %arg1: i32) -> (i32, i32, i32) {
    %c0_i32 = arith.constant 0 : i32
    %c0_i32_0 = arith.constant 0 : i32
    return %arg0, %c0_i32, %arg1 : i32, i32, i32
  }
}

module attributes {stable_mosaic.version = 11 : i64} {
  func.func @body(%arg0: i32, %arg1: i32, %arg2: memref<1x4x100x4xf32, #tpu.memory_space<vmem>>, %arg3: memref<4x100x1xf32, #tpu.memory_space<vmem>>, %arg4: memref<1x4xf32, #tpu.memory_space<vmem>>, %arg5: memref<1x4xf32, #tpu.memory_space<vmem>>, %arg6: memref<9x4x128xbf16, #tpu.memory_space<vmem>>, %arg7: memref<1x128xf32, #tpu.memory_space<vmem>>, %arg8: memref<1x128xf32, #tpu.memory_space<vmem>>, %arg9: memref<80x1xf32, #tpu.memory_space<vmem>>, %arg10: memref<4x128xbf16, #tpu.memory_space<vmem>>, %arg11: memref<1x115x128xbf16, #tpu.memory_space<vmem>>, %arg12: memref<1x80x128xf32, #tpu.memory_space<vmem>>, %arg13: memref<4x100x4xbf16, #tpu.memory_space<vmem>>) attributes {dimension_semantics = [#tpu.dimension_semantics<parallel>, #tpu.dimension_semantics<parallel>], iteration_bounds = array<i64: 2, 1>, scalar_prefetch = 0 : i64, scratch_operands = 1 : i64, tpu.core_type = #tpu.core_type<tc>, window_params = [{transform_indices = @transform_0, window_bounds = array<i64: 1, 4, 100, 4>}, {pipeline_mode = #tpu.pipeline_mode<synchronous>, transform_indices = @transform_1, window_bounds = array<i64: 4, 100, 1>}, {pipeline_mode = #tpu.pipeline_mode<synchronous>, transform_indices = @transform_2, window_bounds = array<i64: 1, 4>}, {pipeline_mode = #tpu.pipeline_mode<synchronous>, transform_indices = @transform_3, window_bounds = array<i64: 1, 4>}, {transform_indices = @transform_4, window_bounds = array<i64: 9, 4, 128>}, {transform_indices = @transform_5, window_bounds = array<i64: 1, 128>}, {transform_indices = @transform_6, window_bounds = array<i64: 1, 128>}, {pipeline_mode = #tpu.pipeline_mode<synchronous>, transform_indices = @transform_7, window_bounds = array<i64: 80, 1>}, {transform_indices = @transform_8, window_bounds = array<i64: 4, 128>}, {transform_indices = @transform_9, window_bounds = array<i64: 1, 115, 128>}, {transform_indices = @transform_10, window_bounds = array<i64: 1, 80, 128>}]} {
    %c0 = arith.constant 0 : index
    %c0_0 = arith.constant 0 : index
    %c0_1 = arith.constant 0 : index
    %c0_2 = arith.constant 0 : index
    %0 = vector.load %arg2[%c0, %c0_0, %c0_1, %c0_2] : memref<1x4x100x4xf32, #tpu.memory_space<vmem>>, vector<1x4x100x4xf32>
    %1 = vector.shape_cast %0 : vector<1x4x100x4xf32> to vector<4x100x4xf32>
    %c0_3 = arith.constant 0 : index
    %c0_4 = arith.constant 0 : index
    %2 = vector.load %arg4[%c0_3, %c0_4] : memref<1x4xf32, #tpu.memory_space<vmem>>, vector<1x4xf32>
    %3 = vector.shape_cast %2 : vector<1x4xf32> to vector<1x1x4xf32>
    %4 = vector.broadcast %3 : vector<1x1x4xf32> to vector<4x100x4xf32>
    %5 = arith.mulf %1, %4 : vector<4x100x4xf32>
    %c0_5 = arith.constant 0 : index
    %c0_6 = arith.constant 0 : index
    %6 = vector.load %arg5[%c0_5, %c0_6] : memref<1x4xf32, #tpu.memory_space<vmem>>, vector<1x4xf32>
    %7 = vector.shape_cast %6 : vector<1x4xf32> to vector<1x1x4xf32>
    %8 = vector.broadcast %7 : vector<1x1x4xf32> to vector<4x100x4xf32>
    %9 = arith.addf %5, %8 : vector<4x100x4xf32>
    %cst = arith.constant 0.000000e+00 : f32
    %10 = vector.broadcast %cst : f32 to vector<4x100x4xf32>
    %11 = arith.maximumf %9, %10 : vector<4x100x4xf32>
    %c0_7 = arith.constant 0 : index
    %c0_8 = arith.constant 0 : index
    %c0_9 = arith.constant 0 : index
    %12 = vector.load %arg3[%c0_7, %c0_8, %c0_9] : memref<4x100x1xf32, #tpu.memory_space<vmem>>, vector<4x100x1xf32>
    %13 = vector.broadcast %12 : vector<4x100x1xf32> to vector<4x100x4xf32>
    %14 = arith.mulf %11, %13 : vector<4x100x4xf32>
    %15 = arith.truncf %14 : vector<4x100x4xf32> to vector<4x100x4xbf16>
    %c0_10 = arith.constant 0 : index
    %c0_11 = arith.constant 0 : index
    %c0_12 = arith.constant 0 : index
    %16 = vector.load %arg13[%c0_10, %c0_11, %c0_12] : memref<4x100x4xbf16, #tpu.memory_space<vmem>>, vector<4x100x4xbf16>
    tpu.vector_store %arg13[%c0_10, %c0_11, %c0_12], %15 {strides = array<i32>} : memref<4x100x4xbf16, #tpu.memory_space<vmem>>, vector<4x100x4xbf16>,
    %c0_13 = arith.constant 0 : index
    %c0_14 = arith.constant 0 : index
    %c0_15 = arith.constant 0 : index
    %17 = vector.load %arg13[%c0_13, %c0_14, %c0_15] : memref<4x100x4xbf16, #tpu.memory_space<vmem>>, vector<1x80x4xbf16>
    %18 = vector.shape_cast %17 : vector<1x80x4xbf16> to vector<80x4xbf16>
    %c0_16 = arith.constant 0 : index
    %c0_17 = arith.constant 0 : index
    %c0_18 = arith.constant 0 : index
    %19 = vector.load %arg6[%c0_16, %c0_17, %c0_18] : memref<9x4x128xbf16, #tpu.memory_space<vmem>>, vector<1x4x128xbf16>
    %20 = vector.shape_cast %19 : vector<1x4x128xbf16> to vector<4x128xbf16>
    %cst_19 = arith.constant dense<0.000000e+00> : vector<80x128xf32>
    %21 = tpu.matmul %18, %20, %cst_19 {dimension_numbers = #tpu.dot_dimension_numbers<[1], [0], [0], [1], [0, 0, 1, 1], [], []>} : vector<80x4xbf16>, vector<4x128xbf16>, vector<80x128xf32> -> vector<80x128xf32>
    %c1 = arith.constant 1 : index
    %c0_20 = arith.constant 0 : index
    %c0_21 = arith.constant 0 : index
    %22 = vector.load %arg13[%c1, %c0_20, %c0_21] : memref<4x100x4xbf16, #tpu.memory_space<vmem>>, vector<1x80x4xbf16>
    %23 = vector.shape_cast %22 : vector<1x80x4xbf16> to vector<80x4xbf16>
    %c1_22 = arith.constant 1 : index
    %c0_23 = arith.constant 0 : index
    %c0_24 = arith.constant 0 : index
    %24 = vector.load %arg6[%c1_22, %c0_23, %c0_24] : memref<9x4x128xbf16, #tpu.memory_space<vmem>>, vector<1x4x128xbf16>
    %25 = vector.shape_cast %24 : vector<1x4x128xbf16> to vector<4x128xbf16>
    %cst_25 = arith.constant dense<0.000000e+00> : vector<80x128xf32>
    %26 = tpu.matmul %23, %25, %cst_25 {dimension_numbers = #tpu.dot_dimension_numbers<[1], [0], [0], [1], [0, 0, 1, 1], [], []>} : vector<80x4xbf16>, vector<4x128xbf16>, vector<80x128xf32> -> vector<80x128xf32>
    %27 = arith.addf %21, %26 : vector<80x128xf32>
    %c0_26 = arith.constant 0 : index
    %c1_27 = arith.constant 1 : index
    %c0_28 = arith.constant 0 : index
    %28 = vector.load %arg13[%c0_26, %c1_27, %c0_28] : memref<4x100x4xbf16, #tpu.memory_space<vmem>>, vector<1x80x4xbf16>
    %29 = vector.shape_cast %28 : vector<1x80x4xbf16> to vector<80x4xbf16>
    %c2 = arith.constant 2 : index
    %c0_29 = arith.constant 0 : index
    %c0_30 = arith.constant 0 : index
    %30 = vector.load %arg6[%c2, %c0_29, %c0_30] : memref<9x4x128xbf16, #tpu.memory_space<vmem>>, vector<1x4x128xbf16>
    %31 = vector.shape_cast %30 : vector<1x4x128xbf16> to vector<4x128xbf16>
    %cst_31 = arith.constant dense<0.000000e+00> : vector<80x128xf32>
    %32 = tpu.matmul %29, %31, %cst_31 {dimension_numbers = #tpu.dot_dimension_numbers<[1], [0], [0], [1], [0, 0, 1, 1], [], []>} : vector<80x4xbf16>, vector<4x128xbf16>, vector<80x128xf32> -> vector<80x128xf32>
    %33 = arith.addf %27, %32 : vector<80x128xf32>
    %c2_32 = arith.constant 2 : index
    %c0_33 = arith.constant 0 : index
    %c0_34 = arith.constant 0 : index
    %34 = vector.load %arg13[%c2_32, %c0_33, %c0_34] : memref<4x100x4xbf16, #tpu.memory_space<vmem>>, vector<1x80x4xbf16>
    %35 = vector.shape_cast %34 : vector<1x80x4xbf16> to vector<80x4xbf16>
    %c3 = arith.constant 3 : index
    %c0_35 = arith.constant 0 : index
    %c0_36 = arith.constant 0 : index
    %36 = vector.load %arg6[%c3, %c0_35, %c0_36] : memref<9x4x128xbf16, #tpu.memory_space<vmem>>, vector<1x4x128xbf16>
    %37 = vector.shape_cast %36 : vector<1x4x128xbf16> to vector<4x128xbf16>
    %cst_37 = arith.constant dense<0.000000e+00> : vector<80x128xf32>
    %38 = tpu.matmul %35, %37, %cst_37 {dimension_numbers = #tpu.dot_dimension_numbers<[1], [0], [0], [1], [0, 0, 1, 1], [], []>} : vector<80x4xbf16>, vector<4x128xbf16>, vector<80x128xf32> -> vector<80x128xf32>
    %39 = arith.addf %33, %38 : vector<80x128xf32>
    %c3_38 = arith.constant 3 : index
    %c0_39 = arith.constant 0 : index
    %c0_40 = arith.constant 0 : index
    %40 = vector.load %arg13[%c3_38, %c0_39, %c0_40] : memref<4x100x4xbf16, #tpu.memory_space<vmem>>, vector<1x80x4xbf16>
    %41 = vector.shape_cast %40 : vector<1x80x4xbf16> to vector<80x4xbf16>
    %c4 = arith.constant 4 : index
    %c0_41 = arith.constant 0 : index
    %c0_42 = arith.constant 0 : index
    %42 = vector.load %arg6[%c4, %c0_41, %c0_42] : memref<9x4x128xbf16, #tpu.memory_space<vmem>>, vector<1x4x128xbf16>
    %43 = vector.shape_cast %42 : vector<1x4x128xbf16> to vector<4x128xbf16>
    %cst_43 = arith.constant dense<0.000000e+00> : vector<80x128xf32>
    %44 = tpu.matmul %41, %43, %cst_43 {dimension_numbers = #tpu.dot_dimension_numbers<[1], [0], [0], [1], [0, 0, 1, 1], [], []>} : vector<80x4xbf16>, vector<4x128xbf16>, vector<80x128xf32> -> vector<80x128xf32>
    %45 = arith.addf %39, %44 : vector<80x128xf32>
    %c2_44 = arith.constant 2 : index
    %c1_45 = arith.constant 1 : index
    %c0_46 = arith.constant 0 : index
    %46 = vector.load %arg13[%c2_44, %c1_45, %c0_46] : memref<4x100x4xbf16, #tpu.memory_space<vmem>>, vector<1x80x4xbf16>
    %47 = vector.shape_cast %46 : vector<1x80x4xbf16> to vector<80x4xbf16>
    %c5 = arith.constant 5 : index
    %c0_47 = arith.constant 0 : index
    %c0_48 = arith.constant 0 : index
    %48 = vector.load %arg6[%c5, %c0_47, %c0_48] : memref<9x4x128xbf16, #tpu.memory_space<vmem>>, vector<1x4x128xbf16>
    %49 = vector.shape_cast %48 : vector<1x4x128xbf16> to vector<4x128xbf16>
    %cst_49 = arith.constant dense<0.000000e+00> : vector<80x128xf32>
    %50 = tpu.matmul %47, %49, %cst_49 {dimension_numbers = #tpu.dot_dimension_numbers<[1], [0], [0], [1], [0, 0, 1, 1], [], []>} : vector<80x4xbf16>, vector<4x128xbf16>, vector<80x128xf32> -> vector<80x128xf32>
    %51 = arith.addf %45, %50 : vector<80x128xf32>
    %c0_50 = arith.constant 0 : index
    %c10 = arith.constant 10 : index
    %c0_51 = arith.constant 0 : index
    %52 = vector.load %arg13[%c0_50, %c10, %c0_51] : memref<4x100x4xbf16, #tpu.memory_space<vmem>>, vector<1x80x4xbf16>
    %53 = vector.shape_cast %52 : vector<1x80x4xbf16> to vector<80x4xbf16>
    %c6 = arith.constant 6 : index
    %c0_52 = arith.constant 0 : index
    %c0_53 = arith.constant 0 : index
    %54 = vector.load %arg6[%c6, %c0_52, %c0_53] : memref<9x4x128xbf16, #tpu.memory_space<vmem>>, vector<1x4x128xbf16>
    %55 = vector.shape_cast %54 : vector<1x4x128xbf16> to vector<4x128xbf16>
    %cst_54 = arith.constant dense<0.000000e+00> : vector<80x128xf32>
    %56 = tpu.matmul %53, %55, %cst_54 {dimension_numbers = #tpu.dot_dimension_numbers<[1], [0], [0], [1], [0, 0, 1, 1], [], []>} : vector<80x4xbf16>, vector<4x128xbf16>, vector<80x128xf32> -> vector<80x128xf32>
    %57 = arith.addf %51, %56 : vector<80x128xf32>
    %c1_55 = arith.constant 1 : index
    %c10_56 = arith.constant 10 : index
    %c0_57 = arith.constant 0 : index
    %58 = vector.load %arg13[%c1_55, %c10_56, %c0_57] : memref<4x100x4xbf16, #tpu.memory_space<vmem>>, vector<1x80x4xbf16>
    %59 = vector.shape_cast %58 : vector<1x80x4xbf16> to vector<80x4xbf16>
    %c7 = arith.constant 7 : index
    %c0_58 = arith.constant 0 : index
    %c0_59 = arith.constant 0 : index
    %60 = vector.load %arg6[%c7, %c0_58, %c0_59] : memref<9x4x128xbf16, #tpu.memory_space<vmem>>, vector<1x4x128xbf16>
    %61 = vector.shape_cast %60 : vector<1x4x128xbf16> to vector<4x128xbf16>
    %cst_60 = arith.constant dense<0.000000e+00> : vector<80x128xf32>
    %62 = tpu.matmul %59, %61, %cst_60 {dimension_numbers = #tpu.dot_dimension_numbers<[1], [0], [0], [1], [0, 0, 1, 1], [], []>} : vector<80x4xbf16>, vector<4x128xbf16>, vector<80x128xf32> -> vector<80x128xf32>
    %63 = arith.addf %57, %62 : vector<80x128xf32>
    %c0_61 = arith.constant 0 : index
    %c11 = arith.constant 11 : index
    %c0_62 = arith.constant 0 : index
    %64 = vector.load %arg13[%c0_61, %c11, %c0_62] : memref<4x100x4xbf16, #tpu.memory_space<vmem>>, vector<1x80x4xbf16>
    %65 = vector.shape_cast %64 : vector<1x80x4xbf16> to vector<80x4xbf16>
    %c8 = arith.constant 8 : index
    %c0_63 = arith.constant 0 : index
    %c0_64 = arith.constant 0 : index
    %66 = vector.load %arg6[%c8, %c0_63, %c0_64] : memref<9x4x128xbf16, #tpu.memory_space<vmem>>, vector<1x4x128xbf16>
    %67 = vector.shape_cast %66 : vector<1x4x128xbf16> to vector<4x128xbf16>
    %cst_65 = arith.constant dense<0.000000e+00> : vector<80x128xf32>
    %68 = tpu.matmul %65, %67, %cst_65 {dimension_numbers = #tpu.dot_dimension_numbers<[1], [0], [0], [1], [0, 0, 1, 1], [], []>} : vector<80x4xbf16>, vector<4x128xbf16>, vector<80x128xf32> -> vector<80x128xf32>
    %69 = arith.addf %63, %68 : vector<80x128xf32>
    %c0_66 = arith.constant 0 : index
    %c0_67 = arith.constant 0 : index
    %70 = vector.load %arg7[%c0_66, %c0_67] : memref<1x128xf32, #tpu.memory_space<vmem>>, vector<1x128xf32>
    %71 = vector.broadcast %70 : vector<1x128xf32> to vector<80x128xf32>
    %72 = arith.mulf %69, %71 : vector<80x128xf32>
    %c0_68 = arith.constant 0 : index
    %c0_69 = arith.constant 0 : index
    %73 = vector.load %arg8[%c0_68, %c0_69] : memref<1x128xf32, #tpu.memory_space<vmem>>, vector<1x128xf32>
    %74 = vector.broadcast %73 : vector<1x128xf32> to vector<80x128xf32>
    %75 = arith.addf %72, %74 : vector<80x128xf32>
    %cst_70 = arith.constant 0.000000e+00 : f32
    %76 = vector.broadcast %cst_70 : f32 to vector<80x128xf32>
    %77 = arith.maximumf %75, %76 : vector<80x128xf32>
    %c0_71 = arith.constant 0 : index
    %c0_72 = arith.constant 0 : index
    %78 = vector.load %arg9[%c0_71, %c0_72] : memref<80x1xf32, #tpu.memory_space<vmem>>, vector<80x1xf32>
    %79 = vector.broadcast %78 : vector<80x1xf32> to vector<80x128xf32>
    %80 = arith.mulf %77, %79 : vector<80x128xf32>
    %cst_73 = arith.constant 0.000000e+00 : bf16
    %81 = vector.broadcast %cst_73 : bf16 to vector<1x115x128xbf16>
    %c0_74 = arith.constant 0 : index
    %c0_75 = arith.constant 0 : index
    %c0_76 = arith.constant 0 : index
    %82 = vector.load %arg11[%c0_74, %c0_75, %c0_76] : memref<1x115x128xbf16, #tpu.memory_space<vmem>>, vector<1x115x128xbf16>
    tpu.vector_store %arg11[%c0_74, %c0_75, %c0_76], %81 {strides = array<i32>} : memref<1x115x128xbf16, #tpu.memory_space<vmem>>, vector<1x115x128xbf16>,
    %83 = arith.truncf %80 : vector<80x128xf32> to vector<80x128xbf16>
    %c0_77 = arith.constant 0 : index
    %c16 = arith.constant 16 : index
    %c0_78 = arith.constant 0 : index
    %84 = vector.load %arg11[%c0_77, %c16, %c0_78] : memref<1x115x128xbf16, #tpu.memory_space<vmem>>, vector<1x80x128xbf16>
    %85 = vector.shape_cast %84 : vector<1x80x128xbf16> to vector<80x128xbf16>
    %86 = vector.shape_cast %83 : vector<80x128xbf16> to vector<1x80x128xbf16>
    tpu.vector_store %arg11[%c0_77, %c16, %c0_78], %86 {strides = array<i32>} : memref<1x115x128xbf16, #tpu.memory_space<vmem>>, vector<1x80x128xbf16>,
    %c3_79 = arith.constant 3 : index
    %c0_80 = arith.constant 0 : index
    %c0_81 = arith.constant 0 : index
    %87 = vector.load %arg13[%c3_79, %c0_80, %c0_81] : memref<4x100x4xbf16, #tpu.memory_space<vmem>>, vector<1x80x4xbf16>
    %88 = vector.shape_cast %87 : vector<1x80x4xbf16> to vector<80x4xbf16>
    %c0_82 = arith.constant 0 : index
    %c0_83 = arith.constant 0 : index
    %89 = vector.load %arg10[%c0_82, %c0_83] : memref<4x128xbf16, #tpu.memory_space<vmem>>, vector<4x128xbf16>
    %cst_84 = arith.constant dense<0.000000e+00> : vector<80x128xf32>
    %90 = tpu.matmul %88, %89, %cst_84 {dimension_numbers = #tpu.dot_dimension_numbers<[1], [0], [0], [1], [0, 0, 1, 1], [], []>} : vector<80x4xbf16>, vector<4x128xbf16>, vector<80x128xf32> -> vector<80x128xf32>
    %c0_85 = arith.constant 0 : index
    %c0_86 = arith.constant 0 : index
    %c0_87 = arith.constant 0 : index
    %91 = vector.load %arg12[%c0_85, %c0_86, %c0_87] : memref<1x80x128xf32, #tpu.memory_space<vmem>>, vector<1x80x128xf32>
    %92 = vector.shape_cast %91 : vector<1x80x128xf32> to vector<80x128xf32>
    %93 = vector.shape_cast %90 : vector<80x128xf32> to vector<1x80x128xf32>
    tpu.vector_store %arg12[%c0_85, %c0_86, %c0_87], %93 {strides = array<i32>} : memref<1x80x128xf32, #tpu.memory_space<vmem>>, vector<1x80x128xf32>,
    return
  }
  func.func @transform_0(%arg0: i32, %arg1: i32) -> (i32, i32, i32, i32) {
    %c0_i32 = arith.constant 0 : i32
    %c0_i32_0 = arith.constant 0 : i32
    %c0_i32_1 = arith.constant 0 : i32
    %c0_i32_2 = arith.constant 0 : i32
    return %arg0, %c0_i32, %c0_i32_0, %c0_i32_1 : i32, i32, i32, i32
  }
  func.func @transform_1(%arg0: i32, %arg1: i32) -> (i32, i32, i32) {
    %c0_i32 = arith.constant 0 : i32
    %c0_i32_0 = arith.constant 0 : i32
    %c0_i32_1 = arith.constant 0 : i32
    %c0_i32_2 = arith.constant 0 : i32
    return %c0_i32, %c0_i32_0, %c0_i32_1 : i32, i32, i32
  }
  func.func @transform_2(%arg0: i32, %arg1: i32) -> (i32, i32) {
    %c0_i32 = arith.constant 0 : i32
    %c0_i32_0 = arith.constant 0 : i32
    %c0_i32_1 = arith.constant 0 : i32
    return %c0_i32, %c0_i32_0 : i32, i32
  }
  func.func @transform_3(%arg0: i32, %arg1: i32) -> (i32, i32) {
    %c0_i32 = arith.constant 0 : i32
    %c0_i32_0 = arith.constant 0 : i32
    %c0_i32_1 = arith.constant 0 : i32
    return %c0_i32, %c0_i32_0 : i32, i32
  }
  func.func @transform_4(%arg0: i32, %arg1: i32) -> (i32, i32, i32) {
    %c0_i32 = arith.constant 0 : i32
    %c0_i32_0 = arith.constant 0 : i32
    %c0_i32_1 = arith.constant 0 : i32
    return %c0_i32, %c0_i32_0, %arg1 : i32, i32, i32
  }
  func.func @transform_5(%arg0: i32, %arg1: i32) -> (i32, i32) {
    %c0_i32 = arith.constant 0 : i32
    %c0_i32_0 = arith.constant 0 : i32
    return %c0_i32, %arg1 : i32, i32
  }
  func.func @transform_6(%arg0: i32, %arg1: i32) -> (i32, i32) {
    %c0_i32 = arith.constant 0 : i32
    %c0_i32_0 = arith.constant 0 : i32
    return %c0_i32, %arg1 : i32, i32
  }
  func.func @transform_7(%arg0: i32, %arg1: i32) -> (i32, i32) {
    %c0_i32 = arith.constant 0 : i32
    %c0_i32_0 = arith.constant 0 : i32
    %c0_i32_1 = arith.constant 0 : i32
    return %c0_i32, %c0_i32_0 : i32, i32
  }
  func.func @transform_8(%arg0: i32, %arg1: i32) -> (i32, i32) {
    %c0_i32 = arith.constant 0 : i32
    %c0_i32_0 = arith.constant 0 : i32
    return %c0_i32, %arg1 : i32, i32
  }
  func.func @transform_9(%arg0: i32, %arg1: i32) -> (i32, i32, i32) {
    %c0_i32 = arith.constant 0 : i32
    %c0_i32_0 = arith.constant 0 : i32
    return %arg0, %c0_i32, %arg1 : i32, i32, i32
  }
  func.func @transform_10(%arg0: i32, %arg1: i32) -> (i32, i32, i32) {
    %c0_i32 = arith.constant 0 : i32
    %c0_i32_0 = arith.constant 0 : i32
    return %arg0, %c0_i32, %arg1 : i32, i32, i32
  }
}

</mosaic_0001>

<bundles_post_ra>
// kernel: basic_block_forward.3
= control target key start
LH: loop header
LB: loop body
LE: loop exit
PB: predicated region body
PF: predicated region fallthrough
CT: control target
= control target key end

     0   :  { %s4158_s0 = inlined_call_operand.hbm [shape: bf16[2,115,128], index: 0, kind: input, shape index: {}]   ;;  %s4159_s1 = inlined_call_operand.hbm [shape: bf16[9,128,128], index: 1, kind: input, shape index: {}]   ;;  %s4160_s2 = inlined_call_operand.hbm [shape: f32[2,80,128], index: 2, kind: input, shape index: {}]   ;;  %s4161_s3 = inlined_call_operand.hbm [shape: f32[2,80,128], index: 3, kind: output, shape index: {}]  }
   0x1   :  { %4171 = sst [smem:[#allocation13_spill]] %s4158_s0 }
   0x2   :  { %8 = vsyncpa [#allocation3], 0 }
   0x3   :  { %10 = vsyncpa [#allocation3 + $0x1], 0 }
   0x4   :  { %11 = vsyncpa [#allocation6], 0 }
   0x5   :  { %12 = vsyncpa [#allocation4], 0 }
   0x6   :  { %14 = vsyncpa [#allocation4 + $0x1], 0  ;;  %s3399_s12 = smov 0   ;;  %s3401_s13 = smov 0  }
   0x7   :  { %s3403_s14 = smov 0   ;;  %s3405_s15 = smov 0  }
   0x8   :  { %s3407_s16 = smov 0   ;;  %s3409_s17 = smov 0  }
   0x9 LB: > { %s32_s18 = sadd.s32 1, %s3361_s16  ;;  %s39_s19 = sadd.s32 1, %s3353_s14  ;;  %s3365_s17 = sphi %s3409_s17, %s20_s17   ;;  %s3361_s16 = sphi %s3407_s16, %s4195_s16   ;;  %s3357_s15 = sphi %s3405_s15, %s4194_s15   ;;  %s3353_s14 = sphi %s3403_s14, %s4193_s14   ;;  %s3349_s13 = sphi %s3401_s13, %s4192_s13   ;;  %s3345_s12 = sphi %s3399_s12, %s4191_s12  }
   0xa   : > { %p34_p0 = scmp.ge.s32.totalorder %s32_s18, 2  ;;  %p46_p1 = scmp.ne.s32.totalorder %s3353_s14, %s3349_s13 }
   0xb   : > { %p47_p2 = scmp.eq.s32.totalorder %s3365_s17, 0  ;;  %p3022_p6 = scmp.lt.s32.totalorder %s3365_s17, 2 }
   0xc   : > { %s4197_s18 = smov (%p34_p0, %s32_s18), 0  ;;  %s173_s21 = sand.u32 1, %s3365_s17  }
   0xd   : > { %p48_p3 = por %p47_p2, %p46_p1  ;;  %s36_s20 = ssub.s32 %s3361_s16, %s4197_s18 }
   0xe   : > { %p37_p5 = scmp.eq.s32.totalorder %s36_s20, 0  ;;  %s175_s22 = sand.u32 1, %s3353_s14  }
   0xf   : > { %s2989_s24 = smul.u32 60, %s175_s22  ;;  %p3449_p7 = pnand %p3022_p6, %p48_p3 }
  0x10   : > { %s3446_s23 = scalar_select %p37_p5, %s3353_s14, %s39_s19  }
  0x11   : > { %s2990_s25 = smul.u32 960, %s3361_s16  ;;  %s4173_s0 = sld [smem:[#allocation13_spill]] }
  0x12   : > { %s4172_s26 = scalar_select %p3449_p7, 1, 0 }
  0x13   : > { %s3453_s27 = smul.u32 80, %s175_s22  ;;  %s177_s4 = scalar_lea.vmem [#allocation2], %s2989_s24 }
  0x14   : > { %s184_s5 = sshll.u32 %s177_s4, 4  ;;  %s3462_s6 = scalar_lea.sflag [#allocation3], %s173_s21  ;;  %s3460_s5 = int_to_ptr.vmem [resolvable:$true] %s184_s5 }
  0x15   : > { %p4165_p9 = pneg %p3449_p7 }
  0x17   : > { %s3458_s30 = scalar_lea.hbm %s4173_s0, %s2990_s25  ;;  %s3192_s10 = scalar_lea.hbm %s4173_s0, 1920 }
  0x18   : > { %s3187_s7 = scalar_lea.hbm %s3458_s30, 960  ;;  %p3193_p12 = scmp.lt.u32.totalorder %s3458_s30, %s4173_s0 }
  0x19   : > { %p3188_p8 = scmp.ne.s32.totalorder %s3458_s30, %s3187_s7  ;;  %p3194_p13 = scmp.lt.u32.totalorder %s3192_s10, %s3187_s7 }
  0x1a   : > { %p3196_p2 = scmp.lt.u32.totalorder %s3187_s7, %s3458_s30 }
  0x1b   : > { %p3190_p10 = pnand %p4165_p9, %p3188_p8  ;;  %p3195_p0 = por %p3194_p13, %p3193_p12 }
  0x1d   : > { %p3191_p11 = pneg %p3190_p10  ;;  %p3197_p3 = por %p3196_p2, %p3195_p0 }
  0x1f   : > { %p3198_p5 = pnand %p3197_p3, %p3191_p11 }
  0x21   : > { %3201 = shalt.err (!%p3198_p5)
}
  0x22   : > { %s3202_s20 = scalar_lea.vmem %s3460_s5, 960  ;;  %s3367_s21 = smov [#allocation2]  }
  0x23   : > { %p3203_p6 = scmp.ne.s32.totalorder %s3460_s5, %s3202_s20  ;;  %s3207_s22 = sshll.u32 %s3367_s21, 4  ;;  %s3208_s22 = int_to_ptr.vmem [resolvable:$false] %s3207_s22 }
  0x24   : > { %s3209_s24 = scalar_lea.vmem %s3208_s22, 1920  ;;  %p3210_p4 = scmp.lt.s32.totalorder %s3460_s5, %s3208_s22 }
  0x25   : > { %p3205_p8 = pnand %p3203_p6, %p4165_p9  ;;  %p3211_p12 = scmp.lt.s32.totalorder %s3209_s24, %s3202_s20 }
  0x27   : > { %p3206_p10 = pneg %p3205_p8  ;;  %p3212_p13 = por %p3211_p12, %p3210_p4 }
  0x29   : > { %p3213_p0 = pnand %p3212_p13, %p3206_p10 }
  0x2b   : > { %3216 = shalt.err (!%p3213_p0)
}
  0x2c   : > { %s4162_s25 = smov 64   ;;  %s4163_s28 = smov 4  }
  0x2d   : > { %3013 = dma.hbm_to_vmem [thread:$0]  (!%p3449_p7), %s3458_s30, 960, %s3460_s5, %s3462_s6, %s4162_s25, %s4162_s25, %s4163_s28  }
  0x2e   : > { %s3494_s29 = sadd.s32 4294967295, %s3365_s17   ;;  %s2260_s4 = sadd.s32 4294967294, %s3365_s17  }
  0x2f   : > { %p52_p4 = scmp.ne.s32.totalorder %s3349_s13, %s3345_s12  ;;  %p4164_p11 = scmp.eq.s32.totalorder %s3494_s29, 0 }
  0x30   : > { %p132_p2 = scmp.eq.s32.totalorder %s3494_s29, 1  ;;  %p138_p3 = scmp.eq.s32.totalorder %s2260_s4, 1 }
  0x31   : > { %p2261_p5 = scmp.ge.s32.totalorder %s3365_s17, 1  ;;  %p3504_p6 = por %p4164_p11, %p52_p4 }
  0x32   : > { %p3511_p8 = por %p132_p2, %p46_p1  ;;  %p3515_p10 = por %p138_p3, %p52_p4 }
  0x33   : > { %s4174_s7 = scalar_select %p3504_p6, 1, 0 }
  0x34   : > { %s4175_s30 = scalar_select %p3511_p8, 1, 0 }
  0x35   : > { %s4176_s5 = scalar_select %p3515_p10, 1, 0 }
  0x36   : > { %p145_p12 = scmp.lt.s32.totalorder %s3365_s17, 3  ;;  %s3370_s9 = smov [#allocation5]  }
  0x37   : > { %s159_s10 = sshll.u32 %s3370_s9, 4  ;;  %s2992_s11 = smul.u32 1280, %s3361_s16  ;;  %s160_s10 = int_to_ptr.vmem [resolvable:$true] %s159_s10 }
  0x38   : > { %p3520_p13 = pnand %p2261_p5, %p145_p12  ;;  %s198_s19 = scalar_lea.vmem [#allocation7], %s3453_s27 }
  0x39   : > { %s206_s20 = sshll.u32 %s198_s19, 4  ;;  %s3531_s24 = scalar_lea.hbm %s4160_s2, %s2992_s11  ;;  %s3539_s20 = int_to_ptr.vmem [resolvable:$true] %s206_s20 }
  0x3a   : > { %s4177_s8 = scalar_select %p3520_p13, 1, 0 }
  0x3b   : > { %p3006_p0 = pneg %p3520_p13  ;;  %s3217_s28 = scalar_lea.hbm %s4159_s1, 9216 }
  0x3c   : > { %p3218_p4 = scmp.ne.s32.totalorder %s4159_s1, %s3217_s28  ;;  %p3224_p12 = scmp.lt.u32.totalorder %s3217_s28, %s4159_s1 }
  0x3d   : > { %p3535_p1 = pnand %p3006_p0, %p4164_p11 }
  0x3f   : > { %p3219_p2 = pneg %p3535_p1 }
  0x41   : > { %p3220_p3 = pnand %p3219_p2, %p3218_p4 }
  0x43   : > { %p3221_p5 = pneg %p3220_p3 }
  0x45   : > { %p3226_p0 = pnand %p3224_p12, %p3221_p5 }
  0x47   : > { %3229 = shalt.err (!%p3226_p0)
}
  0x48   : > { %s3230_s22 = scalar_lea.vmem %s160_s10, 9216  ;;  %p3238_p8 = scmp.lt.s32.totalorder %s160_s10, %s160_s10 }
  0x49   : > { %p3231_p11 = scmp.ne.s32.totalorder %s160_s10, %s3230_s22  ;;  %p3239_p6 = scmp.lt.s32.totalorder %s3230_s22, %s3230_s22 }
  0x4b   : > { %p3233_p9 = pnand %p3231_p11, %p3219_p2  ;;  %p3240_p13 = por %p3239_p6, %p3238_p8 }
  0x4d   : > { %p3234_p10 = pneg %p3233_p9 }
  0x4f   : > { %p3241_p7 = pnand %p3240_p13, %p3234_p10 }
  0x51   : > { %3244 = shalt.err (!%p3241_p7)
}
  0x52   : > { %s4179_s25 = smov 4   ;;  %s4180_s9 = smov 64  }
  0x53   : > { %3009 = dma.hbm_to_vmem [thread:$0]  (!%p3535_p1), %s4159_s1, 9216, %s160_s10, [#allocation6], %s4180_s9, %s4180_s9, %s4179_s25  }
  0x54   : > { %s3245_s28 = scalar_lea.hbm %s3531_s24, 1280  ;;  %p4181_p11 = scmp.ne.s32.totalorder %s4172_s26, 0 }
  0x55   : > { %p3246_p9 = scmp.ne.s32.totalorder %s3531_s24, %s3245_s28  ;;  %s3250_s21 = scalar_lea.hbm %s4160_s2, 2560 }
  0x56   : > { %p4182_p6 = pneg %p4181_p11  ;;  %p3251_p10 = scmp.lt.u32.totalorder %s3531_s24, %s4160_s2 }
  0x57   : > { %p3252_p13 = scmp.lt.u32.totalorder %s3250_s21, %s3245_s28  ;;  %p3254_p2 = scmp.lt.u32.totalorder %s3245_s28, %s3531_s24 }
  0x58   : > { %p3248_p8 = pnand %p3246_p9, %p4182_p6 }
  0x59   : > { %p3253_p4 = por %p3252_p13, %p3251_p10 }
  0x5a   : > { %p3249_p7 = pneg %p3248_p8 }
  0x5b   : > { %p3255_p3 = por %p3254_p2, %p3253_p4 }
  0x5d   : > { %p3256_p5 = pnand %p3255_p3, %p3249_p7 }
  0x5f   : > { %3259 = shalt.err (!%p3256_p5)
}
  0x60   : > { %s3260_s10 = scalar_lea.vmem %s3539_s20, 1280  ;;  %p4183_p12 = pmov %p4182_p6 }
  0x61   : > { %p3261_p1 = scmp.ne.s32.totalorder %s3539_s20, %s3260_s10  ;;  %s3371_s25 = smov [#allocation7]  }
  0x62   : > { %s3265_s9 = sshll.u32 %s3371_s25, 4  ;;  %s3266_s9 = int_to_ptr.vmem [resolvable:$false] %s3265_s9 }
  0x63   : > { %p3263_p0 = pnand %p3261_p1, %p4183_p12  ;;  %s3267_s0 = scalar_lea.vmem %s3266_s9, 2560 }
  0x64   : > { %p3268_p6 = scmp.lt.s32.totalorder %s3539_s20, %s3266_s9  ;;  %p3269_p8 = scmp.lt.s32.totalorder %s3267_s0, %s3260_s10 }
  0x65   : > { %p3264_p9 = pneg %p3263_p0 }
  0x66   : > { %p3270_p10 = por %p3269_p8, %p3268_p6 }
  0x68   : > { %p3271_p13 = pnand %p3270_p10, %p3264_p9 }
  0x6a   : > { %3274 = shalt.err (!%p3271_p13)
}
  0x6b   : > { %s3372_s27 = smov 128   ;;  %s3373_s19 = smov 8  }
  0x6c   : > { %3016 = dma.hbm_to_vmem [thread:$0]  (!%p4181_p11), %s3531_s24, 1280, %s3539_s20, %s3462_s6, %s3372_s27, %s3372_s27, %s3373_s19  }
  0x6d   : > { %p4184_p7 = scmp.ne.s32.totalorder %s4177_s8, 0 }
  0x6e   : > { %s220_s28 = sand.u32 (!%p4184_p7), 1, %s3494_s29   ;;  %s3588_s11 = sand.u32 (!%p4184_p7), 1, %s3349_s13  }
  0x6f   : > { %218 = sbr.rel (%p4184_p7) target bundleno = 568 (0x238), region = 32  ;;  %s221_s21 = scalar_lea.sflag (!%p4184_p7), [#allocation3], %s220_s28 }
  0x70   : > { %s2993_s4 = smul.u32 (!%p4184_p7), 60, %s3588_s11  ;;  %p4185_p4 = scmp.ne.s32.totalorder (!%p4184_p7), %s4174_s7, 0 }
  0x72   : > { %s3591_s22 = scalar_lea.vmem (!%p4184_p7), [#allocation2], %s2993_s4 }
  0x76   : > { %3328 = dma.done.wait (%p4185_p4), %s221_s21, 960  }
  0x77   : > { %3330 = vsyncadd (%p4185_p4), %s221_s21, 4294966336  ;;  %p4186_p11 = scmp.eq.s32.totalorder %s3494_s29, 0 }
  0x79   : > { %3332 = dma.done.wait (%p4186_p11), [#allocation6], 9216   ;;  %p4187_p2 = pmov %p4186_p11 }
  0x7a   : > { %s2994_s26 = smul.u32 80, %s3588_s11 }
  0x7b   : > { %3334 = vsyncadd (%p4187_p2), [#allocation6], 4294958080 }
  0x7c   : > { %s3604_s6 = scalar_lea.vmem [#allocation7], %s2994_s26 }
  0x7d   : > { %3336 = dma.done.wait (%p4185_p4), %s221_s21, 1280  }
  0x7e   : > { %3338 = vsyncadd (%p4185_p4), %s221_s21, 4294966016  ;;  %v3374_v0 = vmov 0.0   ;;  %vm3375_vm0 = vmmov 0   ;;  %v3082_v1 = vld [vmem:[#allocation5] sm:$0xff]   ;;  %v3084_v3 = vld [vmem:[#allocation5 + $0x8] sm:$0xff]   ;;  %vm542_vm3 = vcmask 1044480  }
  0x7f   : > { %2493 = vmatprep.subr.bf16.mxu1 %v3374_v0  ;;  %2637 = vmatprep.subr.bf16.mxu0 %v3374_v0  ;;  %v3083_v2 = vld [vmem:[#allocation5 + $0x100] sm:$0xff]   ;;  %v3085_v4 = vld [vmem:[#allocation5 + $0x108] sm:$0xff]   ;;  %v3086_v5 = vld [vmem:[#allocation5 + $0x10] sm:$0xff]   ;;  %vm331_vm1 = vsmask.f32 5376  ;;  %vm1778_vm6 = vcmask 1046528  }
  0x80   : > { %2509 = vmatprep.mubr.msk.bf16.mxu1 %vm3375_vm0, %v3374_v0  ;;  %2653 = vmatprep.mubr.msk.bf16.mxu0 %vm3375_vm0, %v3374_v0  ;;  %v3087_v6 = vld [vmem:[#allocation5 + $0x110] sm:$0xff]   ;;  %v3088_v7 = vld [vmem:[#allocation5 + $0x18] sm:$0xff]   ;;  %v3090_v9 = vld [vmem:[#allocation5 + $0x20] sm:$0xff]   ;;  %vm711_vm2 = vsmask.f32 4352  ;;  %s4084_s29 = scalar_lea.vmem [#allocation8], %s2994_s26 }
  0x81   : > { %2494 = vmatpush3.bf16.msra.mxu1 %v3082_v1  ;;  %2638 = vmatpush3.bf16.msra.mxu0 %v3083_v2  ;;  %v3089_v8 = vld [vmem:[#allocation5 + $0x118] sm:$0xff]   ;;  %v3091_v10 = vld [vmem:[#allocation5 + $0x120] sm:$0xff]   ;;  %v3626_v12 = vld [vmem:[%s3591_s22 + $0x4] sm:$0xf]  ;;  %vm1340_vm4 = vsmask.f32 7424 }
  0x82   : > { %2495 = vmatprep.subr.bf16.mxu1 %v3374_v0  ;;  %2639 = vmatprep.subr.bf16.mxu0 %v3374_v0  ;;  %v276_v11 = vld [vmem:[%s3591_s22] sm:$0xc]  ;;  %v3630_v15 = vld [vmem:[%s3591_s22 + $0x8] sm:$0xff]   ;;  %v881_v17 = vld [vmem:[%s3591_s22 + $0x4] sm:$0x8]  ;;  %s2995_s7 = smul.u32 1280, %s3357_s15 }
  0x83   : > { %v3092_v13 = vld [vmem:[#allocation5 + $0x28] sm:$0xff]   ;;  %v2268_v14 = vcombine.low %v276_v11, %v3626_v12  ;;  %v341_v21 = vshrl.u32 %v3630_v15, 16  ;;  %v344_v22 = vshll.u32 %v3630_v15, 16  ;;  %v3094_v24 = vld [vmem:[#allocation5 + $0x30] sm:$0xff]   ;;  %v3096_v39 = vld [vmem:[#allocation5 + $0x38] sm:$0xff]   ;;  %s2142_s8 = sshll.u32 %s4084_s29, 4  ;;  %s4107_s8 = int_to_ptr.vmem [resolvable:$true] %s2142_s8 }
  0x84   : > { %v3093_v16 = vld [vmem:[#allocation5 + $0x128] sm:$0xff]   ;;  %v3646_v31 = vld [vmem:[%s3591_s22 + $0x10] sm:$0xff]   ;;  %v883_v33 = vld [vmem:[%s3591_s22 + $0xc] sm:$0xf]  ;;  %vm1947_vm5 = vsmask.f32 6400  ;;  %s4105_s10 = scalar_lea.hbm %s4161_s3, %s2995_s7 }
  0x85   : > { %2496 = vmatpush3.bf16.msra.mxu1 %v3084_v3  ;;  %2640 = vmatpush3.bf16.msra.mxu0 %v3085_v4  ;;  %v3634_v18 = vld [vmem:[%s3591_s22 + $0x8] sm:$0xf]  ;;  %v333_v19 = vshrl.u32 %v2268_v14, 16  ;;  %v336_v20 = vshll.u32 %v2268_v14, 16  ;;  %v343_v27 = vrot.slane %v341_v21, 2  ;;  %v346_v28 = vrot.slane %v344_v22, 3 }
  0x86   : > { %2497 = vmatprep.subr.bf16.mxu1 %v3374_v0  ;;  %2641 = vmatprep.subr.bf16.mxu0 %v3374_v0  ;;  %v2300_v23 = vcombine.low %v881_v17, %v3634_v18  ;;  %v3095_v32 = vld [vmem:[#allocation5 + $0x130] sm:$0xff]   ;;  %v350_v37 = vshrl.u32 %v3646_v31, 16  ;;  %v3097_v40 = vld [vmem:[#allocation5 + $0x138] sm:$0xff]   ;;  %v353_v43 = vshll.u32 %v3646_v31, 16  ;;  %v2314_v53 = vcombine.low %v3634_v18, %v883_v33  ;;  %v3103_v57 = vld [vmem:[#allocation5 + $0x140] sm:$0xff]   ;;  %s2128_s15 = scalar_lea.sflag [#allocation4], %s3588_s11 }
  0x87   : > { %v335_v25 = vrot.slane %v333_v19, 2  ;;  %v338_v26 = vrot.slane %v336_v20, 3  ;;  %v3652_v35 = vld [vmem:[%s3591_s22 + $0x10] sm:$0xf]  ;;  %v347_v42 = vor.u32 %v346_v28, %v343_v27  ;;  %v885_v46 = vld [vmem:[%s3591_s22 + $0x14] sm:$0xf] }
  0x88   : > { %v938_v29 = vshrl.u32 %v2300_v23, 16  ;;  %v941_v30 = vshll.u32 %v2300_v23, 16  ;;  %v2301_v38 = vcombine.low %v883_v33, %v3652_v35  ;;  %v352_v47 = vrot.slane %v350_v37, 2  ;;  %v3663_v50 = vld [vmem:[%s3591_s22 + $0x18] sm:$0xf]  ;;  %v3104_v60 = vld [vmem:[#allocation5 + $0x148] sm:$0xff]  }
  0x89   : > { %2498 = vmatpush3.bf16.msra.mxu1 %v3086_v5  ;;  %2642 = vmatpush3.bf16.msra.mxu0 %v3087_v6  ;;  %v339_v41 = vor.u32 %v338_v26, %v335_v25  ;;  %v355_v54 = vrot.slane %v353_v43, 3  ;;  %v3670_v55 = vld [vmem:[%s3591_s22 + $0x18] sm:$0xff]   ;;  %v3673_v56 = vcombine.low %v885_v46, %v3663_v50  ;;  %v3691_v3 = vld [vmem:[%s3591_s22 + $0x20] sm:$0xff]   ;;  %v3109_v11 = vld [vmem:[#allocation5 + $0x150] sm:$0xff]   ;;  %s3275_s25 = scalar_lea.vmem %s4107_s8, 1280  ;;  %p4188_p5 = scmp.ne.s32.totalorder %s4175_s30, 0 }
  0x8a   : > { %2499 = vmatprep.subr.bf16.mxu1 %v3374_v0  ;;  %2643 = vmatprep.subr.bf16.mxu0 %v3374_v0  ;;  %v940_v34 = vrot.slane %v938_v29, 3  ;;  %v943_v36 = vrot.slane %v941_v30, 4  ;;  %v946_v44 = vshrl.u32 %v2301_v38, 16  ;;  %v949_v45 = vshll.u32 %v2301_v38, 16  ;;  %v3108_v59 = vld [vmem:[#allocation5 + $0x40] sm:$0xff]   ;;  %v3110_v5 = vld [vmem:[#allocation5 + $0x48] sm:$0xff]   ;;  %p3276_p3 = scmp.ne.s32.totalorder %s4107_s8, %s3275_s25 }
  0x8b   : > { %v348_v52 = vsel %vm331_vm1, %v339_v41, %v347_v42  ;;  %v887_v61 = vld [vmem:[%s3591_s22 + $0x1c] sm:$0xf]  ;;  %v356_v63 = vor.u32 %v355_v54, %v352_v47  ;;  %v359_v1 = vshrl.u32 %v3670_v55, 16  ;;  %v362_v2 = vshll.u32 %v3670_v55, 16  ;;  %v3694_v4 = vld [vmem:[%s3591_s22 + $0x20] sm:$0xf] }
  0x8c   : > { %v948_v48 = vrot.slane %v946_v44, 3  ;;  %v951_v49 = vrot.slane %v949_v45, 4  ;;  %v944_v51 = vor.u32 %v943_v36, %v940_v34  ;;  %v3698_v6 = vcombine.low %v887_v61, %v3694_v4  ;;  %v889_v17 = vld [vmem:[%s3591_s22 + $0x24] sm:$0xf]  ;;  %v3713_v18 = vld [vmem:[%s3591_s22 + $0x28] sm:$0xf]  ;;  %p3277_p1 = pnand %p3276_p3, %p4188_p5 }
  0x8d   : > { %2500 = vmatpush3.bf16.msra.mxu1 %v3088_v7  ;;  %2644 = vmatpush3.bf16.msra.mxu0 %v3089_v8  ;;  %v357_v7 = vsel %vm331_vm1, %v347_v42, %v356_v63  ;;  %v2315_v8 = vcombine.low %v3652_v35, %v885_v46  ;;  %v368_v14 = vshrl.u32 %v3691_v3, 16  ;;  %v3718_v20 = vcombine.low %v889_v17, %v3713_v18  ;;  %v3114_v23 = vld [vmem:[#allocation5 + $0x158] sm:$0xff]   ;;  %v3729_v27 = vld [vmem:[%s3591_s22 + $0x28] ss:$0 sps:$4 sm:$0x77]   ;;  %v3117_v30 = vld [vmem:[#allocation5 + $0x160] sm:$0xff]  }
  0x8e   : > { %2501 = vmatprep.subr.bf16.mxu1 %v3374_v0  ;;  %2645 = vmatprep.subr.bf16.mxu0 %v3374_v0  ;;  %v3676_v58 = vor.u32 %v951_v49, %v948_v48  ;;  %v2316_v29 = vcombine.low %v3663_v50, %v887_v61  ;;  %v377_v33 = vshrl.u32 %v3729_v27, 16  ;;  %v380_v34 = vshll.u32 %v3729_v27, 16  ;;  %v3122_v36 = vld [vmem:[#allocation5 + $0x168] sm:$0xff]   ;;  %v3129_v47 = vld [vmem:[#allocation5 + $0x70] sm:$0xff]   ;;  %v3130_v50 = vld [vmem:[#allocation5 + $0x178] sm:$0xff]   ;;  %p3278_p12 = pneg %p3277_p1  ;;  %s3376_s9 = smov [#allocation8]  }
  0x8f   : > { %v370_v25 = vrot.slane %v368_v14, 2  ;;  %v3123_v38 = vld [vmem:[#allocation5 + $0x68] sm:$0xff]   ;;  %v2317_v41 = vcombine.low %v3694_v4, %v889_v17  ;;  %v3750_v48 = vld [vmem:[%s3591_s22 + $0x2c] sm:$0xf]  ;;  %v3131_v54 = vld [vmem:[#allocation5 + $0x78] sm:$0xff]   ;;  %s3279_s0 = sshll.u32 %s3376_s9, 4  ;;  %s3280_s0 = int_to_ptr.vmem [resolvable:$false] %s3279_s0 }
  0x90   : > { %v3682_v62 = vsel %vm711_vm2, %v944_v51, %v3676_v58  ;;  %v379_v42 = vrot.slane %v377_v33, 2  ;;  %v382_v44 = vrot.slane %v380_v34, 3  ;;  %v3132_v45 = vld [vmem:[%s3591_s22 + $0x8] sm:$0xff]   ;;  %v521_v46 = vld [vmem:[%s3591_s22] sm:$0x8]  ;;  %v720_v51 = vrot.slane %v341_v21, 3  ;;  %p3282_p0 = scmp.lt.s32.totalorder %s4107_s8, %s3280_s0 }
  0x91   : > { %2502 = vmatpush3.bf16.msra.mxu1 %v3090_v9  ;;  %2646 = vmatpush3.bf16.msra.mxu0 %v3091_v10  ;;  %v361_v9 = vrot.slane %v359_v1, 2  ;;  %v364_v10 = vrot.slane %v362_v2, 3  ;;  %v1342_v61 = vshrl.u32 %v3132_v45, 16  ;;  %v3138_v33 = vld [vmem:[#allocation5 + $0x190] sm:$0xff]   ;;  %s3281_s27 = scalar_lea.vmem %s3280_s0, 2560 }
  0x92   : > { %2503 = vmatprep.subr.bf16.mxu1 %v3374_v0  ;;  %2647 = vmatprep.subr.bf16.mxu0 %v3374_v0  ;;  %v383_v49 = vor.u32 %v382_v44, %v379_v42  ;;  %v548_v42 = vrot.slane %v3670_v55, 3  ;;  %v3824_v55 = vld [vmem:[%s3591_s22 + $0x28] sm:$0xff]   ;;  %p3283_p9 = scmp.lt.s32.totalorder %s3281_s27, %s3275_s25 }
  0x93   : > { %v365_v19 = vor.u32 %v364_v10, %v361_v9  ;;  %v3136_v10 = vld [vmem:[%s3591_s22 + $0x18] sm:$0xff]  }
  0x94   : > { %p3284_p6 = por %p3283_p9, %p3282_p0 }
  0x95   : > { %2504 = vmatpush3.bf16.msra.mxu1 %v3092_v13  ;;  %2648 = vmatpush3.bf16.msra.mxu0 %v3093_v16  ;;  %v3115_v13 = vld [vmem:[#allocation5 + $0x50] sm:$0xff]   ;;  %v371_v16 = vshll.u32 %v3691_v3, 16  ;;  %v366_v28 = vsel %vm331_vm1, %v356_v63, %v365_v19 }
  0x96   : > { %2505 = vmatprep.subr.bf16.mxu1 %v3374_v0  ;;  %2649 = vmatprep.subr.bf16.mxu0 %v3374_v0  ;;  %p3285_p8 = pnand %p3284_p6, %p3278_p12 }
  0x97   : > { %v373_v26 = vrot.slane %v371_v16, 3  ;;  %v733_v44 = vrot.slane %v371_v16, 4 }
  0x99   : > { %2506 = vmatpush3.bf16.msra.mxu1 %v3094_v24  ;;  %2650 = vmatpush3.bf16.msra.mxu0 %v3095_v32  ;;  %v3116_v24 = vld [vmem:[#allocation5 + $0x58] sm:$0xff]   ;;  %v3121_v32 = vld [vmem:[#allocation5 + $0x60] sm:$0xff]   ;;  %v374_v35 = vor.u32 %v373_v26, %v370_v25  ;;  %v3135_v26 = vld [vmem:[#allocation5 + $0x188] sm:$0xff]  }
  0x9a   : > { %2507 = vmatprep.subr.bf16.mxu1 %v3374_v0  ;;  %2651 = vmatprep.subr.bf16.mxu0 %v3374_v0 }
  0x9b   : > { %v384_v21 = vsel %vm331_vm1, %v374_v35, %v383_v49 }
  0x9d   : > { %2508 = vmatpush3.bf16.msra.mxu1 %v3096_v39  ;;  %2652 = vmatpush3.bf16.msra.mxu0 %v3097_v40  ;;  %v3124_v39 = vld [vmem:[#allocation5 + $0x170] sm:$0xff]   ;;  %v375_v40 = vsel %vm331_vm1, %v365_v19, %v374_v35  ;;  %v1357_v19 = vshll.u32 %v3136_v10, 16 }
  0x9e   : > { %2529 = vmatprep.subr.bf16.mxu1 %v3374_v0  ;;  %2673 = vmatprep.subr.bf16.mxu0 %v3374_v0 }
  0xa0   : > { %2510 = vmatmul.mubr.bf16.vlgmr.msra.gmra.mrb[0].mxu1 %v348_v52  ;;  %2654 = vmatmul.mubr.bf16.vlgmr.msra.gmra.mrb[0].mxu0 %v2314_v53  ;;  %v3133_v52 = vld [vmem:[%s3591_s22 + $0x10] sm:$0xff]   ;;  %v1344_v53 = vshll.u32 %v3132_v45, 16  ;;  %v958_v45 = vshll.u32 %v3673_v56, 16 }
  0xa1   : > { %2513 = vmatprep.mubr.msk.bf16.mxu1 %vm3375_vm0, %v3374_v0  ;;  %2674 = vmatpush3.bf16.msra.mxu0 %v3103_v57  ;;  %v721_v57 = vrot.slane %v344_v22, 4  ;;  %v544_v22 = vrot.slane %v3630_v15, 3 }
  0xa2   : > { %2657 = vmatprep.mubr.msk.bf16.mxu0 %vm3375_vm0, %v3374_v0  ;;  %2675 = vmatprep.subr.bf16.mxu0 %v3374_v0  ;;  %v1346_v4 = vrot.slane %v1344_v53, 1 }
  0xa3   : > { %2530 = vmatpush3.bf16.msra.mxu1 %v3108_v59  ;;  %v3763_v59 = vcombine.low %v521_v46, %v3626_v12  ;;  %v3769_v63 = vor.u32 %v721_v57, %v720_v51  ;;  %v3141_v46 = vld [vmem:[#allocation5 + $0x198] sm:$0xff]   ;;  %v3833_v51 = vcombine.low %v3750_v48, %v3750_v48 }
  0xa4   : > { %2531 = vmatprep.subr.bf16.mxu1 %v3374_v0 }
  0xa5   : > { %2676 = vmatpush3.bf16.msra.mxu0 %v3104_v60  ;;  %v2318_v60 = vcombine.low %v3713_v18, %v3750_v48  ;;  %v543_v12 = vrot.slane %v3763_v59, 3  ;;  %v1353_v18 = vshrl.u32 %v3133_v52, 16  ;;  %v713_v16 = vshrl.u32 %v3763_v59, 16 }
  0xa6   : > { %2677 = vmatprep.subr.bf16.mxu0 %v3374_v0  ;;  %v1373_v48 = vshll.u32 %v3824_v55, 16 }
  0xa7   : > { %2532 = vmatpush3.bf16.msra.mxu1 %v3110_v5  ;;  %v1349_v5 = vshll.u32 %v3133_v52, 16  ;;  %v545_v15 = vsel %vm542_vm3, %v543_v12, %v544_v22  ;;  %v716_v52 = vshll.u32 %v3763_v59, 16  ;;  %v976_v59 = vshll.u32 %v3718_v20, 16  ;;  %v3146_v12 = vld [vmem:[#allocation5 + $0xa0] sm:$0xff]  }
  0xa8   : > { %2514 = vmatmul.mubr.bf16.gmra.mrb[4].mxu1 %v357_v7  ;;  %2533 = vmatprep.subr.bf16.mxu1 %v3374_v0  ;;  %v724_v7 = vrot.slane %v350_v37, 3 }
  0xa9   : > { %2658 = vmatmul.mubr.bf16.gmra.mrb[4].mxu0 %v2315_v8  ;;  %2517 = vmatprep.mubr.msk.bf16.mxu1 %vm3375_vm0, %v3374_v0  ;;  %v1347_v8 = vor.u32 %v1346_v4, %v1342_v61  ;;  %v1351_v9 = vrot.slane %v1349_v5, 1  ;;  %v3144_v61 = vld [vmem:[#allocation5 + $0x1a0] sm:$0xff]   ;;  %v967_v4 = vshll.u32 %v3698_v6, 16  ;;  %v973_v5 = vshrl.u32 %v3718_v20, 16 }
  0xaa   : > { %2678 = vmatpush3.bf16.msra.mxu0 %v3109_v11  ;;  %2661 = vmatprep.mubr.msk.bf16.mxu0 %vm3375_vm0, %v3374_v0  ;;  %v725_v11 = vrot.slane %v353_v43, 4  ;;  %v546_v43 = vrot.slane %v3646_v31, 3  ;;  %v552_v20 = vrot.slane %v3729_v27, 3 }
  0xab   : > { %2679 = vmatprep.subr.bf16.mxu0 %v3374_v0  ;;  %2534 = vmatpush3.bf16.msra.mxu1 %v3115_v13  ;;  %v3134_v13 = vld [vmem:[#allocation5 + $0x180] sm:$0xff]   ;;  %v1352_v37 = vsel %vm1340_vm4, %v1347_v8, %v1351_v9 }
  0xac   : > { %2535 = vmatprep.subr.bf16.mxu1 %v3374_v0  ;;  %v726_v17 = vor.u32 %v725_v11, %v724_v7  ;;  %v547_v34 = vsel %vm542_vm3, %v544_v22, %v546_v43  ;;  %v982_v22 = vshrl.u32 %v3833_v51, 16  ;;  %v985_v7 = vshll.u32 %v3833_v51, 16  ;;  %v3148_v11 = vld [vmem:[#allocation5 + $0xa8] sm:$0xff]  }
  0xae   : > { %2680 = vmatpush3.bf16.msra.mxu0 %v3114_v23  ;;  %v3137_v23 = vld [vmem:[#allocation5 + $0x80] sm:$0xff]   ;;  %v3790_v25 = vsel %vm711_vm2, %v3769_v63, %v726_v17 }
  0xaf   : > { %2681 = vmatprep.subr.bf16.mxu0 %v3374_v0  ;;  %2536 = vmatpush3.bf16.msra.mxu1 %v3116_v24  ;;  %v728_v24 = vrot.slane %v359_v1, 3  ;;  %v1355_v1 = vor.u32 %v1353_v18, %v1351_v9  ;;  %v1375_v9 = vrot.slane %v1373_v48, 1  ;;  %v3868_v18 = vrot.slane %v716_v52, 4 }
  0xb0   : > { %2518 = vmatmul.mubr.bf16.gmra.mrb[8].mxu1 %v366_v28  ;;  %2537 = vmatprep.subr.bf16.mxu1 %v3374_v0  ;;  %v729_v28 = vrot.slane %v362_v2, 4 }
  0xb1   : > { %2662 = vmatmul.mubr.bf16.gmra.mrb[8].mxu0 %v2316_v29  ;;  %2521 = vmatprep.mubr.msk.bf16.mxu1 %vm3375_vm0, %v3374_v0  ;;  %v1359_v29 = vrot.slane %v1357_v19, 1  ;;  %v960_v19 = vrot.slane %v958_v45, 4 }
  0xb2   : > { %2682 = vmatpush3.bf16.msra.mxu0 %v3117_v30  ;;  %2665 = vmatprep.mubr.msk.bf16.mxu0 %vm3375_vm0, %v3374_v0  ;;  %v3139_v30 = vld [vmem:[#allocation5 + $0x88] sm:$0xff]   ;;  %v730_v31 = vor.u32 %v729_v28, %v728_v24  ;;  %v3149_v24 = vld [vmem:[#allocation5 + $0x1b0] sm:$0xff]  }
  0xb3   : > { %2538 = vmatpush3.bf16.msra.mxu1 %v3121_v32  ;;  %2683 = vmatprep.subr.bf16.mxu0 %v3374_v0  ;;  %v3800_v32 = vld [vmem:[%s3591_s22 + $0x20] sm:$0xff]   ;;  %v1360_v35 = vsel %vm1340_vm4, %v1355_v1, %v1359_v29  ;;  %v3151_v1 = vld [vmem:[#allocation5 + $0xb0] sm:$0xff]  }
  0xb4   : > { %2539 = vmatprep.subr.bf16.mxu1 %v3374_v0  ;;  %v3806_v2 = vsel %vm711_vm2, %v726_v17, %v730_v31  ;;  %v1369_v57 = vshrl.u32 %v3800_v32, 16  ;;  %v3862_v17 = vld [vmem:[%s3591_s22 + $0x10] sm:$0xf] }
  0xb6   : > { %2684 = vmatpush3.bf16.msra.mxu0 %v3122_v36  ;;  %v1361_v36 = vshrl.u32 %v3136_v10, 16  ;;  %v3147_v10 = vld [vmem:[#allocation5 + $0x1a8] sm:$0xff]  }
  0xb7   : > { %2540 = vmatpush3.bf16.msra.mxu1 %v3123_v38  ;;  %2685 = vmatprep.subr.bf16.mxu0 %v3374_v0  ;;  %v1365_v38 = vshll.u32 %v3800_v32, 16  ;;  %v969_v32 = vrot.slane %v967_v4, 4 }
  0xb8   : > { %2522 = vmatmul.mubr.bf16.gmra.mrb[12].mxu1 %v375_v40  ;;  %2541 = vmatprep.subr.bf16.mxu1 %v3374_v0  ;;  %v732_v40 = vrot.slane %v368_v14, 3  ;;  %v1363_v14 = vor.u32 %v1361_v36, %v1359_v29 }
  0xb9   : > { %2666 = vmatmul.mubr.bf16.gmra.mrb[12].mxu0 %v2317_v41  ;;  %2525 = vmatprep.mubr.msk.bf16.mxu1 %vm3375_vm0, %v3374_v0  ;;  %v955_v41 = vshrl.u32 %v3673_v56, 16  ;;  %v3143_v56 = vld [vmem:[#allocation5 + $0x98] sm:$0xff]  }
  0xba   : > { %2669 = vmatprep.mubr.msk.bf16.mxu0 %vm3375_vm0, %v3374_v0  ;;  %2686 = vmatpush3.bf16.msra.mxu0 %v3124_v39  ;;  %v3142_v39 = vld [vmem:[#allocation5 + $0x90] sm:$0xff]   ;;  %v3826_v49 = vor.u32 %v733_v44, %v732_v40  ;;  %v3153_v44 = vld [vmem:[#allocation5 + $0xb8] sm:$0xff]  }
  0xbb   : > { %2542 = vmatpush3.bf16.msra.mxu1 %v3129_v47  ;;  %2687 = vmatprep.subr.bf16.mxu0 %v3374_v0  ;;  %v1367_v47 = vrot.slane %v1365_v38, 1  ;;  %v957_v27 = vrot.slane %v955_v41, 3 }
  0xbc   : > { %2543 = vmatprep.subr.bf16.mxu1 %v3374_v0  ;;  %v3839_v53 = vsel %vm711_vm2, %v730_v31, %v3826_v49  ;;  %v3152_v31 = vld [vmem:[#allocation5 + $0x1b8] sm:$0xff]  }
  0xbd   : > { %v1371_v8 = vor.u32 %v1369_v57, %v1367_v47  ;;  %v961_v29 = vor.u32 %v960_v19, %v957_v27  ;;  %v3164_v19 = vld [vmem:[#allocation5 + $0xd0] sm:$0xff]  }
  0xbe   : > { %2688 = vmatpush3.bf16.msra.mxu0 %v3130_v50  ;;  %v964_v50 = vshrl.u32 %v3698_v6, 16  ;;  %v550_v6 = vrot.slane %v3691_v3, 3  ;;  %v3865_v3 = vrot.slane %v713_v16, 3 }
  0xbf   : > { %2544 = vmatpush3.bf16.msra.mxu1 %v3131_v54  ;;  %2709 = vmatprep.subr.bf16.mxu0 %v3374_v0  ;;  %v549_v54 = vsel %vm542_vm3, %v546_v43, %v548_v42  ;;  %v1377_v43 = vshrl.u32 %v3824_v55, 16  ;;  %v3885_v36 = vsel %vm711_vm2, %v3676_v58, %v961_v29  ;;  %v984_v58 = vrot.slane %v982_v22, 3 }
  0xc0   : > { %2526 = vmatmul.mubr.bf16.gmra.mrb[16].mxu1 %v384_v21  ;;  %2565 = vmatprep.subr.bf16.mxu1 %v3374_v0  ;;  %v3150_v21 = vld [vmem:[%s3591_s22 + $0x30] ss:$0 sps:$4 sm:$0x11]  }
  0xc1   : > { %2670 = vmatmul.mubr.bf16.gmra.mrb[16].mxu0 %v2318_v60  ;;  %2545 = vmatprep.mubr.msk.bf16.mxu1 %vm3375_vm0, %v3374_v0  ;;  %v1368_v60 = vsel %vm1340_vm4, %v1363_v14, %v1367_v47  ;;  %v1379_v40 = vor.u32 %v1377_v43, %v1375_v9  ;;  %v987_v14 = vrot.slane %v985_v7, 4  ;;  %v553_v47 = vsel %vm542_vm3, %v550_v6, %v552_v20  ;;  %v3163_v43 = vld [vmem:[#allocation5 + $0x1d8] sm:$0xff]  }
  0xc2   : > { %2689 = vmatprep.mubr.msk.bf16.mxu0 %vm3375_vm0, %v3374_v0 }
  0xc3   : > { %v988_v52 = vor.u32 %v987_v14, %v984_v58  ;;  %v3171_v14 = vld [vmem:[#allocation5 + $0x1f0] sm:$0xff]  }
  0xc8   : > { %2546 = vmatmul.mubr.bf16.vlgmr.msra.gmra.mrb[0].mxu1 %v545_v15  ;;  %v1381_v15 = vshll.u32 %v3150_v21, 16 }
  0xc9   : > { %2690 = vmatmul.mubr.bf16.vlgmr.msra.gmra.mrb[0].mxu0 %v1352_v37  ;;  %2549 = vmatprep.mubr.msk.bf16.mxu1 %vm3375_vm0, %v3374_v0  ;;  %v551_v37 = vsel %vm542_vm3, %v548_v42, %v550_v6 }
  0xca   : > { %2710 = vmatpush3.bf16.msra.mxu0 %v3134_v13  ;;  %2693 = vmatprep.mubr.msk.bf16.mxu0 %vm3375_vm0, %v3374_v0  ;;  %v1521_v13 = vld [vmem:[%s3591_s22 + $0xc] sm:$0xf]  ;;  %v1383_v28 = vrot.slane %v1381_v15, 1 }
  0xcb   : > { %2711 = vmatprep.subr.bf16.mxu0 %v3374_v0  ;;  %2566 = vmatpush3.bf16.msra.mxu1 %v3137_v23  ;;  %v1376_v23 = vsel %vm1340_vm4, %v1371_v8, %v1375_v9  ;;  %v3156_v9 = vld [vmem:[#allocation5 + $0x1c0] sm:$0xff]  }
  0xcc   : > { %2567 = vmatprep.subr.bf16.mxu1 %v3374_v0 }
  0xce   : > { %2712 = vmatpush3.bf16.msra.mxu0 %v3135_v26  ;;  %v2341_v26 = vcombine.low %v1521_v13, %v3862_v17 }
  0xcf   : > { %2713 = vmatprep.subr.bf16.mxu0 %v3374_v0  ;;  %2568 = vmatpush3.bf16.msra.mxu1 %v3139_v30  ;;  %v966_v30 = vrot.slane %v964_v50, 3 }
  0xd0   : > { %2550 = vmatmul.mubr.bf16.gmra.mrb[4].mxu1 %v547_v34  ;;  %2569 = vmatprep.subr.bf16.mxu1 %v3374_v0  ;;  %v975_v34 = vrot.slane %v973_v5, 3  ;;  %v1580_v41 = vshll.u32 %v2341_v26, 16  ;;  %v1578_v57 = vshrl.u32 %v2341_v26, 16  ;;  %v3947_v26 = vld [vmem:[%s3591_s22 + $0x2c] sm:$0xff]  }
  0xd1   : > { %2694 = vmatmul.mubr.bf16.gmra.mrb[4].mxu0 %v1360_v35  ;;  %2553 = vmatprep.mubr.msk.bf16.mxu1 %vm3375_vm0, %v3374_v0  ;;  %v3881_v35 = vld [vmem:[%s3591_s22 + $0x1c] sm:$0xff]   ;;  %v970_v38 = vor.u32 %v969_v32, %v966_v30  ;;  %v1609_v32 = vshll.u32 %v3947_v26, 16 }
  0xd2   : > { %2714 = vmatpush3.bf16.msra.mxu0 %v3138_v33  ;;  %2697 = vmatprep.mubr.msk.bf16.mxu0 %vm3375_vm0, %v3374_v0  ;;  %v3876_v33 = vld [vmem:[%s3591_s22 + $0x14] sm:$0xff]   ;;  %v1593_v16 = vshll.u32 %v3881_v35, 16  ;;  %v1597_v50 = vshrl.u32 %v3881_v35, 16  ;;  %v1582_v21 = vrot.slane %v1580_v41, 1  ;;  %v3169_v41 = vld [vmem:[#allocation5 + $0x1e8] sm:$0xff]  }
  0xd3   : > { %2715 = vmatprep.subr.bf16.mxu0 %v3374_v0  ;;  %2570 = vmatpush3.bf16.msra.mxu1 %v3142_v39  ;;  %v978_v39 = vrot.slane %v976_v59, 4  ;;  %v1589_v42 = vshrl.u32 %v3876_v33, 16  ;;  %v3892_v45 = vsel %vm711_vm2, %v961_v29, %v970_v38  ;;  %v1585_v55 = vshll.u32 %v3876_v33, 16  ;;  %v3166_v29 = vld [vmem:[#allocation5 + $0x1e0] sm:$0xff]  }
  0xd4   : > { %2571 = vmatprep.subr.bf16.mxu1 %v3374_v0  ;;  %v1960_v48 = vrot.slane %v1597_v50, 1  ;;  %v1961_v4 = vrot.slane %v1593_v16, 2  ;;  %v719_v59 = vor.u32 %v3868_v18, %v3865_v3  ;;  %v1583_v22 = vor.u32 %v1582_v21, %v1578_v57  ;;  %v3931_v3 = vld [vmem:[%s3591_s22 + $0x24] sm:$0xff]   ;;  %v1757_v57 = vld [vmem:[%s3591_s22 + $0xc] sm:$0xe] }
  0xd5   : > { %v1587_v7 = vrot.slane %v1585_v55, 1  ;;  %v1595_v13 = vrot.slane %v1593_v16, 1  ;;  %v1601_v18 = vshll.u32 %v3931_v3, 16  ;;  %v1605_v30 = vshrl.u32 %v3931_v3, 16 }
  0xd6   : > { %2716 = vmatpush3.bf16.msra.mxu0 %v3141_v46  ;;  %v979_v46 = vor.u32 %v978_v39, %v975_v34  ;;  %v723_v20 = vsel %vm711_vm2, %v719_v59, %v3769_v63  ;;  %v3161_v63 = vld [vmem:[#allocation5 + $0xc8] sm:$0xff]   ;;  %v3178_v59 = vld [vmem:[#allocation5 + $0x200] sm:$0xff]  }
  0xd7   : > { %2717 = vmatprep.subr.bf16.mxu0 %v3374_v0  ;;  %2572 = vmatpush3.bf16.msra.mxu1 %v3143_v56  ;;  %v1956_v56 = vrot.slane %v1589_v42, 1  ;;  %v1588_v8 = vsel %vm1340_vm4, %v1583_v22, %v1587_v7  ;;  %v1591_v15 = vor.u32 %v1589_v42, %v1587_v7  ;;  %v3170_v42 = vld [vmem:[#allocation5 + $0xe8] sm:$0xff]   ;;  %v1782_v7 = vrot.slane %v3881_v35, 1 }
  0xd8   : > { %2554 = vmatmul.mubr.bf16.gmra.mrb[8].mxu1 %v549_v54  ;;  %2573 = vmatprep.subr.bf16.mxu1 %v3374_v0  ;;  %v3900_v51 = vsel %vm711_vm2, %v970_v38, %v979_v46  ;;  %v1384_v54 = vsel %vm1340_vm4, %v1379_v40, %v1383_v28  ;;  %v3172_v28 = vld [vmem:[%s3591_s22 + $0x28] ss:$0 sps:$4 sm:$0xff]   ;;  %v1611_v40 = vrot.slane %v1609_v32, 1  ;;  %v1784_v35 = vrot.slane %v3931_v3, 1 }
  0xd9   : > { %2698 = vmatmul.mubr.bf16.gmra.mrb[8].mxu0 %v1368_v60  ;;  %2557 = vmatprep.mubr.msk.bf16.mxu1 %vm3375_vm0, %v3374_v0  ;;  %v1957_v60 = vrot.slane %v1585_v55, 2  ;;  %v1596_v27 = vsel %vm1340_vm4, %v1591_v15, %v1595_v13  ;;  %v737_v34 = vshrl.u32 %v3172_v28, 16  ;;  %v740_v38 = vshll.u32 %v3172_v28, 16  ;;  %v3179_v22 = vld [vmem:[#allocation5 + $0x208] sm:$0xff]  }
  0xda   : > { %2718 = vmatpush3.bf16.msra.mxu0 %v3144_v61  ;;  %2701 = vmatprep.mubr.msk.bf16.mxu0 %vm3375_vm0, %v3374_v0  ;;  %v3905_v61 = vsel %vm711_vm2, %v979_v46, %v988_v52 }
  0xdb   : > { %2574 = vmatpush3.bf16.msra.mxu1 %v3146_v12  ;;  %2719 = vmatprep.subr.bf16.mxu0 %v3374_v0  ;;  %v3908_v5 = vor.u32 %v1957_v60, %v1956_v56  ;;  %v3914_v12 = vor.u32 %v1961_v4, %v1960_v48  ;;  %v742_v46 = vrot.slane %v740_v38, 4  ;;  %v3174_v56 = vld [vmem:[#allocation5 + $0xf0] sm:$0xff]   ;;  %v3990_v48 = vcombine.low %v1757_v57, %v3862_v17 }
  0xdc   : > { %2575 = vmatprep.subr.bf16.mxu1 %v3374_v0  ;;  %v1780_v4 = vrot.slane %v3876_v33, 1 }
  0xdd   : > { %v3921_v6 = vsel %vm1947_vm5, %v3908_v5, %v3914_v12 }
  0xde   : > { %2720 = vmatpush3.bf16.msra.mxu0 %v3147_v10  ;;  %v3159_v10 = vld [vmem:[#allocation5 + $0xc0] sm:$0xff]   ;;  %v1783_v33 = vsel %vm1778_vm6, %v1780_v4, %v1782_v7 }
  0xdf   : > { %2576 = vmatpush3.bf16.msra.mxu1 %v3148_v11  ;;  %2721 = vmatprep.subr.bf16.mxu0 %v3374_v0  ;;  %v3157_v11 = vld [vmem:[#allocation5 + $0x1c8] sm:$0xff]  }
  0xe0   : > { %2558 = vmatmul.mubr.bf16.gmra.mrb[12].mxu1 %v551_v37  ;;  %2577 = vmatprep.subr.bf16.mxu1 %v3374_v0  ;;  %v3160_v37 = vld [vmem:[#allocation5 + $0x1d0] sm:$0xff]  }
  0xe1   : > { %2702 = vmatmul.mubr.bf16.gmra.mrb[12].mxu0 %v1376_v23  ;;  %2561 = vmatprep.mubr.msk.bf16.mxu1 %vm3375_vm0, %v3374_v0  ;;  %v1599_v23 = vor.u32 %v1597_v50, %v1595_v13  ;;  %v3185_v13 = vld [vmem:[#allocation5 + $0x238] sm:$0xff]  }
  0xe2   : > { %2705 = vmatprep.mubr.msk.bf16.mxu0 %vm3375_vm0, %v3374_v0  ;;  %2722 = vmatpush3.bf16.msra.mxu0 %v3149_v24  ;;  %v1603_v24 = vrot.slane %v1601_v18, 1 }
  0xe3   : > { %2578 = vmatpush3.bf16.msra.mxu1 %v3151_v1  ;;  %2723 = vmatprep.subr.bf16.mxu0 %v3374_v0 }
  0xe4   : > { %2579 = vmatprep.subr.bf16.mxu1 %v3374_v0  ;;  %v1604_v1 = vsel %vm1340_vm4, %v1599_v23, %v1603_v24  ;;  %v1607_v39 = vor.u32 %v1605_v30, %v1603_v24  ;;  %v3186_v24 = vld [vmem:[%s3591_s22 + $0x34] ss:$0 sps:$4 sm:$0x33]  }
  0xe6   : > { %2724 = vmatpush3.bf16.msra.mxu0 %v3152_v31  ;;  %v3168_v31 = vld [vmem:[#allocation5 + $0xe0] sm:$0xff]   ;;  %v1612_v58 = vsel %vm1340_vm4, %v1607_v39, %v1611_v40 }
  0xe7   : > { %2580 = vmatpush3.bf16.msra.mxu1 %v3153_v44  ;;  %2745 = vmatprep.subr.bf16.mxu0 %v3374_v0  ;;  %v739_v44 = vrot.slane %v737_v34, 3 }
  0xe8   : > { %2562 = vmatmul.mubr.bf16.gmra.mrb[16].mxu1 %v553_v47  ;;  %2601 = vmatprep.subr.bf16.mxu1 %v3374_v0  ;;  %v1613_v47 = vshrl.u32 %v3947_v26, 16 }
  0xe9   : > { %2706 = vmatmul.mubr.bf16.gmra.mrb[16].mxu0 %v1384_v54  ;;  %2581 = vmatprep.mubr.msk.bf16.mxu1 %vm3375_vm0, %v3374_v0  ;;  %v743_v16 = vor.u32 %v742_v46, %v739_v44  ;;  %v3175_v54 = vld [vmem:[#allocation5 + $0x1f8] sm:$0xff]  }
  0xea   : > { %2725 = vmatprep.mubr.msk.bf16.mxu0 %vm3375_vm0, %v3374_v0  ;;  %v1615_v50 = vor.u32 %v1613_v47, %v1611_v40  ;;  %v1968_v23 = vrot.slane %v1613_v47, 1 }
  0xeb   : > { %v744_v21 = vsel %vm711_vm2, %v3826_v49, %v743_v16  ;;  %v1779_v49 = vrot.slane %v3990_v48, 1 }
  0xed   : > { %v1781_v17 = vsel %vm1778_vm6, %v1779_v49, %v1780_v4 }
  0xf0   : > { %2582 = vmatmul.mubr.bf16.vlgmr.msra.gmra.mrb[0].mxu1 %v723_v20  ;;  %v3181_v20 = vld [vmem:[#allocation5 + $0x218] sm:$0xff]  }
  0xf1   : > { %2726 = vmatmul.mubr.bf16.vlgmr.msra.gmra.mrb[0].mxu0 %v1588_v8  ;;  %2585 = vmatprep.mubr.msk.bf16.mxu1 %vm3375_vm0, %v3374_v0  ;;  %v3182_v8 = vld [vmem:[#allocation5 + $0x220] sm:$0xff]  }
  0xf2   : > { %2746 = vmatpush3.bf16.msra.mxu0 %v3156_v9  ;;  %2729 = vmatprep.mubr.msk.bf16.mxu0 %vm3375_vm0, %v3374_v0  ;;  %v1786_v9 = vrot.slane %v3947_v26, 1 }
  0xf3   : > { %2747 = vmatprep.subr.bf16.mxu0 %v3374_v0  ;;  %2602 = vmatpush3.bf16.msra.mxu1 %v3159_v10  ;;  %v3183_v10 = vld [vmem:[#allocation5 + $0x228] sm:$0xff]  }
  0xf4   : > { %2603 = vmatprep.subr.bf16.mxu1 %v3374_v0 }
  0xf6   : > { %2748 = vmatpush3.bf16.msra.mxu0 %v3157_v11  ;;  %v3184_v11 = vld [vmem:[#allocation5 + $0x230] sm:$0xff]  }
  0xf7   : > { %2749 = vmatprep.subr.bf16.mxu0 %v3374_v0  ;;  %2604 = vmatpush3.bf16.msra.mxu1 %v3161_v63  ;;  %v1949_v63 = vshrl.u32 %v3990_v48, 16 }
  0xf8   : > { %2586 = vmatmul.mubr.bf16.gmra.mrb[4].mxu1 %v3790_v25  ;;  %2605 = vmatprep.subr.bf16.mxu1 %v3374_v0  ;;  %v3165_v25 = vld [vmem:[#allocation5 + $0xd8] sm:$0xff]  }
  0xf9   : > { %2730 = vmatmul.mubr.bf16.gmra.mrb[4].mxu0 %v1596_v27  ;;  %2589 = vmatprep.mubr.msk.bf16.mxu1 %vm3375_vm0, %v3374_v0  ;;  %v1952_v27 = vshll.u32 %v3990_v48, 16 }
  0xfa   : > { %2750 = vmatpush3.bf16.msra.mxu0 %v3160_v37  ;;  %2733 = vmatprep.mubr.msk.bf16.mxu0 %vm3375_vm0, %v3374_v0  ;;  %v1964_v37 = vrot.slane %v1605_v30, 1 }
  0xfb   : > { %2751 = vmatprep.subr.bf16.mxu0 %v3374_v0  ;;  %2606 = vmatpush3.bf16.msra.mxu1 %v3164_v19  ;;  %v1969_v19 = vrot.slane %v1609_v32, 2  ;;  %v1954_v28 = vrot.slane %v1952_v27, 2 }
  0xfc   : > { %2607 = vmatprep.subr.bf16.mxu1 %v3374_v0 }
  0xfe   : > { %2752 = vmatpush3.bf16.msra.mxu0 %v3163_v43 }
  0xff   : > { %2753 = vmatprep.subr.bf16.mxu0 %v3374_v0  ;;  %2608 = vmatpush3.bf16.msra.mxu1 %v3165_v25  ;;  %v1951_v25 = vrot.slane %v1949_v63, 1 }
 0x100   : > { %2590 = vmatmul.mubr.bf16.gmra.mrb[8].mxu1 %v3806_v2  ;;  %2609 = vmatprep.subr.bf16.mxu1 %v3374_v0  ;;  %v3967_v2 = vld [vmem:[%s3591_s22 + $0x34] ss:$0 sps:$4 sm:$0x11]  }
 0x101   : > { %2734 = vmatmul.mubr.bf16.gmra.mrb[8].mxu0 %v1604_v1  ;;  %2593 = vmatprep.mubr.msk.bf16.mxu1 %vm3375_vm0, %v3374_v0  ;;  %v1617_v55 = vshll.u32 %v3967_v2, 16  ;;  %v1788_v15 = vrot.slane %v3967_v2, 1  ;;  %v1973_v1 = vshrl.u32 %v3186_v24, 16  ;;  %v1955_v26 = vor.u32 %v1954_v28, %v1951_v25 }
 0x102   : > { %2754 = vmatpush3.bf16.msra.mxu0 %v3166_v29  ;;  %2737 = vmatprep.mubr.msk.bf16.mxu0 %vm3375_vm0, %v3374_v0  ;;  %v1976_v29 = vshll.u32 %v3186_v24, 16 }
 0x103   : > { %2610 = vmatpush3.bf16.msra.mxu1 %v3168_v31  ;;  %2755 = vmatprep.subr.bf16.mxu0 %v3374_v0  ;;  %v1619_v52 = vrot.slane %v1617_v55, 1  ;;  %v1789_v43 = vsel %vm1778_vm6, %v1786_v9, %v1788_v15  ;;  %v1975_v32 = vrot.slane %v1973_v1, 1  ;;  %v1959_v34 = vsel %vm1947_vm5, %v1955_v26, %v3908_v5  ;;  %v272_v55 = vld [vmem:[%s3604_s6 + $0x30] sm:$0xff] }
 0x104   : > { %2611 = vmatprep.subr.bf16.mxu1 %v3374_v0  ;;  %v1978_v31 = vrot.slane %v1976_v29, 2  ;;  %v268_v26 = vld [vmem:[%s3604_s6 + $0x10] sm:$0xff] }
 0x105   : > { %v1620_v60 = vsel %vm1340_vm4, %v1615_v50, %v1619_v52 }
 0x106   : > { %2756 = vmatpush3.bf16.msra.mxu0 %v3169_v41 }
 0x107   : > { %2612 = vmatpush3.bf16.msra.mxu1 %v3170_v42  ;;  %2757 = vmatprep.subr.bf16.mxu0 %v3374_v0 }
 0x108   : > { %2594 = vmatmul.mubr.bf16.gmra.mrb[12].mxu1 %v3839_v53  ;;  %2613 = vmatprep.subr.bf16.mxu1 %v3374_v0  ;;  %v3176_v53 = vld [vmem:[#allocation5 + $0xf8] sm:$0xff]  }
 0x109   : > { %2738 = vmatmul.mubr.bf16.gmra.mrb[12].mxu0 %v1612_v58  ;;  %2597 = vmatprep.mubr.msk.bf16.mxu1 %vm3375_vm0, %v3374_v0 }
 0x10a   : > { %2741 = vmatprep.mubr.msk.bf16.mxu0 %vm3375_vm0, %v3374_v0  ;;  %2758 = vmatpush3.bf16.msra.mxu0 %v3171_v14 }
 0x10b   : > { %2614 = vmatpush3.bf16.msra.mxu1 %v3174_v56  ;;  %2759 = vmatprep.subr.bf16.mxu0 %v3374_v0  ;;  %v273_v56 = vld [vmem:[%s3604_s6 + $0x38] sm:$0xff] }
 0x10c   : > { %2615 = vmatprep.subr.bf16.mxu1 %v3374_v0 }
 0x10e   : > { %2760 = vmatpush3.bf16.msra.mxu0 %v3175_v54 }
 0x10f   : > { %2616 = vmatpush3.bf16.msra.mxu1 %v3176_v53  ;;  %2781 = vmatprep.subr.bf16.mxu0 %v3374_v0 }
 0x110   : > { %2598 = vmatmul.mubr.bf16.gmra.mrb[16].mxu1 %v744_v21  ;;  %2817 = vmatprep.subr.bf16.mxu1 %v3374_v0 }
 0x111   : > { %2742 = vmatmul.mubr.bf16.gmra.mrb[16].mxu0 %v1620_v60  ;;  %2617 = vmatprep.mubr.msk.bf16.mxu1 %vm3375_vm0, %v3374_v0 }
 0x112   : > { %2761 = vmatprep.mubr.msk.bf16.mxu0 %vm3375_vm0, %v3374_v0 }
 0x118   : > { %2618 = vmatmul.mubr.bf16.vlgmr.msra.gmra.mrb[0].mxu1 %v3682_v62  ;;  %v3180_v62 = vld [vmem:[#allocation5 + $0x210] sm:$0xff]  }
 0x119   : > { %2762 = vmatmul.mubr.bf16.vlgmr.msra.gmra.mrb[0].mxu0 %v1781_v17  ;;  %2621 = vmatprep.mubr.msk.bf16.mxu1 %vm3375_vm0, %v3374_v0  ;;  %v274_v17 = vld [vmem:[%s3604_s6 + $0x40] sm:$0xff] }
 0x11a   : > { %2782 = vmatpush3.bf16.msra.mxu0 %v3178_v59  ;;  %2765 = vmatprep.mubr.msk.bf16.mxu0 %vm3375_vm0, %v3374_v0 }
 0x11b   : > { %2783 = vmatprep.subr.bf16.mxu0 %v3374_v0  ;;  %2825 = vmatpush3.bf16.msra.mxu1 %v3178_v59 }
 0x11c   : > { %2818 = vmatprep.subr.bf16.mxu1 %v3374_v0 }
 0x11e   : > { %2784 = vmatpush3.bf16.msra.mxu0 %v3179_v22 }
 0x11f   : > { %2785 = vmatprep.subr.bf16.mxu0 %v3374_v0  ;;  %2826 = vmatpush3.bf16.msra.mxu1 %v3179_v22  ;;  %v275_v22 = vld [vmem:[%s3604_s6 + $0x48] sm:$0xff] }
 0x120   : > { %2622 = vmatmul.mubr.bf16.gmra.mrb[4].mxu1 %v3885_v36  ;;  %2819 = vmatprep.subr.bf16.mxu1 %v3374_v0  ;;  %v1785_v36 = vsel %vm1778_vm6, %v1782_v7, %v1784_v35 }
 0x121   : > { %2766 = vmatmul.mubr.bf16.gmra.mrb[4].mxu0 %v1783_v33  ;;  %2625 = vmatprep.mubr.msk.bf16.mxu1 %vm3375_vm0, %v3374_v0 }
 0x122   : > { %2786 = vmatpush3.bf16.msra.mxu0 %v3180_v62  ;;  %2769 = vmatprep.mubr.msk.bf16.mxu0 %vm3375_vm0, %v3374_v0 }
 0x123   : > { %2787 = vmatprep.subr.bf16.mxu0 %v3374_v0  ;;  %2827 = vmatpush3.bf16.msra.mxu1 %v3180_v62 }
 0x124   : > { %2820 = vmatprep.subr.bf16.mxu1 %v3374_v0 }
 0x126   : > { %2788 = vmatpush3.bf16.msra.mxu0 %v3181_v20 }
 0x127   : > { %2789 = vmatprep.subr.bf16.mxu0 %v3374_v0  ;;  %2828 = vmatpush3.bf16.msra.mxu1 %v3181_v20 }
 0x128   : > { %2626 = vmatmul.mubr.bf16.gmra.mrb[8].mxu1 %v3892_v45  ;;  %2821 = vmatprep.subr.bf16.mxu1 %v3374_v0  ;;  %v1787_v45 = vsel %vm1778_vm6, %v1784_v35, %v1786_v9 }
 0x129   : > { %2770 = vmatmul.mubr.bf16.gmra.mrb[8].mxu0 %v1785_v36  ;;  %2629 = vmatprep.mubr.msk.bf16.mxu1 %vm3375_vm0, %v3374_v0 }
 0x12a   : > { %2790 = vmatpush3.bf16.msra.mxu0 %v3182_v8  ;;  %2773 = vmatprep.mubr.msk.bf16.mxu0 %vm3375_vm0, %v3374_v0 }
 0x12b   : > { %2829 = vmatpush3.bf16.msra.mxu1 %v3182_v8  ;;  %2791 = vmatprep.subr.bf16.mxu0 %v3374_v0 }
 0x12c   : > { %2822 = vmatprep.subr.bf16.mxu1 %v3374_v0 }
 0x12e   : > { %2792 = vmatpush3.bf16.msra.mxu0 %v3183_v10 }
 0x12f   : > { %2830 = vmatpush3.bf16.msra.mxu1 %v3183_v10  ;;  %2793 = vmatprep.subr.bf16.mxu0 %v3374_v0 }
 0x130   : > { %2630 = vmatmul.mubr.bf16.gmra.mrb[12].mxu1 %v3900_v51  ;;  %2823 = vmatprep.subr.bf16.mxu1 %v3374_v0  ;;  %v1965_v51 = vrot.slane %v1601_v18, 2  ;;  %v1970_v18 = vor.u32 %v1969_v19, %v1968_v23 }
 0x131   : > { %2774 = vmatmul.mubr.bf16.gmra.mrb[12].mxu0 %v1787_v45  ;;  %2633 = vmatprep.mubr.msk.bf16.mxu1 %vm3375_vm0, %v3374_v0 }
 0x132   : > { %2777 = vmatprep.mubr.msk.bf16.mxu0 %vm3375_vm0, %v3374_v0  ;;  %2794 = vmatpush3.bf16.msra.mxu0 %v3184_v11  ;;  %v1966_v3 = vor.u32 %v1965_v51, %v1964_v37 }
 0x133   : > { %2831 = vmatpush3.bf16.msra.mxu1 %v3184_v11  ;;  %2795 = vmatprep.subr.bf16.mxu0 %v3374_v0  ;;  %v266_v11 = vld [vmem:[%s3604_s6] sm:$0xff] }
 0x134   : > { %2824 = vmatprep.subr.bf16.mxu1 %v3374_v0  ;;  %v1971_v30 = vsel %vm1947_vm5, %v1966_v3, %v1970_v18  ;;  %v1967_v5 = vsel %vm1947_vm5, %v3914_v12, %v1966_v3 }
 0x136   : > { %2796 = vmatpush3.bf16.msra.mxu0 %v3185_v13 }
 0x137   : > { %2832 = vmatpush3.bf16.msra.mxu1 %v3185_v13  ;;  %v267_v13 = vld [vmem:[%s3604_s6 + $0x8] sm:$0xff] }
 0x138   : > { %2634 = vmatmul.mubr.bf16.gmra.mrb[16].mxu1 %v3905_v61  ;;  %v1979_v61 = vor.u32 %v1978_v31, %v1975_v32 }
 0x139   : > { %2778 = vmatmul.mubr.bf16.gmra.mrb[16].mxu0 %v1789_v43  ;;  %2809 = vmatprep.mubr.msk.bf16.mxu1 %vm3375_vm0, %v3374_v0 }
 0x13a   : > { %2797 = vmatprep.mubr.msk.bf16.mxu0 %vm3375_vm0, %v3374_v0  ;;  %v1980_v38 = vsel %vm1947_vm5, %v1970_v18, %v1979_v61 }
 0x140   : > { %2810 = vmatmul.mubr.bf16.vlgmr.msra.gmra.mrb[20].mxu1 %v1971_v30  ;;  %v269_v30 = vld [vmem:[%s3604_s6 + $0x18] sm:$0xff] }
 0x141   : > { %2798 = vmatmul.mubr.bf16.vlgmr.msra.gmra.mrb[0].mxu0 %v1959_v34  ;;  %2813 = vmatprep.mubr.msk.bf16.mxu1 %vm3375_vm0, %v3374_v0 }
 0x142   : > { %2801 = vmatprep.mubr.msk.bf16.mxu0 %vm3375_vm0, %v3374_v0 }
 0x148   : > { %2814 = vmatmul.mubr.bf16.gmra.mrb[24].mxu1 %v1980_v38 }
 0x149   : > { %2802 = vmatmul.mubr.bf16.gmra.mrb[4].mxu0 %v3921_v6 }
 0x14a   : > { %2805 = vmatprep.mubr.msk.bf16.mxu0 %vm3375_vm0, %v3374_v0 }
 0x151   : > { %2806 = vmatmul.mubr.bf16.gmra.mrb[8].mxu0 %v1967_v5 }
 0x1eb   : > { %v1077_v39 = vpop.f32.mrb[0].mxu1 }
 0x1ec   : > { %v2619_v40 = vpop.f32.mrb[1].mxu1  ;;  %v2833_v63 = vadd.f32 %v1077_v39, %v266_v11 }
 0x1ed   : > { %v1080_v41 = vpop.f32.mrb[2].mxu1 }
 0x1ee   : > { %v2620_v2 = vpop.f32.mrb[3].mxu1  ;;  %v2835_v23 = vadd.f32 %v1080_v41, %v267_v13 }
 0x1f3   : > { %v1085_v42 = vpop.f32.mrb[4].mxu1 }
 0x1f4   : > { %v2623_v44 = vpop.f32.mrb[5].mxu1  ;;  %v2837_v32 = vadd.f32 %v1085_v42, %v268_v26 }
 0x1f5   : > { %v1088_v46 = vpop.f32.mrb[6].mxu1 }
 0x1f6   : > { %v2624_v58 = vpop.f32.mrb[7].mxu1  ;;  %v2839_v5 = vadd.f32 %v1088_v46, %v269_v30 }
 0x1fb   : > { %v4072_v14 = vpop.f32.mrb[8].mxu1 }
 0x1fc   : > { %v2627_v6 = vpop.f32.mrb[9].mxu1 }
 0x1fd   : > { %v4074_v47 = vpop.f32.mrb[10].mxu1 }
 0x1fe   : > { %v2628_v0 = vpop.f32.mrb[11].mxu1 }
 0x1ff   : > { %v270_v0 = vld [vmem:[%s3604_s6 + $0x20] sm:$0xff] }
 0x200   : > { %v2841_v46 = vadd.f32 %v4072_v14, %v270_v0 }
 0x203   : > { %v1101_v12 = vpop.f32.mrb[12].mxu1 }
 0x204   : > { %v2845_v16 = vadd.f32 %v1101_v12, %v272_v55  ;;  %v1901_v50 = vpop.f32.mrb[12].mxu0  ;;  %v2631_v52 = vpop.f32.mrb[13].mxu1  ;;  %v271_v55 = vld [vmem:[%s3604_s6 + $0x28] sm:$0xff] }
 0x205   : > { %v2775_v54 = vpop.f32.mrb[13].mxu0  ;;  %v1104_v53 = vpop.f32.mrb[14].mxu1 }
 0x206   : > { %v2846_v57 = vadd.f32 %v2845_v16, %v1901_v50  ;;  %v2848_v21 = vadd.f32 %v1104_v53, %v273_v56  ;;  %v1904_v60 = vpop.f32.mrb[14].mxu0  ;;  %v2632_v48 = vpop.f32.mrb[15].mxu1  ;;  %v2843_v56 = vadd.f32 %v4074_v47, %v271_v55 }
 0x207   : > { %v2776_v49 = vpop.f32.mrb[15].mxu0 }
 0x208   : > { %v2849_v4 = vadd.f32 %v2848_v21, %v1904_v60 }
 0x20b   : > { %v1109_v59 = vpop.f32.mrb[16].mxu1 }
 0x20c   : > { %v2851_v7 = vadd.f32 %v1109_v59, %v274_v17  ;;  %v1909_v33 = vpop.f32.mrb[16].mxu0  ;;  %v2635_v62 = vpop.f32.mrb[17].mxu1 }
 0x20d   : > { %v2779_v35 = vpop.f32.mrb[17].mxu0  ;;  %v1112_v20 = vpop.f32.mrb[18].mxu1 }
 0x20e   : > { %v2852_v36 = vadd.f32 %v2851_v7, %v1909_v33  ;;  %v2854_v8 = vadd.f32 %v1112_v20, %v275_v22  ;;  %v1912_v9 = vpop.f32.mrb[18].mxu0  ;;  %v2636_v10 = vpop.f32.mrb[19].mxu1 }
 0x20f   : > { %v2780_v45 = vpop.f32.mrb[19].mxu0 }
 0x210   : > { %v2855_v15 = vadd.f32 %v2854_v8, %v1912_v9 }
 0x213   : > { %v2092_v27 = vpop.f32.mrb[20].mxu1 }
 0x214   : > { %v2068_v51 = vpop.f32.mrb[0].mxu0  ;;  %v2847_v37 = vadd.f32 %v2846_v57, %v2092_v27  ;;  %v2811_v19 = vpop.f32.mrb[21].mxu1 }
 0x215   : > { %v2834_v24 = vadd.f32 %v2833_v63, %v2068_v51  ;;  %v2799_v43 = vpop.f32.mrb[1].mxu0  ;;  %v2095_v25 = vpop.f32.mrb[22].mxu1 }
 0x216   : > { %2123 = vst [vmem:[%s4084_s29 + $0x30] sm:$0xff] %v2847_v37  ;;  %v2071_v28 = vpop.f32.mrb[2].mxu0  ;;  %v2850_v3 = vadd.f32 %v2849_v4, %v2095_v25  ;;  %v2812_v18 = vpop.f32.mrb[23].mxu1 }
 0x217   : > { %2117 = vst [vmem:[%s4084_s29] sm:$0xff] %v2834_v24  ;;  %v2836_v1 = vadd.f32 %v2835_v23, %v2071_v28  ;;  %v2800_v29 = vpop.f32.mrb[3].mxu0 }
 0x218   : > { %2124 = vst [vmem:[%s4084_s29 + $0x38] sm:$0xff] %v2850_v3 }
 0x219   : > { %2118 = vst [vmem:[%s4084_s29 + $0x8] sm:$0xff] %v2836_v1 }
 0x21b   : > { %v2100_v31 = vpop.f32.mrb[24].mxu1 }
 0x21c   : > { %v2076_v34 = vpop.f32.mrb[4].mxu0  ;;  %v2853_v61 = vadd.f32 %v2852_v36, %v2100_v31  ;;  %v2815_v38 = vpop.f32.mrb[25].mxu1 }
 0x21d   : > { %v2838_v39 = vadd.f32 %v2837_v32, %v2076_v34  ;;  %v2803_v40 = vpop.f32.mrb[5].mxu0  ;;  %v2103_v41 = vpop.f32.mrb[26].mxu1 }
 0x21e   : > { %2125 = vst [vmem:[%s4084_s29 + $0x40] sm:$0xff] %v2853_v61  ;;  %v2079_v2 = vpop.f32.mrb[6].mxu0  ;;  %v2856_v44 = vadd.f32 %v2855_v15, %v2103_v41  ;;  %v2816_v58 = vpop.f32.mrb[27].mxu1 }
 0x21f   : > { %2119 = vst [vmem:[%s4084_s29 + $0x10] sm:$0xff] %v2838_v39  ;;  %v2840_v42 = vadd.f32 %v2839_v5, %v2079_v2  ;;  %v2804_v6 = vpop.f32.mrb[7].mxu0 }
 0x220   : > { %2126 = vst [vmem:[%s4084_s29 + $0x48] sm:$0xff] %v2856_v44 }
 0x221   : > { %2120 = vst [vmem:[%s4084_s29 + $0x18] sm:$0xff] %v2840_v42 }
 0x224   : > { %v2084_v12 = vpop.f32.mrb[8].mxu0 }
 0x225   : > { %v2842_v16 = vadd.f32 %v2841_v46, %v2084_v12  ;;  %v2807_v50 = vpop.f32.mrb[9].mxu0 }
 0x226   : > { %v2087_v52 = vpop.f32.mrb[10].mxu0 }
 0x227   : > { %2121 = vst [vmem:[%s4084_s29 + $0x20] sm:$0xff] %v2842_v16  ;;  %v2844_v14 = vadd.f32 %v2843_v56, %v2087_v52  ;;  %v2808_v54 = vpop.f32.mrb[11].mxu0 }
 0x229   : > { %2122 = vst [vmem:[%s4084_s29 + $0x28] sm:$0xff] %v2844_v14 }
 0x22a   : > { %3288 = shalt.err (!%p3285_p8)
}
 0x22b   : > { %s3289_s19 = scalar_lea.hbm %s4105_s10, 1280  ;;  %s3293_s21 = scalar_lea.hbm %s4161_s3, 2560 }
 0x22c   : > { %p3290_p10 = scmp.ne.s32.totalorder %s4105_s10, %s3289_s19  ;;  %p3294_p4 = scmp.lt.u32.totalorder %s4105_s10, %s4161_s3 }
 0x22d   : > { %p3295_p11 = scmp.lt.u32.totalorder %s3293_s21, %s3289_s19  ;;  %p3297_p3 = scmp.lt.u32.totalorder %s3289_s19, %s4105_s10 }
 0x22e   : > { %p3291_p13 = pnand %p3290_p10, %p4188_p5 }
 0x22f   : > { %p3296_p2 = por %p3295_p11, %p3294_p4 }
 0x230   : > { %p3292_p7 = pneg %p3291_p13 }
 0x231   : > { %p3298_p1 = por %p3297_p3, %p3296_p2 }
 0x233   : > { %p3299_p12 = pnand %p3298_p1, %p3292_p7 }
 0x235   : > { %3302 = shalt.err (!%p3299_p12)
}
 0x236   : > { %s3377_s6 = smov 128   ;;  %s3378_s29 = smov 8  }
 0x237   : > { %3004 = dma.vmem_to_hbm [thread:$0]  (%p4188_p5), %s4107_s8, 1280, %s4105_s10, %s2128_s15, %s3377_s6, %s3377_s6, %s3378_s29  }
 0x238 PF: > { %s2157_s7 = sand.u32 1, %s3345_s12   ;;  %p4189_p0 = scmp.ne.s32.totalorder %s4176_s5, 0 }
 0x239   : > { %p4190_p9 = scmp.ge.s32.totalorder %s3365_s17, 2  ;;  %s2158_s20 = scalar_lea.sflag [#allocation4], %s2157_s7 }
 0x23b   : > { %p3018_p6 = pnand %p4190_p9, %p4189_p0 }
 0x23d   : > { %3340 = dma.done.wait (!%p3018_p6), %s2158_s20, 1280  }
 0x23e   : > { %3342 = vsyncadd (!%p3018_p6), %s2158_s20, 4294966016  ;;  %s20_s17 = sadd.s32 1, %s3365_s17   ;;  %s4191_s12 = smov %s3349_s13 }
 0x23f   : > { %p17_p8 = scmp.ge.s32.totalorder %s20_s17, 4   ;;  %s4192_s13 = smov %s3353_s14 }
 0x240   : > { %s4193_s14 = smov %s3446_s23  ;;  %s4194_s15 = smov %s3361_s16 }
 0x241   : > { %s4195_s16 = smov %s4197_s18  ;;  %19 = sbr.rel (!%p17_p8) target bundleno = 9 (0x9), region = 101 }
 0x248   :  { %2163 = vsyncpa [#allocation3], 1 }
 0x249   :  { %2165 = vsyncpa [#allocation3 + $0x1], 1 }
 0x24a   :  { %2166 = vsyncpa [#allocation6], 1 }
 0x24b   :  { %2167 = vsyncpa [#allocation4], 1 }
 0x24c   :  { %2169 = vsyncpa [#allocation4 + $0x1], 1 }

// kernel: basic_block_forward.2
= control target key start
LH: loop header
LB: loop body
LE: loop exit
PB: predicated region body
PF: predicated region fallthrough
CT: control target
= control target key end

     0   :  { %s5706_s0 = inlined_call_operand.hbm [shape: f32[2,4,100,4], index: 0, kind: input, shape index: {}]   ;;  %s5707_s1 = inlined_call_operand.hbm [shape: f32[4,100,1], index: 1, kind: input, shape index: {}]   ;;  %s5708_s2 = inlined_call_operand.hbm [shape: f32[1,4], index: 2, kind: input, shape index: {}]   ;;  %s5709_s3 = inlined_call_operand.hbm [shape: f32[1,4], index: 3, kind: input, shape index: {}]   ;;  %s5710_s4 = inlined_call_operand.hbm [shape: bf16[9,4,128], index: 4, kind: input, shape index: {}]   ;;  %s5711_s5 = inlined_call_operand.hbm [shape: f32[1,128], index: 5, kind: input, shape index: {}]   ;;  %s5712_s6 = inlined_call_operand.hbm [shape: f32[1,128], index: 6, kind: input, shape index: {}]   ;;  %s5713_s7 = inlined_call_operand.hbm [shape: f32[80,1], index: 7, kind: input, shape index: {}]   ;;  %s5714_s8 = inlined_call_operand.hbm [shape: bf16[4,128], index: 8, kind: input, shape index: {}]   ;;  %s5715_s9 = inlined_call_operand.hbm [shape: bf16[2,115,128], index: 9, kind: output, shape index: {0}]   ;;  %s5716_s10 = inlined_call_operand.hbm [shape: f32[2,80,128], index: 10, kind: output, shape index: {1}]  }
   0x1   :  { %5729 = sst [smem:[#allocation30_spill]] %s5706_s0 }
   0x2   :  { %5730 = sst [smem:[#allocation31_spill]] %s5707_s1 }
   0x3   :  { %5731 = sst [smem:[#allocation32_spill]] %s5708_s2 }
   0x4   :  { %5732 = sst [smem:[#allocation33_spill]] %s5709_s3 }
   0x5   :  { %5733 = sst [smem:[#allocation34_spill]] %s5715_s9 }
   0x6   :  { %5734 = sst [smem:[#allocation35_spill]] %s5716_s10 }
   0x7   :  { %16 = vsyncpa [#allocation4], 0 }
   0x8   :  { %18 = vsyncpa [#allocation4 + $0x1], 0 }
   0x9   :  { %19 = vsyncpa [#allocation7], 0 }
   0xa   :  { %20 = vsyncpa [#allocation10], 0 }
   0xb   :  { %21 = vsyncpa [#allocation13], 0 }
   0xc   :  { %22 = vsyncpa [#allocation16], 0 }
   0xd   :  { %23 = vsyncpa [#allocation5], 0 }
   0xe   :  { %25 = vsyncpa [#allocation5 + $0x1], 0 }
   0xf   :  { %26 = vsyncpa [#allocation20], 0 }
  0x10   :  { %28 = vsyncpa [#allocation20 + $0x1], 0  ;;  %s4725_s13 = smov 0   ;;  %s4727_s14 = smov 0  }
  0x11   :  { %s4729_s15 = smov 0   ;;  %s4731_s16 = smov 0  }
  0x12   :  { %s4733_s17 = smov 0   ;;  %s4735_s18 = smov 0  }
  0x13 LB: > { %5735 = sst [smem:[#allocation28_spill]] %s4638_s16  ;;  %s5717_s19 = sadd.s32 4294967295, %s4646_s18   ;;  %s4646_s18 = sphi %s4735_s18, %s34_s18   ;;  %s4642_s17 = sphi %s4733_s17, %s5767_s17   ;;  %s4638_s16 = sphi %s4731_s16, %s5766_s16   ;;  %s4634_s15 = sphi %s4729_s15, %s5765_s15   ;;  %s4630_s14 = sphi %s4727_s14, %s5764_s14   ;;  %s4626_s13 = sphi %s4725_s13, %s5763_s13  }
  0x14   : > { %p3330_p0 = scmp.ge.s32.totalorder %s4646_s18, 1  ;;  %p4759_p1 = scmp.eq.s32.totalorder %s5717_s19, 0 }
  0x15   : > { %p321_p2 = scmp.lt.s32.totalorder %s4646_s18, 3  ;;  %s4648_s22 = smov [#allocation6]  }
  0x16   : > { %s5736_s20 = scalar_select %p4759_p1, 1, 0 }
  0x17   : > { %p4764_p3 = pnand %p3330_p0, %p321_p2  ;;  %s333_s23 = sshll.u32 %s4648_s22, 4  ;;  %s4768_s23 = int_to_ptr.vmem [resolvable:$true] %s333_s23 }
  0x18   : > { %s4649_s25 = smov [#allocation9]   ;;  %s4650_s27 = smov [#allocation12]  }
  0x19   : > { %s5737_s21 = scalar_select %p4764_p3, 1, 0 }
  0x1a   : > { %p4087_p4 = pneg %p4764_p3  ;;  %s358_s26 = sshll.u32 %s4649_s25, 4  ;;  %s4779_s26 = int_to_ptr.vmem [resolvable:$true] %s358_s26 }
  0x1b   : > { %5738 = sst [smem:[#allocation29_spill]] %s5737_s21  ;;  %s4781_s28 = sshll.u32 %s4650_s27, 4  ;;  %s387_s28 = int_to_ptr.vmem [resolvable:$true] %s4781_s28 }
  0x1c   : > { %p4775_p6 = pnand %p4087_p4, %p4759_p1  ;;  %s5740_s1 = sld [smem:[#allocation31_spill]] }
  0x1e   : > { %p4791_p8 = pneg %p4775_p6 }
  0x22   : > { %s4262_s11 = scalar_lea.hbm %s5740_s1, 6656 }
  0x23   : > { %p4263_p7 = scmp.ne.s32.totalorder %s5740_s1, %s4262_s11  ;;  %p4269_p11 = scmp.lt.u32.totalorder %s4262_s11, %s5740_s1 }
  0x25   : > { %p4265_p9 = pnand %p4791_p8, %p4263_p7 }
  0x27   : > { %p4266_p10 = pneg %p4265_p9 }
  0x29   : > { %p4271_p12 = pnand %p4269_p11, %p4266_p10 }
  0x2b   : > { %4274 = shalt.err (!%p4271_p12)
}
  0x2c   : > { %s4275_s29 = scalar_lea.vmem %s4768_s23, 6656  ;;  %p4283_p4 = scmp.lt.s32.totalorder %s4768_s23, %s4768_s23 }
  0x2d   : > { %p4276_p13 = scmp.ne.s32.totalorder %s4768_s23, %s4275_s29  ;;  %p4284_p5 = scmp.lt.s32.totalorder %s4275_s29, %s4275_s29 }
  0x2f   : > { %p4278_p0 = pnand %p4276_p13, %p4791_p8  ;;  %p4285_p7 = por %p4284_p5, %p4283_p4 }
  0x31   : > { %p4279_p2 = pneg %p4278_p0 }
  0x33   : > { %p4286_p9 = pnand %p4285_p7, %p4279_p2 }
  0x35   : > { %4289 = shalt.err (!%p4286_p9)
}
  0x36   : > { %s5725_s30 = smov 128   ;;  %s5727_s11 = smov 8  }
  0x37   : > { %4090 = dma.hbm_to_vmem [thread:$0]  (!%p4775_p6), %s5740_s1, 6656, %s4768_s23, [#allocation7], %s5725_s30, %s5725_s30, %s5727_s11  }
  0x38   : > { %s5742_s3 = sld [smem:[#allocation33_spill]] }
  0x3e   : > { %s4290_s29 = scalar_lea.hbm %s5742_s3, 16 }
  0x3f   : > { %p4291_p5 = scmp.ne.s32.totalorder %s5742_s3, %s4290_s29  ;;  %p4297_p12 = scmp.lt.u32.totalorder %s4290_s29, %s5742_s3 }
  0x41   : > { %p4293_p10 = pnand %p4291_p5, %p4791_p8 }
  0x43   : > { %p4294_p11 = pneg %p4293_p10 }
  0x45   : > { %p4299_p13 = pnand %p4297_p12, %p4294_p11 }
  0x47   : > { %4302 = shalt.err (!%p4299_p13)
}
  0x48   : > { %s4303_s23 = scalar_lea.vmem %s4779_s26, 16  ;;  %s4310_s9 = scalar_lea.vmem %s4779_s26, 32 }
  0x49   : > { %p4304_p0 = scmp.ne.s32.totalorder %s4779_s26, %s4303_s23  ;;  %p4311_p7 = scmp.lt.s32.totalorder %s4779_s26, %s4779_s26 }
  0x4a   : > { %p4312_p9 = scmp.lt.s32.totalorder %s4310_s9, %s4303_s23 }
  0x4b   : > { %p4306_p2 = pnand %p4304_p0, %p4791_p8 }
  0x4c   : > { %p4313_p5 = por %p4312_p9, %p4311_p7 }
  0x4d   : > { %p4307_p4 = pneg %p4306_p2 }
  0x4f   : > { %p4314_p10 = pnand %p4313_p5, %p4307_p4 }
  0x51   : > { %4317 = shalt.err (!%p4314_p10)
}
  0x52   : > { %4096 = dma.hbm_to_vmem [thread:$0]  (!%p4775_p6), %s5742_s3, 16, %s4779_s26, [#allocation10]  }
  0x53   : > { %s4318_s22 = scalar_lea.hbm %s5711_s5, 16 }
  0x54   : > { %p4319_p11 = scmp.ne.s32.totalorder %s5711_s5, %s4318_s22  ;;  %p4325_p0 = scmp.lt.u32.totalorder %s4318_s22, %s5711_s5 }
  0x56   : > { %p4321_p12 = pnand %p4319_p11, %p4791_p8 }
  0x58   : > { %p4322_p13 = pneg %p4321_p12 }
  0x5a   : > { %p4327_p2 = pnand %p4325_p0, %p4322_p13 }
  0x5c   : > { %4330 = shalt.err (!%p4327_p2)
}
  0x5d   : > { %s4331_s9 = scalar_lea.vmem %s387_s28, 16  ;;  %s4338_s26 = scalar_lea.vmem %s387_s28, 32 }
  0x5e   : > { %p4332_p4 = scmp.ne.s32.totalorder %s387_s28, %s4331_s9  ;;  %p4339_p5 = scmp.lt.s32.totalorder %s387_s28, %s387_s28 }
  0x5f   : > { %p4340_p10 = scmp.lt.s32.totalorder %s4338_s26, %s4331_s9 }
  0x60   : > { %p4334_p7 = pnand %p4332_p4, %p4791_p8 }
  0x61   : > { %p4341_p3 = por %p4340_p10, %p4339_p5 }
  0x62   : > { %p4335_p9 = pneg %p4334_p7 }
  0x64   : > { %p4342_p1 = pnand %p4341_p3, %p4335_p9 }
  0x66   : > { %4345 = shalt.err (!%p4342_p1)
}
  0x67   : > { %4102 = dma.hbm_to_vmem [thread:$0]  (!%p4775_p6), %s5711_s5, 16, %s387_s28, [#allocation13]  }
  0x68   : > { %s4653_s21 = smov [#allocation15]   ;;  %s4654_s22 = smov [#allocation8]  }
  0x69   : > { %s409_s12 = sshll.u32 %s4653_s21, 4  ;;  %s347_s25 = sshll.u32 %s4654_s22, 4  ;;  %s410_s12 = int_to_ptr.vmem [resolvable:$true] %s409_s12  ;;  %s348_s25 = int_to_ptr.vmem [resolvable:$true] %s347_s25 }
  0x6a   : > { %s4346_s23 = scalar_lea.hbm %s5713_s7, 1280 }
  0x6b   : > { %p4347_p1 = scmp.ne.s32.totalorder %s5713_s7, %s4346_s23  ;;  %p4353_p12 = scmp.lt.u32.totalorder %s4346_s23, %s5713_s7 }
  0x6d   : > { %p4349_p3 = pnand %p4347_p1, %p4791_p8 }
  0x6f   : > { %p4350_p11 = pneg %p4349_p3 }
  0x71   : > { %p4355_p13 = pnand %p4353_p12, %p4350_p11 }
  0x73   : > { %4358 = shalt.err (!%p4355_p13)
}
  0x74   : > { %s4359_s28 = scalar_lea.vmem %s410_s12, 1280  ;;  %p4367_p7 = scmp.lt.s32.totalorder %s410_s12, %s410_s12 }
  0x75   : > { %p4360_p0 = scmp.ne.s32.totalorder %s410_s12, %s4359_s28  ;;  %p4368_p9 = scmp.lt.s32.totalorder %s4359_s28, %s4359_s28 }
  0x77   : > { %p4362_p2 = pnand %p4360_p0, %p4791_p8  ;;  %p4369_p5 = por %p4368_p9, %p4367_p7 }
  0x79   : > { %p4363_p4 = pneg %p4362_p2 }
  0x7b   : > { %p4370_p10 = pnand %p4369_p5, %p4363_p4 }
  0x7d   : > { %4373 = shalt.err (!%p4370_p10)
}
  0x7e   : > { %s5743_s16 = smov 128   ;;  %s5744_s2 = sld [smem:[#allocation32_spill]] }
  0x7f   : > { %4108 = dma.hbm_to_vmem [thread:$0]  (!%p4775_p6), %s5713_s7, 1280, %s410_s12, [#allocation16], %s5743_s16, %s5743_s16, %s5727_s11  }
  0x84   : > { %s4374_s29 = scalar_lea.hbm %s5744_s2, 16 }
  0x85   : > { %p4375_p1 = scmp.ne.s32.totalorder %s5744_s2, %s4374_s29  ;;  %p4381_p12 = scmp.lt.u32.totalorder %s4374_s29, %s5744_s2 }
  0x87   : > { %p4377_p3 = pnand %p4375_p1, %p4791_p8 }
  0x89   : > { %p4378_p11 = pneg %p4377_p3 }
  0x8b   : > { %p4383_p13 = pnand %p4381_p12, %p4378_p11 }
  0x8d   : > { %4386 = shalt.err (!%p4383_p13)
}
  0x8e   : > { %s4387_s28 = scalar_lea.vmem %s348_s25, 16  ;;  %s4394_s12 = scalar_lea.vmem %s348_s25, 32 }
  0x8f   : > { %p4388_p0 = scmp.ne.s32.totalorder %s348_s25, %s4387_s28  ;;  %p4395_p7 = scmp.lt.s32.totalorder %s348_s25, %s348_s25 }
  0x90   : > { %p4396_p9 = scmp.lt.s32.totalorder %s4394_s12, %s4387_s28 }
  0x91   : > { %p4390_p2 = pnand %p4388_p0, %p4791_p8 }
  0x92   : > { %p4397_p5 = por %p4396_p9, %p4395_p7 }
  0x93   : > { %p4391_p4 = pneg %p4390_p2 }
  0x95   : > { %p4398_p10 = pnand %p4397_p5, %p4391_p4 }
  0x97   : > { %4401 = shalt.err (!%p4398_p10)
}
  0x98   : > { %4093 = dma.hbm_to_vmem [thread:$0]  (!%p4775_p6), %s5744_s2, 16, %s348_s25, [#allocation7]  }
  0x99   : > { %s4655_s22 = smov [#allocation11]   ;;  %s4402_s9 = scalar_lea.hbm %s5710_s4, 288 }
  0x9a   : > { %s370_s27 = sshll.u32 %s4655_s22, 4  ;;  %p4403_p1 = scmp.ne.s32.totalorder %s5710_s4, %s4402_s9  ;;  %s371_s27 = int_to_ptr.vmem [resolvable:$true] %s370_s27 }
  0x9b   : > { %p4409_p12 = scmp.lt.u32.totalorder %s4402_s9, %s5710_s4 }
  0x9c   : > { %p4405_p3 = pnand %p4403_p1, %p4791_p8 }
  0x9e   : > { %p4406_p11 = pneg %p4405_p3 }
  0xa0   : > { %p4411_p13 = pnand %p4409_p12, %p4406_p11 }
  0xa2   : > { %4414 = shalt.err (!%p4411_p13)
}
  0xa3   : > { %s4415_s25 = scalar_lea.vmem %s371_s27, 288  ;;  %p4423_p7 = scmp.lt.s32.totalorder %s371_s27, %s371_s27 }
  0xa4   : > { %p4416_p0 = scmp.ne.s32.totalorder %s371_s27, %s4415_s25  ;;  %p4424_p9 = scmp.lt.s32.totalorder %s4415_s25, %s4415_s25 }
  0xa6   : > { %p4418_p2 = pnand %p4416_p0, %p4791_p8  ;;  %p4425_p5 = por %p4424_p9, %p4423_p7 }
  0xa8   : > { %p4419_p4 = pneg %p4418_p2 }
  0xaa   : > { %p4426_p10 = pnand %p4425_p5, %p4419_p4 }
  0xac   : > { %4429 = shalt.err (!%p4426_p10)
}
  0xad   : > { %s4656_s30 = smov 32   ;;  %s4657_s21 = smov 2  }
  0xae   : > { %4099 = dma.hbm_to_vmem [thread:$0]  (!%p4775_p6), %s5710_s4, 288, %s371_s27, [#allocation10], %s4656_s30, %s4656_s30, %s4657_s21  }
  0xaf   : > { %s4658_s23 = smov [#allocation14]   ;;  %s4659_s26 = smov [#allocation17]  }
  0xb0   : > { %s399_s9 = sshll.u32 %s4658_s23, 4  ;;  %s425_s10 = sshll.u32 %s4659_s26, 4  ;;  %s400_s9 = int_to_ptr.vmem [resolvable:$true] %s399_s9  ;;  %s4915_s10 = int_to_ptr.vmem [resolvable:$true] %s425_s10 }
  0xb1   : > { %s4430_s25 = scalar_lea.hbm %s5712_s6, 16 }
  0xb2   : > { %p4431_p1 = scmp.ne.s32.totalorder %s5712_s6, %s4430_s25  ;;  %p4437_p12 = scmp.lt.u32.totalorder %s4430_s25, %s5712_s6 }
  0xb4   : > { %p4433_p3 = pnand %p4431_p1, %p4791_p8 }
  0xb6   : > { %p4434_p11 = pneg %p4433_p3 }
  0xb8   : > { %p4439_p13 = pnand %p4437_p12, %p4434_p11 }
  0xba   : > { %4442 = shalt.err (!%p4439_p13)
}
  0xbb   : > { %s4443_s30 = scalar_lea.vmem %s400_s9, 16  ;;  %s4450_s21 = scalar_lea.vmem %s400_s9, 32 }
  0xbc   : > { %p4444_p0 = scmp.ne.s32.totalorder %s400_s9, %s4443_s30  ;;  %p4451_p7 = scmp.lt.s32.totalorder %s400_s9, %s400_s9 }
  0xbd   : > { %p4452_p9 = scmp.lt.s32.totalorder %s4450_s21, %s4443_s30 }
  0xbe   : > { %p4446_p2 = pnand %p4444_p0, %p4791_p8 }
  0xbf   : > { %p4453_p5 = por %p4452_p9, %p4451_p7 }
  0xc0   : > { %p4447_p4 = pneg %p4446_p2 }
  0xc2   : > { %p4454_p10 = pnand %p4453_p5, %p4447_p4 }
  0xc4   : > { %4457 = shalt.err (!%p4454_p10)
}
  0xc5   : > { %4105 = dma.hbm_to_vmem [thread:$0]  (!%p4775_p6), %s5712_s6, 16, %s400_s9, [#allocation13]  }
  0xc6   : > { %s4458_s26 = scalar_lea.hbm %s5714_s8, 32 }
  0xc7   : > { %p4459_p1 = scmp.ne.s32.totalorder %s5714_s8, %s4458_s26  ;;  %p4465_p12 = scmp.lt.u32.totalorder %s4458_s26, %s5714_s8 }
  0xc9   : > { %p4461_p3 = pnand %p4459_p1, %p4791_p8 }
  0xcb   : > { %p4462_p11 = pneg %p4461_p3 }
  0xcd   : > { %p4467_p13 = pnand %p4465_p12, %p4462_p11 }
  0xcf   : > { %4470 = shalt.err (!%p4467_p13)
}
  0xd0   : > { %s4471_s9 = scalar_lea.vmem %s4915_s10, 32  ;;  %p4479_p7 = scmp.lt.s32.totalorder %s4915_s10, %s4915_s10 }
  0xd1   : > { %p4472_p0 = scmp.ne.s32.totalorder %s4915_s10, %s4471_s9  ;;  %p4480_p9 = scmp.lt.s32.totalorder %s4471_s9, %s4471_s9 }
  0xd3   : > { %p4474_p2 = pnand %p4472_p0, %p4791_p8  ;;  %p4481_p5 = por %p4480_p9, %p4479_p7 }
  0xd5   : > { %p4475_p4 = pneg %p4474_p2 }
  0xd7   : > { %p4482_p10 = pnand %p4481_p5, %p4475_p4 }
  0xd9   : > { %4485 = shalt.err (!%p4482_p10)
}
  0xda   : > { %4111 = dma.hbm_to_vmem [thread:$0]  (!%p4775_p6), %s5714_s8, 32, %s4915_s10, [#allocation16]  }
  0xdb   : > { %s3329_s19 = sadd.s32 4294967294, %s4646_s18   ;;  %s46_s21 = sadd.s32 1, %s4642_s17 }
  0xdc   : > { %p48_p8 = scmp.ge.s32.totalorder %s46_s21, 2  ;;  %s53_s24 = sadd.s32 1, %s4634_s15 }
  0xdd   : > { %p60_p1 = scmp.ne.s32.totalorder %s4634_s15, %s4630_s14  ;;  %p61_p3 = scmp.eq.s32.totalorder %s4646_s18, 0 }
  0xde   : > { %s5769_s21 = smov (%p48_p8, %s46_s21), 0  ;;  %p66_p12 = scmp.ne.s32.totalorder %s4630_s14, %s4626_s13 }
  0xdf   : > { %p4966_p11 = por %p61_p3, %p60_p1  ;;  %s50_s10 = ssub.s32 %s4642_s17, %s5769_s21 }
  0xe0   : > { %s5746_s11 = sadd.s32 4294967295, %s4646_s18   ;;  %p51_p13 = scmp.eq.s32.totalorder %s50_s10, 0 }
  0xe1   : > { %p280_p6 = scmp.eq.s32.totalorder %s5746_s11, 1  ;;  %p5747_p0 = scmp.ne.s32.totalorder %s5736_s20, 0 }
  0xe2   : > { %p286_p7 = scmp.eq.s32.totalorder %s3329_s19, 1  ;;  %p4131_p5 = scmp.lt.s32.totalorder %s4646_s18, 2 }
  0xe3   : > { %p4978_p2 = por %p5747_p0, %p66_p12  ;;  %p4982_p4 = por %p280_p6, %p60_p1 }
  0xe4   : > { %s4987_s26 = scalar_select %p51_p13, %s4634_s15, %s53_s24  }
  0xe5   : > { %s5749_s23 = scalar_select %p4982_p4, 1, 0 }
  0xe6   : > { %p4989_p9 = por %p286_p7, %p66_p12  ;;  %s436_s12 = sand.u32 1, %s4634_s15  }
  0xe7   : > { %s4043_s25 = smul.u32 6656, %s4642_s17  ;;  %p4998_p10 = pnand %p4131_p5, %p4966_p11 }
  0xe8   : > { %s5750_s28 = scalar_select %p4989_p9, 1, 0 }
  0xe9   : > { %s4042_s22 = smul.u32 416, %s436_s12  ;;  %s5752_s0 = sld [smem:[#allocation30_spill]] }
  0xea   : > { %s5009_s1 = scalar_lea.sflag [#allocation4], %s436_s12  ;;  %p4488_p1 = pneg %p4998_p10 }
  0xeb   : > { %s440_s24 = scalar_lea.vmem [#allocation3], %s4042_s22 }
  0xec   : > { %s447_s10 = sshll.u32 %s440_s24, 4  ;;  %s5007_s10 = int_to_ptr.vmem [resolvable:$true] %s447_s10 }
  0xef   : > { %s5005_s19 = scalar_lea.hbm %s5752_s0, %s4043_s25  ;;  %s4491_s30 = scalar_lea.hbm %s5752_s0, 13312 }
  0xf0   : > { %s4486_s11 = scalar_lea.hbm %s5005_s19, 6656  ;;  %p4492_p12 = scmp.lt.u32.totalorder %s5005_s19, %s5752_s0 }
  0xf1   : > { %p4487_p8 = scmp.ne.s32.totalorder %s5005_s19, %s4486_s11  ;;  %p4493_p6 = scmp.lt.u32.totalorder %s4491_s30, %s4486_s11 }
  0xf2   : > { %p4495_p0 = scmp.lt.u32.totalorder %s4486_s11, %s5005_s19 }
  0xf3   : > { %p4489_p3 = pnand %p4488_p1, %p4487_p8  ;;  %p4494_p13 = por %p4493_p6, %p4492_p12 }
  0xf5   : > { %p4490_p11 = pneg %p4489_p3  ;;  %p4496_p7 = por %p4495_p0, %p4494_p13 }
  0xf7   : > { %p4497_p5 = pnand %p4496_p7, %p4490_p11 }
  0xf9   : > { %4500 = shalt.err (!%p4497_p5)
}
  0xfa   : > { %s4501_s12 = scalar_lea.vmem %s5007_s10, 6656  ;;  %s4660_s22 = smov [#allocation3]  }
  0xfb   : > { %p4502_p8 = scmp.ne.s32.totalorder %s5007_s10, %s4501_s12  ;;  %s4506_s24 = sshll.u32 %s4660_s22, 4  ;;  %s4507_s24 = int_to_ptr.vmem [resolvable:$false] %s4506_s24 }
  0xfc   : > { %s4508_s2 = scalar_lea.vmem %s4507_s24, 13312  ;;  %p4509_p4 = scmp.lt.s32.totalorder %s5007_s10, %s4507_s24 }
  0xfd   : > { %p4504_p3 = pnand %p4502_p8, %p4488_p1  ;;  %p4510_p12 = scmp.lt.s32.totalorder %s4508_s2, %s4501_s12 }
  0xff   : > { %p4505_p9 = pneg %p4504_p3  ;;  %p4511_p6 = por %p4510_p12, %p4509_p4 }
 0x101   : > { %p4512_p13 = pnand %p4511_p6, %p4505_p9 }
 0x103   : > { %4515 = shalt.err (!%p4512_p13)
}
 0x104   : > { %s5753_s3 = smov 8   ;;  %s5754_s11 = sld [smem:[#allocation29_spill]] }
 0x105   : > { %4115 = dma.hbm_to_vmem [thread:$0]  (!%p4998_p10), %s5005_s19, 6656, %s5007_s10, %s5009_s1, %s5743_s16, %s5743_s16, %s5753_s3  }
 0x10a   : > { %p5755_p1 = scmp.ne.s32.totalorder %s5754_s11, 0 }
 0x10b   : > { %s5043_s25 = sand.u32 (!%p5755_p1), 1, %s4630_s14  }
 0x10c   : > { %459 = sbr.rel (%p5755_p1) target bundleno = 888 (0x378), region = 56  ;;  %s462_s30 = scalar_lea.sflag (!%p5755_p1), [#allocation4], %s5043_s25 }
 0x10d   : > { %s4044_s27 = smul.u32 (!%p5755_p1), 416, %s5043_s25 }
 0x10f   : > { %s5047_s12 = scalar_lea.vmem (!%p5755_p1), [#allocation3], %s4044_s27 }
 0x113   : > { %4597 = dma.done.wait (%p4978_p2), %s462_s30, 6656  }
 0x114   : > { %4599 = vsyncadd (%p4978_p2), %s462_s30, 4294960640  ;;  %p5756_p4 = scmp.ne.s32.totalorder %s5736_s20, 0 }
 0x116   : > { %4601 = dma.done.wait (%p5756_p4), [#allocation7], 6672  }
 0x117   : > { %4603 = vsyncadd (%p5756_p4), [#allocation7], 4294960624 }
 0x118   : > { %4605 = dma.done.wait (%p5756_p4), [#allocation10], 304  }
 0x119   : > { %4607 = vsyncadd (%p5756_p4), [#allocation10], 4294966992 }
 0x11a   : > { %4609 = dma.done.wait (%p5756_p4), [#allocation13], 32  }
 0x11b   : > { %4611 = vsyncadd (%p5756_p4), [#allocation13], 4294967264 }
 0x11c   : > { %4613 = dma.done.wait (%p5756_p4), [#allocation16], 1312  }
 0x11d   : > { %4615 = vsyncadd (%p5756_p4), [#allocation16], 4294965984  ;;  %v4661_v0 = vmov 0   ;;  %v803_v1 = vld [vmem:[#allocation6 + $0x148] sm:$0xff]  ;;  %v801_v2 = vld [vmem:[#allocation6 + $0x138] sm:$0xff]  ;;  %v4662_v11 = vmov 0.0  }
 0x11e   : > { %4209 = vset.pattern.permute.xlu1 %v4661_v0  ;;  %4208 = vset.pattern.permute.xlu0 %v4661_v0  ;;  %v804_v3 = vld [vmem:[#allocation6 + $0x150] sm:$0xff]  ;;  %v802_v4 = vld [vmem:[#allocation6 + $0x140] sm:$0xff]  ;;  %v775_v6 = vld [vmem:[#allocation6 + $0x68] sm:$0xff]  ;;  %s4045_s20 = smul.u32 60, %s5043_s25  ;;  %vm4663_vm0 = vmmov 0   ;;  %vm1457_vm1 = vcmask 1041408  }
 0x11f   : > { %1021 = vperm.xlu1 %4209, %v803_v1   ;;  %1011 = vperm.xlu0 %4208, %v801_v2   ;;  %v776_v5 = vld [vmem:[#allocation6 + $0x70] sm:$0xff]  ;;  %v806_v7 = vld [vmem:[#allocation6 + $0x160] sm:$0xff]  ;;  %v805_v8 = vld [vmem:[#allocation6 + $0x158] sm:$0xff]  ;;  %vm2898_vm2 = vsmask.f32 1280  ;;  %vm1338_vm4 = vcmask 27648  }
 0x120   : > { %v778_v9 = vld [vmem:[#allocation6 + $0x80] sm:$0xff]  ;;  %v777_v10 = vld [vmem:[#allocation6 + $0x78] sm:$0xff]  ;;  %3760 = vmatprep.subr.bf16.mxu0 %v4662_v11  ;;  %3672 = vmatprep.subr.bf16.mxu1 %v4662_v11  ;;  %v808_v12 = vld [vmem:[#allocation6 + $0x170] sm:$0xff]  ;;  %s5076_s16 = scalar_lea.vmem [#allocation18], %s4045_s20  ;;  %vm1441_vm5 = vcmask 31744   ;;  %vm2342_vm8 = vcmask 1046528  }
 0x121   : > { %v807_v13 = vld [vmem:[#allocation6 + $0x168] sm:$0xff]  ;;  %3762 = vmatprep.mubr.msk.bf16.mxu0 %vm4663_vm0, %v4662_v11  ;;  %3674 = vmatprep.mubr.msk.bf16.mxu1 %vm4663_vm0, %v4662_v11  ;;  %2883 = vst [vmem:[%s5076_s16] sm:$0xf] %v4661_v0  ;;  %2884 = vst [vmem:[%s5076_s16 + $0x4] sm:$0xf] %v4661_v0  ;;  %v780_v14 = vld [vmem:[#allocation6 + $0x90] sm:$0xff]  ;;  %s4046_s29 = smul.u32 80, %s5043_s25 }
 0x122   : > { %2885 = vst [vmem:[%s5076_s16 + $0x8] sm:$0xf] %v4661_v0  ;;  %2886 = vst [vmem:[%s5076_s16 + $0xc] sm:$0xf] %v4661_v0  ;;  %v779_v15 = vld [vmem:[#allocation6 + $0x88] sm:$0xff]  ;;  %v810_v19 = vld [vmem:[#allocation6 + $0x180] sm:$0xff] }
 0x123   : > { %1026 = vperm.xlu1 %4209, %v804_v3   ;;  %1016 = vperm.xlu0 %4208, %v802_v4   ;;  %2887 = vst [vmem:[%s5076_s16 + $0x10] sm:$0xf] %v4661_v0  ;;  %2888 = vst [vmem:[%s5076_s16 + $0x14] sm:$0xf] %v4661_v0  ;;  %v1988_v16 = vld [vmem:[#allocation11 + $0x8] sm:$0x3] }
 0x124   : > { %2889 = vst [vmem:[%s5076_s16 + $0x18] sm:$0xf] %v4661_v0  ;;  %2890 = vst [vmem:[%s5076_s16 + $0x1c] sm:$0xf] %v4661_v0  ;;  %v2030_v17 = vsel %vm1457_vm1, %v1988_v16, 0  ;;  %v809_v20 = vld [vmem:[#allocation6 + $0x178] sm:$0xff] }
 0x125   : > { %2891 = vst [vmem:[%s5076_s16 + $0x20] sm:$0xf] %v4661_v0  ;;  %2892 = vst [vmem:[%s5076_s16 + $0x24] sm:$0xf] %v4661_v0  ;;  %v2900_v18 = vld [vmem:[%s5076_s16 + $0x38] sm:$0x3]  ;;  %3761 = vmatpush3.bf16.msra.mxu0 %v2030_v17 }
 0x126   : > { %2893 = vst [vmem:[%s5076_s16 + $0x28] sm:$0xf] %v4661_v0  ;;  %2894 = vst [vmem:[%s5076_s16 + $0x2c] sm:$0xf] %v4661_v0  ;;  %v1415_v21 = vld [vmem:[#allocation11 + $0x2] sm:$0x3]  ;;  %3782 = vmatprep.subr.bf16.mxu0 %v4662_v11 }
 0x127   : > { %886 = vperm.xlu1 %4209, %v776_v5   ;;  %881 = vperm.xlu0 %4208, %v775_v6   ;;  %2895 = vst [vmem:[%s5076_s16 + $0x30] sm:$0xf] %v4661_v0  ;;  %2896 = vst [vmem:[%s5076_s16 + $0x34] sm:$0xf] %v4661_v0  ;;  %v1459_v23 = vsel %vm1457_vm1, %v1415_v21, 0  ;;  %v789_v24 = vld [vmem:[#allocation6 + $0xd8] sm:$0xff] }
 0x128   : > { %vm2899_vm3 = vmand %vm1457_vm1, %vm2898_vm2  ;;  %v788_v25 = vld [vmem:[#allocation6 + $0xd0] sm:$0xff]  ;;  %3673 = vmatpush3.bf16.msra.mxu1 %v1459_v23  ;;  %v791_v26 = vld [vmem:[#allocation6 + $0xe8] sm:$0xff]  ;;  %vm1691_vm6 = vsmask.f32 7424  ;;  %vm2614_vm7 = vsmask.f32 6400 }
 0x129   : > { %v2901_v22 = vsel %vm2899_vm3, 0, %v2900_v18  ;;  %3694 = vmatprep.subr.bf16.mxu1 %v4662_v11  ;;  %v790_v27 = vld [vmem:[#allocation6 + $0xe0] sm:$0xff]  ;;  %v781_v29 = vld [vmem:[#allocation6 + $0x98] sm:$0xff]  ;;  %v792_v31 = vld [vmem:[#allocation6 + $0xf0] sm:$0xff]  ;;  %s5575_s9 = scalar_lea.vmem [#allocation19], %s4046_s29  ;;  %s5757_s19 = sld [smem:[#allocation28_spill]] }
 0x12a   : > { %2902 = vst [vmem:[%s5076_s16 + $0x38] sm:$0x3] %v2901_v22  ;;  %v782_v28 = vld [vmem:[#allocation6 + $0xa0] sm:$0xff]  ;;  %v793_v30 = vld [vmem:[#allocation6 + $0xf8] sm:$0xff]  ;;  %v784_v32 = vld [vmem:[#allocation6 + $0xb0] sm:$0xff]  ;;  %s3127_s10 = sshll.u32 %s5575_s9, 4  ;;  %s5614_s10 = int_to_ptr.vmem [resolvable:$true] %s3127_s10 }
 0x12b   : > { %1036 = vperm.xlu1 %4209, %v806_v7   ;;  %1031 = vperm.xlu0 %4208, %v805_v8   ;;  %v783_v33 = vld [vmem:[#allocation6 + $0xa8] sm:$0xff]  ;;  %v794_v35 = vld [vmem:[#allocation6 + $0x100] sm:$0xff]  ;;  %v797_v38 = vld [vmem:[#allocation6 + $0x118] sm:$0xff]  ;;  %s3110_s22 = sshll.u32 %s5076_s16, 4  ;;  %s5758_s11 = sld [smem:[#allocation34_spill]]  ;;  %s5625_s22 = int_to_ptr.vmem [resolvable:$true] %s3110_s22 }
 0x12c   : > { %v795_v34 = vld [vmem:[#allocation6 + $0x108] sm:$0xff]  ;;  %v762_v37 = vld [vmem:[#allocation6] sm:$0xff]  ;;  %v796_v39 = vld [vmem:[#allocation6 + $0x110] sm:$0xff]  ;;  %s5759_s20 = sld [smem:[#allocation35_spill]]  ;;  %p5760_p9 = scmp.ne.s32.totalorder %s5749_s23, 0 }
 0x12d   : > { %v763_v36 = vld [vmem:[#allocation6 + $0x8] sm:$0xff]  ;;  %v765_v40 = vld [vmem:[#allocation6 + $0x18] sm:$0xff]  ;;  %v764_v41 = vld [vmem:[#allocation6 + $0x10] sm:$0xff]  ;;  %s4664_s2 = smov [#allocation18]  }
 0x12e   : > { %v766_v42 = vld [vmem:[#allocation6 + $0x20] sm:$0xff]  ;;  %v768_v44 = vld [vmem:[#allocation6 + $0x30] sm:$0xff]  ;;  %v767_v45 = vld [vmem:[#allocation6 + $0x28] sm:$0xff]  ;;  %s4520_s3 = sshll.u32 %s4664_s2, 4  ;;  %s4521_s3 = int_to_ptr.vmem [resolvable:$false] %s4520_s3 }
 0x12f   : > { %896 = vperm.xlu1 %4209, %v778_v9   ;;  %891 = vperm.xlu0 %4208, %v777_v10   ;;  %v798_v43 = vld [vmem:[#allocation6 + $0x120] sm:$0xff]  ;;  %v769_v47 = vld [vmem:[#allocation6 + $0x38] sm:$0xff]  ;;  %v772_v48 = vld [vmem:[#allocation6 + $0x50] sm:$0xff]  ;;  %s4047_s1 = smul.u32 960, %s5757_s19  ;;  %s4522_s0 = scalar_lea.vmem %s4521_s3, 1920 }
 0x130   : > { %v770_v46 = vld [vmem:[#allocation6 + $0x40] sm:$0xff]  ;;  %v771_v49 = vld [vmem:[#allocation6 + $0x48] sm:$0xff]  ;;  %v785_v50 = vld [vmem:[#allocation6 + $0xb8] sm:$0xff]  ;;  %s4048_s24 = smul.u32 1280, %s5757_s19  ;;  %s3091_s19 = scalar_lea.sflag [#allocation5], %s5043_s25 }
 0x131   : > { %v773_v51 = vld [vmem:[#allocation6 + $0x58] sm:$0xff]  ;;  %v786_v53 = vld [vmem:[#allocation6 + $0xc0] sm:$0xff]  ;;  %v2815_v54 = vld [vmem:[#allocation15 + $0x10] sm:$0xff]  ;;  %s5623_s27 = scalar_lea.hbm %s5758_s11, %s4047_s1  ;;  %s4516_s1 = scalar_lea.vmem %s5625_s22, 960 }
 0x132   : > { %v2813_v52 = vld [vmem:[#allocation15] sm:$0xff]  ;;  %v2814_v55 = vld [vmem:[#allocation15 + $0x8] sm:$0xff]  ;;  %v2816_v57 = vld [vmem:[#allocation15 + $0x18] sm:$0xff]  ;;  %s5631_s29 = scalar_lea.hbm %s5759_s20, %s4048_s24  ;;  %p4517_p2 = scmp.ne.s32.totalorder %s5625_s22, %s4516_s1 }
 0x133   : > { %1046 = vperm.xlu1 %4209, %v808_v12   ;;  %1041 = vperm.xlu0 %4208, %v807_v13   ;;  %v2817_v56 = vld [vmem:[#allocation15 + $0x20] sm:$0xff]  ;;  %v2819_v58 = vld [vmem:[#allocation15 + $0x30] sm:$0xff]  ;;  %v2818_v59 = vld [vmem:[#allocation15 + $0x28] sm:$0xff]  ;;  %p4523_p0 = scmp.lt.s32.totalorder %s5625_s22, %s4521_s3  ;;  %p4524_p7 = scmp.lt.s32.totalorder %s4522_s0, %s4516_s1 }
 0x134   : > { %v2821_v60 = vld [vmem:[#allocation15 + $0x40] sm:$0xff]  ;;  %v2820_v61 = vld [vmem:[#allocation15 + $0x38] sm:$0xff]  ;;  %v2822_v63 = vld [vmem:[#allocation15 + $0x48] sm:$0xff]  ;;  %p4518_p10 = pnand %p4517_p2, %p5760_p9 }
 0x135   : > { %v774_v62 = vld [vmem:[#allocation6 + $0x60] sm:$0xf]  ;;  %v799_v0 = vld [vmem:[#allocation6 + $0x128] sm:$0xff]  ;;  %v800_v3 = vld [vmem:[#allocation6 + $0x130] sm:$0xf]  ;;  %p4525_p5 = por %p4524_p7, %p4523_p0 }
 0x136   : > { %v787_v1 = vld [vmem:[#allocation6 + $0xc8] sm:$0xf]  ;;  %v5100_v5 = vld [vmem:[#allocation8] ss:$0 sm:$0xff]  ;;  %v579_v6 = vld [vmem:[%s5047_s12 + $0x138] sm:$0xff]  ;;  %p4519_p11 = pneg %p4518_p10 }
 0x137   : > { %906 = vperm.xlu1 %4209, %v780_v14   ;;  %901 = vperm.xlu0 %4208, %v779_v15   ;;  %v811_v2 = vld [vmem:[#allocation6 + $0x188] sm:$0xff]  ;;  %v813_v7 = vld [vmem:[#allocation6 + $0x198] sm:$0xf]  ;;  %v638_v9 = vmul.f32 %v5100_v5, %v579_v6  ;;  %v582_v10 = vld [vmem:[%s5047_s12 + $0x150] sm:$0xff] }
 0x138   : > { %v581_v4 = vld [vmem:[%s5047_s12 + $0x148] sm:$0xff]  ;;  %v812_v12 = vld [vmem:[#allocation6 + $0x190] sm:$0xff]  ;;  %v5106_v13 = vld [vmem:[#allocation9] ss:$0 sm:$0xff]  ;;  %v641_v15 = vmul.f32 %v5100_v5, %v582_v10  ;;  %p4526_p8 = pnand %p4525_p5, %p4519_p11 }
 0x139   : > { %v640_v8 = vmul.f32 %v5100_v5, %v581_v4  ;;  %v580_v14 = vld [vmem:[%s5047_s12 + $0x140] sm:$0xff]  ;;  %v697_v17 = vadd.f32 %v5106_v13, %v638_v9  ;;  %v557_v4 = vld [vmem:[%s5047_s12 + $0x88] sm:$0xff] }
 0x13a   : > { %v639_v18 = vmul.f32 %v5100_v5, %v580_v14  ;;  %v700_v21 = vadd.f32 %v5106_v13, %v641_v15  ;;  %v2127_v9 = vld [vmem:[#allocation11 + $0xa] sm:$0x3] }
 0x13b   : > { %1056 = vperm.xlu1 %4209, %v810_v19   ;;  %1051 = vperm.xlu0 %4208, %v809_v20   ;;  %v699_v16 = vadd.f32 %v5106_v13, %v640_v8  ;;  %v554_v19 = vld [vmem:[%s5047_s12 + $0x70] sm:$0xff]  ;;  %v553_v20 = vld [vmem:[%s5047_s12 + $0x68] sm:$0xff] }
 0x13c   : > { %v613_v22 = vmul.f32 %v5100_v5, %v554_v19  ;;  %v612_v23 = vmul.f32 %v5100_v5, %v553_v20 }
 0x13f   : > { %951 = vperm.xlu1 %4209, %v789_v24   ;;  %946 = vperm.xlu0 %4208, %v788_v25   ;;  %v751_v24 = vmax.f32 %v699_v16, 0.0  ;;  %v749_v25 = vmax.f32 %v697_v17, 0.0  ;;  %v616_v16 = vmul.f32 %v5100_v5, %v557_v4 }
 0x143   : > { %961 = vperm.xlu1 %4209, %v791_v26   ;;  %956 = vperm.xlu0 %4208, %v790_v27   ;;  %v698_v26 = vadd.f32 %v5106_v13, %v639_v18  ;;  %v584_v27 = vld [vmem:[%s5047_s12 + $0x160] sm:$0xff] }
 0x147   : > { %916 = vperm.xlu1 %4209, %v782_v28   ;;  %911 = vperm.xlu0 %4208, %v781_v29   ;;  %v583_v28 = vld [vmem:[%s5047_s12 + $0x158] sm:$0xff] }
 0x14b   : > { %971 = vperm.xlu1 %4209, %v793_v30   ;;  %966 = vperm.xlu0 %4208, %v792_v31   ;;  %v752_v31 = vmax.f32 %v700_v21, 0.0  ;;  %v588_v21 = vld [vmem:[%s5047_s12 + $0x180] sm:$0xff] }
 0x14f   : > { %926 = vperm.xlu1 %4209, %v784_v32   ;;  %921 = vperm.xlu0 %4208, %v783_v33   ;;  %v672_v32 = vadd.f32 %v5106_v13, %v613_v22  ;;  %v671_v33 = vadd.f32 %v5106_v13, %v612_v23  ;;  %v587_v22 = vld [vmem:[%s5047_s12 + $0x178] sm:$0xff] }
 0x153   : > { %981 = vperm.xlu1 %4209, %v795_v34   ;;  %976 = vperm.xlu0 %4208, %v794_v35   ;;  %v643_v34 = vmul.f32 %v5100_v5, %v584_v27  ;;  %v556_v35 = vld [vmem:[%s5047_s12 + $0x80] sm:$0xff] }
 0x157   : > { %821 = vperm.xlu1 %4209, %v763_v36   ;;  %816 = vperm.xlu0 %4208, %v762_v37  }
 0x15b   : > { %991 = vperm.xlu1 %4209, %v797_v38   ;;  %986 = vperm.xlu0 %4208, %v796_v39   ;;  %v750_v38 = vmax.f32 %v698_v26, 0.0  ;;  %v642_v39 = vmul.f32 %v5100_v5, %v583_v28  ;;  %v1402_v26 = vld [vmem:[#allocation11] sm:$0x3] }
 0x15f   : > { %831 = vperm.xlu1 %4209, %v765_v40   ;;  %826 = vperm.xlu0 %4208, %v764_v41   ;;  %v555_v40 = vld [vmem:[%s5047_s12 + $0x78] sm:$0xff] }
 0x163   : > { %836 = vperm.xlu1 %4209, %v766_v42   ;;  %996 = vperm.xlu0 %4208, %v798_v43   ;;  %v615_v43 = vmul.f32 %v5100_v5, %v556_v35 }
 0x167   : > { %846 = vperm.xlu1 %4209, %v768_v44   ;;  %841 = vperm.xlu0 %4208, %v767_v45  }
 0x16b   : > { %856 = vperm.xlu1 %4209, %v770_v46   ;;  %851 = vperm.xlu0 %4208, %v769_v47   ;;  %v724_v46 = vmax.f32 %v672_v32, 0.0  ;;  %v723_v47 = vmax.f32 %v671_v33, 0.0  ;;  %v647_v32 = vmul.f32 %v5100_v5, %v588_v21  ;;  %v646_v33 = vmul.f32 %v5100_v5, %v587_v22 }
 0x16f   : > { %866 = vperm.xlu1 %4209, %v772_v48   ;;  %861 = vperm.xlu0 %4208, %v771_v49   ;;  %v702_v48 = vadd.f32 %v5106_v13, %v643_v34 }
 0x173   : > { %931 = vperm.xlu1 %4209, %v785_v50   ;;  %871 = vperm.xlu0 %4208, %v773_v51   ;;  %v701_v51 = vadd.f32 %v5106_v13, %v642_v39  ;;  %v566_v39 = vld [vmem:[%s5047_s12 + $0xd0] sm:$0xff] }
 0x177   : > { %2825 = vperm.xlu1 %4209, %v2813_v52   ;;  %936 = vperm.xlu0 %4208, %v786_v53   ;;  %v614_v52 = vmul.f32 %v5100_v5, %v555_v40  ;;  %v586_v53 = vld [vmem:[%s5047_s12 + $0x170] sm:$0xff] }
 0x17b   : > { %2835 = vperm.xlu1 %4209, %v2815_v54   ;;  %2830 = vperm.xlu0 %4208, %v2814_v55   ;;  %v585_v54 = vld [vmem:[%s5047_s12 + $0x168] sm:$0xff] }
 0x17f   : > { %2845 = vperm.xlu1 %4209, %v2817_v56   ;;  %2840 = vperm.xlu0 %4208, %v2816_v57   ;;  %v674_v57 = vadd.f32 %v5106_v13, %v615_v43  ;;  %v1575_v43 = vsel %vm1457_vm1, %v1402_v26, 0 }
 0x181   : > { %v726_v8 = vmax.f32 %v674_v57, 0.0 }
 0x183   : > { %2855 = vperm.xlu1 %4209, %v2819_v58   ;;  %2850 = vperm.xlu0 %4208, %v2818_v59  }
 0x187   : > { %2865 = vperm.xlu1 %4209, %v2821_v60   ;;  %2860 = vperm.xlu0 %4208, %v2820_v61   ;;  %v754_v60 = vmax.f32 %v702_v48, 0.0  ;;  %v645_v61 = vmul.f32 %v5100_v5, %v586_v53  ;;  %v706_v48 = vadd.f32 %v5106_v13, %v647_v32  ;;  %v625_v53 = vmul.f32 %v5100_v5, %v566_v39  ;;  %v561_v39 = vld [vmem:[%s5047_s12 + $0xa8] sm:$0xff] }
 0x189   : > { %v704_v15 = vadd.f32 %v5106_v13, %v645_v61 }
 0x18b   : > { %876 = vperm.xlu1 %4209, %v774_v62   ;;  %2870 = vperm.xlu0 %4208, %v2822_v63   ;;  %v644_v62 = vmul.f32 %v5100_v5, %v585_v54  ;;  %v558_v63 = vld [vmem:[%s5047_s12 + $0x90] sm:$0xff]  ;;  %v569_v54 = vld [vmem:[%s5047_s12 + $0xe8] sm:$0xff] }
 0x18c   : > { %v617_v10 = vmul.f32 %v5100_v5, %v558_v63 }
 0x18d   : > { %v703_v20 = vadd.f32 %v5106_v13, %v644_v62  ;;  %v758_v62 = vmax.f32 %v706_v48, 0.0 }
 0x18f   : > { %1001 = vperm.xlu1 %4209, %v799_v0   ;;  %941 = vperm.xlu0 %4208, %v787_v1  }
 0x193   : > { %1061 = vperm.xlu1 %4209, %v811_v2   ;;  %1006 = vperm.xlu0 %4208, %v800_v3   ;;  %v753_v2 = vmax.f32 %v701_v51, 0.0  ;;  %v673_v3 = vadd.f32 %v5106_v13, %v614_v52  ;;  %v705_v52 = vadd.f32 %v5106_v13, %v646_v33 }
 0x195   : > { %v725_v19 = vmax.f32 %v673_v3, 0.0  ;;  %v757_v4 = vmax.f32 %v705_v52, 0.0  ;;  %v620_v52 = vmul.f32 %v5100_v5, %v561_v39 }
 0x197   : > { %1071 = vperm.xlu1 %4209, %v813_v7   ;;  %1066 = vperm.xlu0 %4208, %v812_v12  }
 0x19e   : > { %v1022_v29 = vpop.permute.xlu1 %1021  ;;  %v1012_v30 = vpop.permute.xlu0 %1011 }
 0x19f   : > { %v1115_v36 = vmul.f32 %v1022_v29, %v751_v24  ;;  %v1113_v37 = vmul.f32 %v1012_v30, %v749_v25  ;;  %v676_v25 = vadd.f32 %v5106_v13, %v617_v10  ;;  %v2216_v30 = vsel %vm1457_vm1, %v2127_v9, 0  ;;  %v571_v10 = vld [vmem:[%s5047_s12 + $0xf8] sm:$0xff] }
 0x1a1   : > { %v3561_v41 = vpack.c.bf16 %v1115_v36, %v1115_v36  ;;  %v3559_v42 = vpack.c.bf16 %v1113_v37, %v1113_v37  ;;  %v756_v36 = vmax.f32 %v704_v15, 0.0  ;;  %v755_v37 = vmax.f32 %v703_v20, 0.0 }
 0x1a2   : > { %v1027_v44 = vpop.permute.xlu1 %1026  ;;  %v1017_v45 = vpop.permute.xlu0 %1016 }
 0x1a3   : > { %1381 = vst.msk [vmem:[#allocation2 + $0xa4] sm:$0xf] %vm1338_vm4, %v3561_v41  ;;  %1379 = vst.msk [vmem:[#allocation2 + $0x9c] sm:$0xf] %vm1338_vm4, %v3559_v42  ;;  %v1116_v49 = vmul.f32 %v1027_v44, %v752_v31  ;;  %v1114_v50 = vmul.f32 %v1017_v45, %v750_v38  ;;  %v675_v31 = vadd.f32 %v5106_v13, %v616_v16  ;;  %v567_v38 = vld [vmem:[%s5047_s12 + $0xd8] sm:$0xff]  ;;  %v728_v42 = vmax.f32 %v676_v25, 0.0 }
 0x1a5   : > { %v3562_v55 = vpack.c.bf16 %v1116_v49, %v1116_v49  ;;  %v3560_v56 = vpack.c.bf16 %v1114_v50, %v1114_v50  ;;  %v626_v49 = vmul.f32 %v5100_v5, %v567_v38  ;;  %v562_v38 = vld [vmem:[%s5047_s12 + $0xb0] sm:$0xff] }
 0x1a6   : > { %v887_v58 = vpop.permute.xlu1 %886  ;;  %v882_v59 = vpop.permute.xlu0 %881  ;;  %v621_v48 = vmul.f32 %v5100_v5, %v562_v38 }
 0x1a7   : > { %1382 = vst.msk [vmem:[#allocation2 + $0xa8] sm:$0xf] %vm1338_vm4, %v3562_v55  ;;  %1380 = vst.msk [vmem:[#allocation2 + $0xa0] sm:$0xf] %vm1338_vm4, %v3560_v56  ;;  %v1088_v0 = vmul.f32 %v887_v58, %v724_v46  ;;  %v1087_v1 = vmul.f32 %v882_v59, %v723_v47  ;;  %v727_v47 = vmax.f32 %v675_v31, 0.0  ;;  %v568_v55 = vld [vmem:[%s5047_s12 + $0xe0] sm:$0xff]  ;;  %v685_v63 = vadd.f32 %v5106_v13, %v626_v49 }
 0x1a8   : > { %v560_v58 = vld [vmem:[%s5047_s12 + $0xa0] sm:$0xff] }
 0x1a9   : > { %v3534_v6 = vpack.c.bf16 %v1088_v0, %v1088_v0  ;;  %v3533_v7 = vpack.c.bf16 %v1087_v1, %v1087_v1  ;;  %v628_v0 = vmul.f32 %v5100_v5, %v569_v54  ;;  %v627_v1 = vmul.f32 %v5100_v5, %v568_v55  ;;  %v572_v54 = vld [vmem:[%s5047_s12 + $0x100] sm:$0xff] }
 0x1aa   : > { %v1037_v12 = vpop.permute.xlu1 %1036  ;;  %v1032_v14 = vpop.permute.xlu0 %1031  ;;  %v737_v16 = vmax.f32 %v685_v63, 0.0  ;;  %v680_v63 = vadd.f32 %v5106_v13, %v621_v48  ;;  %v2313_v48 = vld [vmem:[#allocation11 + $0xc] sm:$0x3] }
 0x1ab   : > { %1354 = vst.msk [vmem:[#allocation2 + $0x38] sm:$0xf] %vm1338_vm4, %v3534_v6  ;;  %1353 = vst.msk [vmem:[#allocation2 + $0x34] sm:$0xf] %vm1338_vm4, %v3533_v7  ;;  %v1118_v17 = vmul.f32 %v1037_v12, %v754_v60  ;;  %v1117_v18 = vmul.f32 %v1032_v14, %v753_v2  ;;  %v684_v6 = vadd.f32 %v5106_v13, %v625_v53  ;;  %v559_v7 = vld [vmem:[%s5047_s12 + $0x98] sm:$0xff]  ;;  %v573_v53 = vld [vmem:[%s5047_s12 + $0x108] sm:$0xff] }
 0x1ad   : > { %v3564_v23 = vpack.c.bf16 %v1118_v17, %v1118_v17  ;;  %v3563_v24 = vpack.c.bf16 %v1117_v18, %v1117_v18  ;;  %v687_v17 = vadd.f32 %v5106_v13, %v628_v0  ;;  %v619_v18 = vmul.f32 %v5100_v5, %v560_v58  ;;  %v541_v58 = vld [vmem:[%s5047_s12 + $0x8] sm:$0xff] }
 0x1ae   : > { %v897_v27 = vpop.permute.xlu1 %896  ;;  %v892_v28 = vpop.permute.xlu0 %891  ;;  %v4210_v29 = vld [vmem:[#allocation2 + $0x9c] sm:$0xff]   ;;  %v4212_v61 = vld [vmem:[#allocation2 + $0xa4] sm:$0xff]   ;;  %v736_v22 = vmax.f32 %v684_v6, 0.0  ;;  %v632_v0 = vmul.f32 %v5100_v5, %v573_v53  ;;  %v540_v6 = vld [vmem:[%s5047_s12] sm:$0xff] }
 0x1af   : > { %1384 = vst.msk [vmem:[#allocation2 + $0xb0] sm:$0xf] %vm1338_vm4, %v3564_v23  ;;  %1383 = vst.msk [vmem:[#allocation2 + $0xac] sm:$0xf] %vm1338_vm4, %v3563_v24  ;;  %v1090_v34 = vmul.f32 %v897_v27, %v726_v8  ;;  %v1089_v35 = vmul.f32 %v892_v28, %v725_v19  ;;  %3763 = vmatmul.mubr.msk.bf16.vlgmr.msra.gmra.mrb[0].mxu0 %vm1441_vm5, %v4210_v29  ;;  %v618_v19 = vmul.f32 %v5100_v5, %v559_v7  ;;  %v570_v24 = vld [vmem:[%s5047_s12 + $0xf0] sm:$0xff] }
 0x1b0   : > { %3783 = vmatpush3.bf16.msra.mxu0 %v2216_v30  ;;  %3766 = vmatprep.mubr.msk.bf16.mxu0 %vm4663_vm0, %v4662_v11  ;;  %v686_v23 = vadd.f32 %v5106_v13, %v627_v1  ;;  %v630_v27 = vmul.f32 %v5100_v5, %v571_v10  ;;  %v739_v31 = vmax.f32 %v687_v17, 0.0  ;;  %v678_v32 = vadd.f32 %v5106_v13, %v619_v18  ;;  %v575_v10 = vld [vmem:[%s5047_s12 + $0x118] sm:$0xff] }
 0x1b1   : > { %v3536_v40 = vpack.c.bf16 %v1090_v34, %v1090_v34  ;;  %v3535_v41 = vpack.c.bf16 %v1089_v35, %v1089_v35  ;;  %3804 = vmatprep.subr.bf16.mxu0 %v4662_v11  ;;  %v629_v33 = vmul.f32 %v5100_v5, %v570_v24  ;;  %v599_v17 = vmul.f32 %v5100_v5, %v540_v6 }
 0x1b2   : > { %v1047_v44 = vpop.permute.xlu1 %1046  ;;  %v1042_v45 = vpop.permute.xlu0 %1041  ;;  %v4211_v46 = vld [vmem:[#allocation2 + $0x34] sm:$0xff]   ;;  %v634_v24 = vmul.f32 %v5100_v5, %v575_v10 }
 0x1b3   : > { %1356 = vst.msk [vmem:[#allocation2 + $0x40] sm:$0xf] %vm1338_vm4, %v3536_v40  ;;  %1355 = vst.msk [vmem:[#allocation2 + $0x3c] sm:$0xf] %vm1338_vm4, %v3535_v41  ;;  %v1120_v50 = vmul.f32 %v1047_v44, %v756_v36  ;;  %v1119_v51 = vmul.f32 %v1042_v45, %v755_v37  ;;  %3675 = vmatmul.mubr.msk.bf16.vlgmr.msra.gmra.mrb[0].mxu1 %vm1441_vm5, %v4211_v46  ;;  %v738_v36 = vmax.f32 %v686_v23, 0.0  ;;  %v730_v46 = vmax.f32 %v678_v32, 0.0 }
 0x1b4   : > { %3678 = vmatprep.mubr.msk.bf16.mxu1 %vm4663_vm0, %v4662_v11  ;;  %3695 = vmatpush3.bf16.msra.mxu1 %v1575_v43  ;;  %v677_v37 = vadd.f32 %v5106_v13, %v618_v19  ;;  %v574_v23 = vld [vmem:[%s5047_s12 + $0x110] sm:$0xff] }
 0x1b5   : > { %v3566_v56 = vpack.c.bf16 %v1120_v50, %v1120_v50  ;;  %v3565_v57 = vpack.c.bf16 %v1119_v51, %v1119_v51  ;;  %3716 = vmatprep.subr.bf16.mxu1 %v4662_v11 }
 0x1b6   : > { %v907_v59 = vpop.permute.xlu1 %906  ;;  %v902_v60 = vpop.permute.xlu0 %901  ;;  %v4214_v30 = vld [vmem:[#allocation2 + $0xac] sm:$0xff]   ;;  %v729_v51 = vmax.f32 %v677_v37, 0.0 }
 0x1b7   : > { %1386 = vst.msk [vmem:[#allocation2 + $0xb8] sm:$0xf] %vm1338_vm4, %v3566_v56  ;;  %1385 = vst.msk [vmem:[#allocation2 + $0xb4] sm:$0xf] %vm1338_vm4, %v3565_v57  ;;  %v1092_v2 = vmul.f32 %v907_v59, %v728_v42  ;;  %v1091_v3 = vmul.f32 %v902_v60, %v727_v47  ;;  %3767 = vmatmul.mubr.msk.bf16.gmra.mrb[4].mxu0 %vm1441_vm5, %v4212_v61  ;;  %v689_v42 = vadd.f32 %v5106_v13, %v630_v27 }
 0x1b8   : > { %3770 = vmatprep.mubr.msk.bf16.mxu0 %vm4663_vm0, %v4662_v11  ;;  %v688_v47 = vadd.f32 %v5106_v13, %v629_v33 }
 0x1b9   : > { %v3538_v8 = vpack.c.bf16 %v1092_v2, %v1092_v2  ;;  %v3537_v9 = vpack.c.bf16 %v1091_v3, %v1091_v3  ;;  %v741_v57 = vmax.f32 %v689_v42, 0.0  ;;  %v679_v3 = vadd.f32 %v5106_v13, %v620_v52 }
 0x1ba   : > { %v1057_v12 = vpop.permute.xlu1 %1056  ;;  %v1052_v14 = vpop.permute.xlu0 %1051  ;;  %v4213_v15 = vld [vmem:[#allocation2 + $0x3c] sm:$0xff]   ;;  %v5253_v42 = vadd.f32 %v5106_v13, %v634_v24 }
 0x1bb   : > { %1358 = vst.msk [vmem:[#allocation2 + $0x48] sm:$0xf] %vm1338_vm4, %v3538_v8  ;;  %1357 = vst.msk [vmem:[#allocation2 + $0x44] sm:$0xf] %vm1338_vm4, %v3537_v9  ;;  %v1122_v20 = vmul.f32 %v1057_v12, %v758_v62  ;;  %v1121_v21 = vmul.f32 %v1052_v14, %v757_v4  ;;  %3679 = vmatmul.mubr.msk.bf16.gmra.mrb[4].mxu1 %vm1441_vm5, %v4213_v15  ;;  %v740_v62 = vmax.f32 %v688_v47, 0.0  ;;  %v732_v15 = vmax.f32 %v680_v63, 0.0 }
 0x1bc   : > { %3682 = vmatprep.mubr.msk.bf16.mxu1 %vm4663_vm0, %v4662_v11  ;;  %v631_v4 = vmul.f32 %v5100_v5, %v572_v54  ;;  %v600_v9 = vmul.f32 %v5100_v5, %v541_v58 }
 0x1bd   : > { %v3568_v25 = vpack.c.bf16 %v1122_v20, %v1122_v20  ;;  %v3567_v26 = vpack.c.bf16 %v1121_v21, %v1121_v21  ;;  %v731_v21 = vmax.f32 %v679_v3, 0.0  ;;  %v546_v3 = vld [vmem:[%s5047_s12 + $0x30] sm:$0xff] }
 0x1be   : > { %v952_v28 = vpop.permute.xlu1 %951  ;;  %v947_v29 = vpop.permute.xlu0 %946  ;;  %v4216_v61 = vld [vmem:[#allocation2 + $0xb4] sm:$0xff]  }
 0x1bf   : > { %1388 = vst.msk [vmem:[#allocation2 + $0xc0] sm:$0xf] %vm1338_vm4, %v3568_v25  ;;  %1387 = vst.msk [vmem:[#allocation2 + $0xbc] sm:$0xf] %vm1338_vm4, %v3567_v26  ;;  %v1101_v34 = vmul.f32 %v952_v28, %v737_v16  ;;  %v1100_v35 = vmul.f32 %v947_v29, %v736_v22  ;;  %3771 = vmatmul.mubr.msk.bf16.gmra.mrb[8].mxu0 %vm1441_vm5, %v4214_v30  ;;  %v691_v16 = vadd.f32 %v5106_v13, %v632_v0  ;;  %v543_v30 = vld [vmem:[%s5047_s12 + $0x18] sm:$0xff] }
 0x1c0   : > { %3774 = vmatprep.mubr.msk.bf16.mxu0 %vm4663_vm0, %v4662_v11  ;;  %v690_v22 = vadd.f32 %v5106_v13, %v631_v4  ;;  %v659_v28 = vadd.f32 %v5106_v13, %v600_v9  ;;  %v545_v4 = vld [vmem:[%s5047_s12 + $0x28] sm:$0xff] }
 0x1c1   : > { %v3547_v40 = vpack.c.bf16 %v1101_v34, %v1101_v34  ;;  %v3546_v41 = vpack.c.bf16 %v1100_v35, %v1100_v35  ;;  %v743_v33 = vmax.f32 %v691_v16, 0.0  ;;  %v658_v34 = vadd.f32 %v5106_v13, %v599_v17 }
 0x1c2   : > { %v962_v43 = vpop.permute.xlu1 %961  ;;  %v957_v44 = vpop.permute.xlu0 %956  ;;  %v4215_v45 = vld [vmem:[#allocation2 + $0x44] sm:$0xff]   ;;  %v742_v39 = vmax.f32 %v690_v22, 0.0 }
 0x1c3   : > { %1367 = vst.msk [vmem:[#allocation2 + $0x6c] sm:$0xf] %vm1338_vm4, %v3547_v40  ;;  %1366 = vst.msk [vmem:[#allocation2 + $0x68] sm:$0xf] %vm1338_vm4, %v3546_v41  ;;  %v1103_v49 = vmul.f32 %v962_v43, %v739_v31  ;;  %v1102_v50 = vmul.f32 %v957_v44, %v738_v36  ;;  %3683 = vmatmul.mubr.msk.bf16.gmra.mrb[8].mxu1 %vm1441_vm5, %v4215_v45  ;;  %v633_v36 = vmul.f32 %v5100_v5, %v574_v23  ;;  %v542_v40 = vld [vmem:[%s5047_s12 + $0x10] sm:$0xff] }
 0x1c4   : > { %3686 = vmatprep.mubr.msk.bf16.mxu1 %vm4663_vm0, %v4662_v11  ;;  %v602_v43 = vmul.f32 %v5100_v5, %v543_v30  ;;  %v710_v54 = vmax.f32 %v658_v34, 0.0 }
 0x1c5   : > { %v3549_v55 = vpack.c.bf16 %v1103_v49, %v1103_v49  ;;  %v3548_v56 = vpack.c.bf16 %v1102_v50, %v1102_v50  ;;  %v544_v49 = vld [vmem:[%s5047_s12 + $0x20] sm:$0xff] }
 0x1c6   : > { %v917_v59 = vpop.permute.xlu1 %916  ;;  %v912_v60 = vpop.permute.xlu0 %911  ;;  %v4217_v27 = vld [vmem:[#allocation2 + $0xbc] sm:$0xff]   ;;  %v576_v50 = vld [vmem:[%s5047_s12 + $0x120] sm:$0xff] }
 0x1c7   : > { %1369 = vst.msk [vmem:[#allocation2 + $0x74] sm:$0xf] %vm1338_vm4, %v3549_v55  ;;  %1368 = vst.msk [vmem:[#allocation2 + $0x70] sm:$0xf] %vm1338_vm4, %v3548_v56  ;;  %v1094_v1 = vmul.f32 %v917_v59, %v730_v46  ;;  %v1093_v2 = vmul.f32 %v912_v60, %v729_v51  ;;  %3775 = vmatmul.mubr.msk.bf16.gmra.mrb[12].mxu0 %vm1441_vm5, %v4216_v61  ;;  %v711_v46 = vmax.f32 %v659_v28, 0.0  ;;  %v745_v61 = vmax.f32 %v5253_v42, 0.0 }
 0x1c8   : > { %3778 = vmatprep.mubr.msk.bf16.mxu0 %vm4663_vm0, %v4662_v11  ;;  %v692_v55 = vadd.f32 %v5106_v13, %v633_v36  ;;  %v601_v56 = vmul.f32 %v5100_v5, %v542_v40 }
 0x1c9   : > { %v3540_v7 = vpack.c.bf16 %v1094_v1, %v1094_v1  ;;  %v3539_v8 = vpack.c.bf16 %v1093_v2, %v1093_v2  ;;  %v603_v2 = vmul.f32 %v5100_v5, %v544_v49 }
 0x1ca   : > { %v972_v12 = vpop.permute.xlu1 %971  ;;  %v967_v14 = vpop.permute.xlu0 %966  ;;  %v4219_v18 = vld [vmem:[#allocation2 + $0x68] sm:$0xff]   ;;  %v660_v9 = vadd.f32 %v5106_v13, %v601_v56  ;;  %v744_v17 = vmax.f32 %v692_v55, 0.0 }
 0x1cb   : > { %1360 = vst.msk [vmem:[#allocation2 + $0x50] sm:$0xf] %vm1338_vm4, %v3540_v7  ;;  %1359 = vst.msk [vmem:[#allocation2 + $0x4c] sm:$0xf] %vm1338_vm4, %v3539_v8  ;;  %v1105_v19 = vmul.f32 %v972_v12, %v741_v57  ;;  %v1104_v20 = vmul.f32 %v967_v14, %v740_v62  ;;  %v2159_v29 = vshll.u32 %v4219_v18, 16  ;;  %v2157_v59 = vshrl.u32 %v4219_v18, 16 }
 0x1cc   : > { %v661_v62 = vadd.f32 %v5106_v13, %v602_v43  ;;  %v2370_v8 = vsel %vm1457_vm1, %v2313_v48, 0  ;;  %v635_v12 = vmul.f32 %v5100_v5, %v576_v50  ;;  %v662_v24 = vadd.f32 %v5106_v13, %v603_v2  ;;  %v1662_v43 = vld [vmem:[#allocation11 + $0x4] sm:$0x3] }
 0x1cd   : > { %v3551_v25 = vpack.c.bf16 %v1105_v19, %v1105_v19  ;;  %v3550_v26 = vpack.c.bf16 %v1104_v20, %v1104_v20  ;;  %v2161_v47 = vrot.slane %v2159_v29, 1  ;;  %v605_v19 = vmul.f32 %v5100_v5, %v546_v3 }
 0x1ce   : > { %v927_v31 = vpop.permute.xlu1 %926  ;;  %v922_v32 = vpop.permute.xlu0 %921  ;;  %v5244_v35 = vld [vmem:[#allocation2 + $0x70] sm:$0xff]   ;;  %v604_v20 = vmul.f32 %v5100_v5, %v545_v4  ;;  %v713_v23 = vmax.f32 %v661_v62, 0.0  ;;  %v712_v29 = vmax.f32 %v660_v9, 0.0  ;;  %v694_v30 = vadd.f32 %v5106_v13, %v635_v12  ;;  %v563_v62 = vld [vmem:[%s5047_s12 + $0xb8] sm:$0xff] }
 0x1cf   : > { %1371 = vst.msk [vmem:[#allocation2 + $0x7c] sm:$0xf] %vm1338_vm4, %v3551_v25  ;;  %1370 = vst.msk [vmem:[#allocation2 + $0x78] sm:$0xf] %vm1338_vm4, %v3550_v26  ;;  %v1096_v37 = vmul.f32 %v927_v31, %v732_v15  ;;  %v1095_v38 = vmul.f32 %v922_v32, %v731_v21  ;;  %3779 = vmatmul.mubr.msk.bf16.gmra.mrb[16].mxu0 %vm1441_vm5, %v4217_v27  ;;  %v2164_v41 = vshll.u32 %v5244_v35, 16  ;;  %v548_v25 = vld [vmem:[%s5047_s12 + $0x40] sm:$0xff] }
 0x1d0   : > { %3784 = vmatprep.mubr.msk.bf16.mxu0 %vm4663_vm0, %v4662_v11  ;;  %v2162_v1 = vor.u32 %v2161_v47, %v2157_v59  ;;  %v5295_v36 = vadd.f32 %v5106_v13, %v605_v19  ;;  %v714_v42 = vmax.f32 %v662_v24, 0.0  ;;  %v607_v48 = vmul.f32 %v5100_v5, %v548_v25 }
 0x1d1   : > { %v3542_v44 = vpack.c.bf16 %v1096_v37, %v1096_v37  ;;  %v3541_v45 = vpack.c.bf16 %v1095_v38, %v1095_v38  ;;  %v2166_v60 = vrot.slane %v2164_v41, 1  ;;  %v5298_v37 = vadd.f32 %v5106_v13, %v604_v20  ;;  %v547_v38 = vld [vmem:[%s5047_s12 + $0x38] sm:$0xff] }
 0x1d2   : > { %v982_v51 = vpop.permute.xlu1 %981  ;;  %v977_v52 = vpop.permute.xlu0 %976  ;;  %v4218_v53 = vld [vmem:[#allocation2 + $0x4c] sm:$0xff]   ;;  %v666_v4 = vadd.f32 %v5106_v13, %v607_v48  ;;  %v622_v12 = vmul.f32 %v5100_v5, %v563_v62 }
 0x1d3   : > { %1362 = vst.msk [vmem:[#allocation2 + $0x58] sm:$0xf] %vm1338_vm4, %v3542_v44  ;;  %1361 = vst.msk [vmem:[#allocation2 + $0x54] sm:$0xf] %vm1338_vm4, %v3541_v45  ;;  %v1107_v57 = vmul.f32 %v982_v51, %v743_v33  ;;  %v1106_v58 = vmul.f32 %v977_v52, %v742_v39  ;;  %3687 = vmatmul.mubr.msk.bf16.gmra.mrb[12].mxu1 %vm1441_vm5, %v4218_v53  ;;  %v2167_v16 = vsel %vm1691_vm6, %v2162_v1, %v2166_v60  ;;  %v549_v53 = vld [vmem:[%s5047_s12 + $0x48] sm:$0xff] }
 0x1d4   : > { %3690 = vmatprep.mubr.msk.bf16.mxu1 %vm4663_vm0, %v4662_v11  ;;  %v2168_v33 = vshrl.u32 %v5244_v35, 16  ;;  %v550_v35 = vld [vmem:[%s5047_s12 + $0x50] sm:$0xff]  ;;  %v606_v52 = vmul.f32 %v5100_v5, %v547_v38  ;;  %v715_v55 = vmax.f32 %v5298_v37, 0.0  ;;  %v718_v19 = vmax.f32 %v666_v4, 0.0 }
 0x1d5   : > { %v3553_v63 = vpack.c.bf16 %v1107_v57, %v1107_v57  ;;  %v3552_v0 = vpack.c.bf16 %v1106_v58, %v1106_v58  ;;  %v609_v57 = vmul.f32 %v5100_v5, %v550_v35 }
 0x1d6   : > { %v822_v6 = vpop.permute.xlu1 %821  ;;  %v817_v7 = vpop.permute.xlu0 %816  ;;  %v5274_v10 = vld [vmem:[#allocation2 + $0x78] sm:$0xff]   ;;  %v2170_v41 = vor.u32 %v2168_v33, %v2166_v60  ;;  %v1752_v60 = vsel %vm1457_vm1, %v1662_v43, 0  ;;  %v665_v9 = vadd.f32 %v5106_v13, %v606_v52 }
 0x1d7   : > { %1373 = vst.msk [vmem:[#allocation2 + $0x84] sm:$0xf] %vm1338_vm4, %v3553_v63  ;;  %1372 = vst.msk [vmem:[#allocation2 + $0x80] sm:$0xf] %vm1338_vm4, %v3552_v0  ;;  %v1075_v14 = vmul.f32 %v822_v6, %v711_v46  ;;  %v1074_v15 = vmul.f32 %v817_v7, %v710_v54  ;;  %3785 = vmatmul.mubr.msk.bf16.vlgmr.msra.gmra.mrb[0].mxu0 %vm1441_vm5, %v2167_v16  ;;  %v2172_v18 = vshll.u32 %v5274_v10, 16  ;;  %v746_v46 = vmax.f32 %v694_v30, 0.0 }
 0x1d8   : > { %3805 = vmatpush3.bf16.msra.mxu0 %v2370_v8  ;;  %3788 = vmatprep.mubr.msk.bf16.mxu0 %vm4663_vm0, %v4662_v11  ;;  %v716_v54 = vmax.f32 %v5295_v36, 0.0  ;;  %v551_v63 = vld [vmem:[%s5047_s12 + $0x58] sm:$0xff]  ;;  %v608_v6 = vmul.f32 %v5100_v5, %v549_v53 }
 0x1d9   : > { %v3521_v21 = vpack.c.bf16 %v1075_v14, %v1075_v14  ;;  %v3520_v22 = vpack.c.bf16 %v1074_v15, %v1074_v15  ;;  %3826 = vmatprep.subr.bf16.mxu0 %v4662_v11  ;;  %v2174_v34 = vrot.slane %v2172_v18, 1 }
 0x1da   : > { %v992_v26 = vpop.permute.xlu1 %991  ;;  %v987_v27 = vpop.permute.xlu0 %986  ;;  %v4221_v28 = vld [vmem:[#allocation2 + $0x54] sm:$0xff]   ;;  %v667_v20 = vadd.f32 %v5106_v13, %v608_v6 }
 0x1db   : > { %1340 = vst.msk [vmem:[#allocation2 + $0x4] sm:$0xf] %vm1338_vm4, %v3521_v21  ;;  %1339 = vst.msk [vmem:[#allocation2] sm:$0xf] %vm1338_vm4, %v3520_v22  ;;  %v1109_v31 = vmul.f32 %v992_v26, %v745_v61  ;;  %v1108_v32 = vmul.f32 %v987_v27, %v744_v17  ;;  %3691 = vmatmul.mubr.msk.bf16.gmra.mrb[16].mxu1 %vm1441_vm5, %v4221_v28  ;;  %v2175_v51 = vsel %vm1691_vm6, %v2170_v41, %v2174_v34  ;;  %v564_v27 = vld [vmem:[%s5047_s12 + $0xc0] sm:$0xff] }
 0x1dc   : > { %3696 = vmatprep.mubr.msk.bf16.mxu1 %vm4663_vm0, %v4662_v11  ;;  %v2176_v61 = vshrl.u32 %v5274_v10, 16  ;;  %v668_v10 = vadd.f32 %v5106_v13, %v609_v57  ;;  %v610_v22 = vmul.f32 %v5100_v5, %v551_v63  ;;  %v717_v26 = vmax.f32 %v665_v9, 0.0 }
 0x1dd   : > { %v3555_v39 = vpack.c.bf16 %v1109_v31, %v1109_v31  ;;  %v3554_v40 = vpack.c.bf16 %v1108_v32, %v1108_v32  ;;  %v681_v32 = vadd.f32 %v5106_v13, %v622_v12  ;;  %v719_v37 = vmax.f32 %v667_v20, 0.0 }
 0x1de   : > { %v832_v44 = vpop.permute.xlu1 %831  ;;  %v827_v45 = vpop.permute.xlu0 %826  ;;  %v5304_v47 = vld [vmem:[#allocation2 + $0x80] sm:$0xff]   ;;  %v2178_v16 = vor.u32 %v2176_v61, %v2174_v34  ;;  %v720_v31 = vmax.f32 %v668_v10, 0.0  ;;  %v669_v38 = vadd.f32 %v5106_v13, %v610_v22 }
 0x1df   : > { %1375 = vst.msk [vmem:[#allocation2 + $0x8c] sm:$0xf] %vm1338_vm4, %v3555_v39  ;;  %1374 = vst.msk [vmem:[#allocation2 + $0x88] sm:$0xf] %vm1338_vm4, %v3554_v40  ;;  %v1077_v49 = vmul.f32 %v832_v44, %v713_v23  ;;  %v1076_v50 = vmul.f32 %v827_v45, %v712_v29  ;;  %3789 = vmatmul.mubr.msk.bf16.gmra.mrb[4].mxu0 %vm1441_vm5, %v2175_v51  ;;  %v2180_v56 = vshll.u32 %v5304_v47, 16 }
 0x1e0   : > { %3792 = vmatprep.mubr.msk.bf16.mxu0 %vm4663_vm0, %v4662_v11  ;;  %v623_v39 = vmul.f32 %v5100_v5, %v564_v27  ;;  %v721_v52 = vmax.f32 %v669_v38, 0.0 }
 0x1e1   : > { %v3523_v58 = vpack.c.bf16 %v1077_v49, %v1077_v49  ;;  %v3522_v59 = vpack.c.bf16 %v1076_v50, %v1076_v50  ;;  %v2182_v3 = vrot.slane %v2180_v56, 1 }
 0x1e2   : > { %v837_v0 = vpop.permute.xlu1 %836  ;;  %v997_v1 = vpop.permute.xlu0 %996  ;;  %v4223_v2 = vld [vmem:[#allocation2] sm:$0xff]   ;;  %v682_v49 = vadd.f32 %v5106_v13, %v623_v39 }
 0x1e3   : > { %1342 = vst.msk [vmem:[#allocation2 + $0xc] sm:$0xf] %vm1338_vm4, %v3523_v58  ;;  %1341 = vst.msk [vmem:[#allocation2 + $0x8] sm:$0xf] %vm1338_vm4, %v3522_v59  ;;  %v1078_v7 = vmul.f32 %v837_v0, %v714_v42  ;;  %v1110_v8 = vmul.f32 %v997_v1, %v746_v46  ;;  %3697 = vmatmul.mubr.msk.bf16.vlgmr.msra.gmra.mrb[0].mxu1 %vm1441_vm5, %v4223_v2  ;;  %v2183_v25 = vsel %vm1691_vm6, %v2178_v16, %v2182_v3 }
 0x1e4   : > { %3717 = vmatpush3.bf16.msra.mxu1 %v1752_v60  ;;  %3700 = vmatprep.mubr.msk.bf16.mxu1 %vm4663_vm0, %v4662_v11  ;;  %v2184_v42 = vshrl.u32 %v5304_v47, 16  ;;  %v733_v46 = vmax.f32 %v681_v32, 0.0  ;;  %v734_v60 = vmax.f32 %v682_v49, 0.0 }
 0x1e5   : > { %v3524_v14 = vpack.c.bf16 %v1078_v7, %v1078_v7  ;;  %v3556_v15 = vpack.c.bf16 %v1110_v8, %v1110_v8  ;;  %3738 = vmatprep.subr.bf16.mxu1 %v4662_v11 }
 0x1e6   : > { %v847_v17 = vpop.permute.xlu1 %846  ;;  %v842_v18 = vpop.permute.xlu0 %841  ;;  %v5334_v21 = vld [vmem:[#allocation2 + $0x88] sm:$0xff]   ;;  %v2186_v45 = vor.u32 %v2184_v42, %v2182_v3 }
 0x1e7   : > { %1343 = vst.msk [vmem:[#allocation2 + $0x10] sm:$0xf] %vm1338_vm4, %v3524_v14  ;;  %1376 = vst.msk [vmem:[#allocation2 + $0x90] sm:$0xf] %vm1338_vm4, %v3556_v15  ;;  %v1080_v23 = vmul.f32 %v847_v17, %v716_v54  ;;  %v1079_v24 = vmul.f32 %v842_v18, %v715_v55  ;;  %3793 = vmatmul.mubr.msk.bf16.gmra.mrb[8].mxu0 %vm1441_vm5, %v2183_v25  ;;  %v2188_v28 = vshll.u32 %v5334_v21, 16  ;;  %v2192_v63 = vshrl.u32 %v5334_v21, 16 }
 0x1e8   : > { %3796 = vmatprep.mubr.msk.bf16.mxu0 %vm4663_vm0, %v4662_v11  ;;  %v2467_v15 = vld [vmem:[#allocation11 + $0xe] sm:$0x3] }
 0x1e9   : > { %v3526_v29 = vpack.c.bf16 %v1080_v23, %v1080_v23  ;;  %v3525_v30 = vpack.c.bf16 %v1079_v24, %v1079_v24  ;;  %v2190_v43 = vrot.slane %v2188_v28, 1  ;;  %v4234_v28 = vld [vmem:[#allocation2] sm:$0xff]  }
 0x1ea   : > { %v857_v33 = vpop.permute.xlu1 %856  ;;  %v852_v34 = vpop.permute.xlu0 %851  ;;  %v4225_v36 = vld [vmem:[#allocation2 + $0x8] sm:$0xff]  }
 0x1eb   : > { %1345 = vst.msk [vmem:[#allocation2 + $0x18] sm:$0xf] %vm1338_vm4, %v3526_v29  ;;  %1344 = vst.msk [vmem:[#allocation2 + $0x14] sm:$0xf] %vm1338_vm4, %v3525_v30  ;;  %v1082_v40 = vmul.f32 %v857_v33, %v718_v19  ;;  %v1081_v41 = vmul.f32 %v852_v34, %v717_v26  ;;  %3701 = vmatmul.mubr.msk.bf16.gmra.mrb[4].mxu1 %vm1441_vm5, %v4225_v36  ;;  %v2191_v51 = vsel %vm1691_vm6, %v2186_v45, %v2190_v43  ;;  %v4230_v57 = vld [vmem:[#allocation2 + $0x4] sm:$0xfe]  }
 0x1ec   : > { %3704 = vmatprep.mubr.msk.bf16.mxu1 %vm4663_vm0, %v4662_v11  ;;  %v2194_v3 = vor.u32 %v2192_v63, %v2190_v43  ;;  %v2616_v6 = vshrl.u32 %v4230_v57, 16  ;;  %v2619_v9 = vshll.u32 %v4230_v57, 16  ;;  %v2343_v27 = vrot.slane %v4230_v57, 1  ;;  %v5400_v36 = vld [vmem:[#allocation2 + $0x8] sm:$0xff]   ;;  %v1849_v57 = vld [vmem:[#allocation11 + $0x6] sm:$0x3] }
 0x1ed   : > { %v3528_v35 = vpack.c.bf16 %v1082_v40, %v1082_v40  ;;  %v3527_v44 = vpack.c.bf16 %v1081_v41, %v1081_v41  ;;  %v2523_v34 = vsel %vm1457_vm1, %v2467_v15, 0  ;;  %v1700_v49 = vshll.u32 %v5400_v36, 16 }
 0x1ee   : > { %v867_v48 = vpop.permute.xlu1 %866  ;;  %v862_v5 = vpop.permute.xlu0 %861  ;;  %v4228_v53 = vld [vmem:[#allocation2 + $0x90] ss:$0 sps:$4 sm:$0x11]   ;;  %v2618_v17 = vrot.slane %v2616_v6, 1  ;;  %v2621_v23 = vrot.slane %v2619_v9, 2 }
 0x1ef   : > { %1347 = vst.msk [vmem:[#allocation2 + $0x20] sm:$0xf] %vm1338_vm4, %v3528_v35  ;;  %1346 = vst.msk [vmem:[#allocation2 + $0x1c] sm:$0xf] %vm1338_vm4, %v3527_v44  ;;  %v1084_v50 = vmul.f32 %v867_v48, %v720_v31  ;;  %v1083_v47 = vmul.f32 %v862_v5, %v719_v37  ;;  %3797 = vmatmul.mubr.msk.bf16.gmra.mrb[12].mxu0 %vm1441_vm5, %v2191_v51  ;;  %v2196_v56 = vshll.u32 %v4228_v53, 16  ;;  %v5368_v4 = vld [vmem:[#allocation2 + $0xc] sm:$0xff]  }
 0x1f0   : > { %3800 = vmatprep.mubr.msk.bf16.mxu0 %vm4663_vm0, %v4662_v11  ;;  %v2624_v18 = vshrl.u32 %v5368_v4, 16  ;;  %v2627_v19 = vshll.u32 %v5368_v4, 16  ;;  %v2344_v24 = vrot.slane %v5368_v4, 1  ;;  %v2622_v37 = vor.u32 %v2621_v23, %v2618_v17 }
 0x1f1   : > { %v3530_v54 = vpack.c.bf16 %v1084_v50, %v1084_v50  ;;  %v3529_v55 = vpack.c.bf16 %v1083_v47, %v1083_v47  ;;  %v2198_v0 = vrot.slane %v2196_v56, 1  ;;  %v1695_v35 = vshll.u32 %v4234_v28, 16 }
 0x1f2   : > { %v932_v13 = vpop.permute.xlu1 %931  ;;  %v872_v58 = vpop.permute.xlu0 %871  ;;  %v4227_v59 = vld [vmem:[#allocation2 + $0x10] sm:$0xff]   ;;  %v2626_v25 = vrot.slane %v2624_v18, 1  ;;  %v2629_v26 = vrot.slane %v2627_v19, 2  ;;  %v2345_v39 = vsel %vm2342_vm8, %v2343_v27, %v2344_v24  ;;  %v1704_v18 = vshrl.u32 %v5400_v36, 16 }
 0x1f3   : > { %1349 = vst.msk [vmem:[#allocation2 + $0x28] sm:$0xf] %vm1338_vm4, %v3530_v54  ;;  %1348 = vst.msk [vmem:[#allocation2 + $0x24] sm:$0xf] %vm1338_vm4, %v3529_v55  ;;  %v1097_v61 = vmul.f32 %v932_v13, %v733_v46  ;;  %v1085_v62 = vmul.f32 %v872_v58, %v721_v52  ;;  %3705 = vmatmul.mubr.msk.bf16.gmra.mrb[8].mxu1 %vm1441_vm5, %v4227_v59  ;;  %v2199_v12 = vsel %vm1691_vm6, %v2194_v3, %v2198_v0  ;;  %v5378_v16 = vld [vmem:[#allocation2 + $0x14] sm:$0xff]  }
 0x1f4   : > { %3708 = vmatprep.mubr.msk.bf16.mxu1 %vm4663_vm0, %v4662_v11  ;;  %v2633_v30 = vshrl.u32 %v5378_v16, 16  ;;  %v2636_v31 = vshll.u32 %v5378_v16, 16  ;;  %v2630_v38 = vor.u32 %v2629_v26, %v2626_v25  ;;  %v2346_v47 = vrot.slane %v5378_v16, 1 }
 0x1f5   : > { %v3543_v1 = vpack.c.bf16 %v1097_v61, %v1097_v61  ;;  %v3531_v2 = vpack.c.bf16 %v1085_v62, %v1085_v62  ;;  %v1697_v56 = vrot.slane %v1695_v35, 1  ;;  %v4237_v61 = vld [vmem:[#allocation2 + $0x10] sm:$0xff]   ;;  %v1693_v0 = vshrl.u32 %v4234_v28, 16 }
 0x1f6   : > { %v5370_v7 = vpop.permute.xlu1 %2825  ;;  %v937_v8 = vpop.permute.xlu0 %936  ;;  %v4229_v22 = vld [vmem:[#allocation2 + $0x18] sm:$0xff]   ;;  %v2635_v41 = vrot.slane %v2633_v30, 1  ;;  %v5407_v42 = vsel %vm2614_vm7, %v2622_v37, %v2630_v38  ;;  %v2638_v43 = vrot.slane %v2636_v31, 2  ;;  %v2347_v63 = vsel %vm2342_vm8, %v2344_v24, %v2346_v47 }
 0x1f7   : > { %1363 = vst.msk [vmem:[#allocation2 + $0x5c] sm:$0xf] %vm1338_vm4, %v3543_v1  ;;  %1350 = vst.msk [vmem:[#allocation2 + $0x2c] sm:$0xf] %vm1338_vm4, %v3531_v2  ;;  %v1098_v10 = vmul.f32 %v937_v8, %v734_v60  ;;  %3801 = vmatmul.mubr.msk.bf16.gmra.mrb[16].mxu0 %vm1441_vm5, %v2199_v12  ;;  %v5391_v29 = vld [vmem:[#allocation2 + $0x1c] sm:$0xff]   ;;  %v1702_v1 = vrot.slane %v1700_v49, 1  ;;  %v1698_v6 = vor.u32 %v1697_v56, %v1693_v0 }
 0x1f8   : > { %3806 = vmatprep.mubr.msk.bf16.mxu0 %vm4663_vm0, %v4662_v11  ;;  %v2642_v44 = vshrl.u32 %v5391_v29, 16  ;;  %v2645_v45 = vshll.u32 %v5391_v29, 16  ;;  %v2639_v50 = vor.u32 %v2638_v43, %v2635_v41  ;;  %v1891_v3 = vsel %vm1457_vm1, %v1849_v57, 0  ;;  %v4239_v23 = vld [vmem:[#allocation2 + $0x18] sm:$0xff]   ;;  %v4243_v49 = vld [vmem:[#allocation2 + $0x40] sm:$0xff]  }
 0x1f9   : > { %v3544_v14 = vpack.c.bf16 %v1098_v10, %v1098_v10  ;;  %v1708_v10 = vshll.u32 %v4237_v61, 16  ;;  %v2348_v15 = vrot.slane %v5391_v29, 1  ;;  %v1706_v24 = vor.u32 %v1704_v18, %v1702_v1 }
 0x1fa   : > { %v5382_v20 = vpop.permute.xlu1 %2835  ;;  %v5384_v21 = vpop.permute.xlu0 %2830  ;;  %v5403_v40 = vld [vmem:[#allocation2 + $0x24] sm:$0xff]   ;;  %v2644_v51 = vrot.slane %v2642_v44, 1  ;;  %v2647_v52 = vrot.slane %v2645_v45, 2  ;;  %v5423_v54 = vsel %vm2614_vm7, %v2630_v38, %v2639_v50  ;;  %v1716_v29 = vshll.u32 %v4239_v23, 16 }
 0x1fb   : > { %1364 = vst.msk [vmem:[#allocation2 + $0x60] sm:$0xf] %vm1338_vm4, %v3544_v14  ;;  %3709 = vmatmul.mubr.msk.bf16.gmra.mrb[12].mxu1 %vm1441_vm5, %v4229_v22  ;;  %v4232_v5 = vld [vmem:[#allocation2 + $0x20] sm:$0xff]   ;;  %v2651_v53 = vshrl.u32 %v5403_v40, 16  ;;  %v2654_v55 = vshll.u32 %v5403_v40, 16  ;;  %v1703_v14 = vsel %vm1691_vm6, %v1698_v6, %v1702_v1  ;;  %v1710_v19 = vrot.slane %v1708_v10, 1 }
 0x1fc   : > { %3712 = vmatprep.mubr.msk.bf16.mxu1 %vm4663_vm0, %v4662_v11  ;;  %v2648_v13 = vor.u32 %v2647_v52, %v2644_v51  ;;  %v2349_v22 = vsel %vm2342_vm8, %v2346_v47, %v2348_v15  ;;  %v2350_v28 = vrot.slane %v5403_v40, 1  ;;  %v1718_v37 = vrot.slane %v1716_v29, 1  ;;  %v4242_v47 = vld [vmem:[#allocation2 + $0x38] sm:$0xfe]   ;;  %v4247_v10 = vld [vmem:[#allocation2 + $0x50] sm:$0xff]   ;;  %v4253_v29 = vld [vmem:[#allocation2 + $0x88] sm:$0xff]  }
 0x1fd   : > { %v2653_v58 = vrot.slane %v2651_v53, 1  ;;  %v2656_v62 = vrot.slane %v2654_v55, 2  ;;  %v1711_v27 = vsel %vm1691_vm6, %v1706_v24, %v1710_v19  ;;  %v1720_v45 = vshrl.u32 %v4239_v23, 16  ;;  %v4244_v51 = vld [vmem:[#allocation2 + $0x28] ss:$0 sps:$4 sm:$0x11]  }
 0x1fe   : > { %v5395_v32 = vpop.permute.xlu1 %2845  ;;  %v5397_v33 = vpop.permute.xlu0 %2840  ;;  %v5434_v2 = vsel %vm2614_vm7, %v2639_v50, %v2648_v13  ;;  %v2351_v36 = vsel %vm2342_vm8, %v2348_v15, %v2350_v28  ;;  %v4240_v38 = vld [vmem:[#allocation2 + $0x2c] ss:$0 sps:$4 sm:$0x11]   ;;  %v2497_v53 = vrot.slane %v4243_v49, 1  ;;  %v2610_v55 = vld [vmem:[#allocation11 + $0x10] sm:$0x3] }
 0x1ff   : > { %3807 = vmatmul.mubr.msk.bf16.vlgmr.msra.gmra.mrb[0].mxu0 %vm1441_vm5, %v2345_v39  ;;  %v5438_v4 = vor.u32 %v2656_v62, %v2653_v58  ;;  %v4241_v39 = vld [vmem:[#allocation2 + $0x20] sm:$0xff]   ;;  %v2352_v43 = vrot.slane %v4240_v38, 1  ;;  %v1722_v50 = vor.u32 %v1720_v45, %v1718_v37  ;;  %v2496_v56 = vrot.slane %v4242_v47, 1  ;;  %v4249_v18 = vld [vmem:[#allocation2 + $0x58] sm:$0xff]  }
 0x200   : > { %3827 = vmatpush3.bf16.msra.mxu0 %v2523_v34  ;;  %3810 = vmatprep.mubr.msk.bf16.mxu0 %vm4663_vm0, %v4662_v11  ;;  %v1712_v34 = vshrl.u32 %v4237_v61, 16  ;;  %v1724_v35 = vshll.u32 %v4241_v39, 16  ;;  %v1728_v57 = vshrl.u32 %v4241_v39, 16  ;;  %v2684_v58 = vsel %vm1457_vm1, %v2610_v55, 0 }
 0x201   : > { %3848 = vmatprep.subr.bf16.mxu0 %v4662_v11  ;;  %v5446_v12 = vsel %vm2614_vm7, %v2648_v13, %v5438_v4  ;;  %v2353_v44 = vsel %vm2342_vm8, %v2350_v28, %v2352_v43  ;;  %v1732_v13 = vshll.u32 %v4244_v51, 16  ;;  %v2498_v61 = vsel %vm2342_vm8, %v2496_v56, %v2497_v53  ;;  %v4252_v28 = vld [vmem:[#allocation2 + $0x80] sm:$0xff]  }
 0x202   : > { %v5413_v46 = vpop.permute.xlu1 %2855  ;;  %v5415_v48 = vpop.permute.xlu0 %2850  ;;  %v1714_v41 = vor.u32 %v1712_v34, %v1710_v19  ;;  %v4248_v19 = vld [vmem:[#allocation2 + $0x70] sm:$0xff]   ;;  %v4251_v24 = vld [vmem:[#allocation2 + $0x60] ss:$0 sps:$4 sm:$0x11]  }
 0x203   : > { %3713 = vmatmul.mubr.msk.bf16.gmra.mrb[16].mxu1 %vm1441_vm5, %v4232_v5  ;;  %v1726_v5 = vrot.slane %v1724_v35, 1  ;;  %v1734_v0 = vrot.slane %v1732_v13, 1  ;;  %v5557_v13 = vld [vmem:[#allocation12] ss:$0 sm:$0xff] }
 0x204   : > { %3718 = vmatprep.mubr.msk.bf16.mxu1 %vm4663_vm0, %v4662_v11  ;;  %v1719_v40 = vsel %vm1691_vm6, %v1714_v41, %v1718_v37  ;;  %v4258_v41 = vld [vmem:[#allocation2 + $0xb4] sm:$0xff]  }
 0x205   : > { %v1727_v52 = vsel %vm1691_vm6, %v1722_v50, %v1726_v5  ;;  %v1730_v62 = vor.u32 %v1728_v57, %v1726_v5 }
 0x206   : > { %v5428_v59 = vpop.permute.xlu1 %2865  ;;  %v5430_v60 = vpop.permute.xlu0 %2860 }
 0x207   : > { %3811 = vmatmul.mubr.msk.bf16.gmra.mrb[4].mxu0 %vm1441_vm5, %v2347_v63  ;;  %v4245_v63 = vld [vmem:[#allocation2 + $0x48] sm:$0xff]   ;;  %v1735_v1 = vsel %vm1691_vm6, %v1730_v62, %v1734_v0 }
 0x208   : > { %3814 = vmatprep.mubr.msk.bf16.mxu0 %vm4663_vm0, %v4662_v11  ;;  %v5559_v62 = vld [vmem:[#allocation14] ss:$0 sm:$0xff] }
 0x20a   : > { %v877_v8 = vpop.permute.xlu1 %876  ;;  %v5442_v9 = vpop.permute.xlu0 %2870 }
 0x20b   : > { %3719 = vmatmul.mubr.msk.bf16.vlgmr.msra.gmra.mrb[0].mxu1 %vm1441_vm5, %v1703_v14  ;;  %v2963_v8 = vld [vmem:[#allocation17] sm:$0x3]  ;;  %v4246_v14 = vld [vmem:[#allocation2 + $0x68] sm:$0xff]  }
 0x20c   : > { %3739 = vmatpush3.bf16.msra.mxu1 %v1891_v3  ;;  %3722 = vmatprep.mubr.msk.bf16.mxu1 %vm4663_vm0, %v4662_v11  ;;  %v2499_v3 = vrot.slane %v4245_v63, 1  ;;  %v3005_v15 = vsel %vm1457_vm1, %v2963_v8, 0 }
 0x20d   : > { %3870 = vmatprep.subr.bf16.mxu1 %v4662_v11 }
 0x20e   : > { %v1002_v16 = vpop.permute.xlu1 %1001  ;;  %v942_v17 = vpop.permute.xlu0 %941  ;;  %v2500_v6 = vsel %vm2342_vm8, %v2497_v53, %v2499_v3 }
 0x20f   : > { %3815 = vmatmul.mubr.msk.bf16.gmra.mrb[8].mxu0 %vm1441_vm5, %v2349_v22  ;;  %v2501_v16 = vrot.slane %v4247_v10, 1  ;;  %v2503_v22 = vrot.slane %v4249_v18, 1 }
 0x210   : > { %3818 = vmatprep.mubr.msk.bf16.mxu0 %vm4663_vm0, %v4662_v11 }
 0x211   : > { %v2502_v17 = vsel %vm2342_vm8, %v2499_v3, %v2501_v16  ;;  %v2504_v23 = vsel %vm2342_vm8, %v2501_v16, %v2503_v22 }
 0x212   : > { %v1062_v25 = vpop.permute.xlu1 %1061  ;;  %v1007_v26 = vpop.permute.xlu0 %1006 }
 0x213   : > { %3723 = vmatmul.mubr.msk.bf16.gmra.mrb[4].mxu1 %vm1441_vm5, %v1711_v27  ;;  %v4250_v25 = vld [vmem:[#allocation2 + $0x78] sm:$0xff]   ;;  %v2505_v26 = vrot.slane %v4251_v24, 1 }
 0x214   : > { %3726 = vmatprep.mubr.msk.bf16.mxu1 %vm4663_vm0, %v4662_v11 }
 0x215   : > { %v2506_v27 = vsel %vm2342_vm8, %v2503_v22, %v2505_v26 }
 0x216   : > { %v1072_v30 = vpop.permute.xlu1 %1071  ;;  %v1067_v31 = vpop.permute.xlu0 %1066 }
 0x217   : > { %3819 = vmatmul.mubr.msk.bf16.gmra.mrb[12].mxu0 %vm1441_vm5, %v2351_v36  ;;  %v4254_v30 = vld [vmem:[#allocation2 + $0x9c] sm:$0xff]   ;;  %v4255_v31 = vld [vmem:[#allocation2 + $0xa4] sm:$0xff]  }
 0x218   : > { %3822 = vmatprep.mubr.msk.bf16.mxu0 %vm4663_vm0, %v4662_v11 }
 0x21b   : > { %3727 = vmatmul.mubr.msk.bf16.gmra.mrb[8].mxu1 %vm1441_vm5, %v1719_v40 }
 0x21c   : > { %3730 = vmatprep.mubr.msk.bf16.mxu1 %vm4663_vm0, %v4662_v11 }
 0x21f   : > { %3823 = vmatmul.mubr.msk.bf16.gmra.mrb[16].mxu0 %vm1441_vm5, %v2353_v44 }
 0x220   : > { %3828 = vmatprep.mubr.msk.bf16.mxu0 %vm4663_vm0, %v4662_v11 }
 0x223   : > { %3731 = vmatmul.mubr.msk.bf16.gmra.mrb[12].mxu1 %vm1441_vm5, %v1727_v52 }
 0x224   : > { %3734 = vmatprep.mubr.msk.bf16.mxu1 %vm4663_vm0, %v4662_v11 }
 0x227   : > { %3829 = vmatmul.mubr.msk.bf16.vlgmr.msra.gmra.mrb[0].mxu0 %vm1441_vm5, %v2498_v61 }
 0x228   : > { %3849 = vmatpush3.bf16.msra.mxu0 %v2684_v58  ;;  %3832 = vmatprep.mubr.msk.bf16.mxu0 %vm4663_vm0, %v4662_v11 }
 0x22b   : > { %3735 = vmatmul.mubr.msk.bf16.gmra.mrb[16].mxu1 %vm1441_vm5, %v1735_v1 }
 0x22c   : > { %3740 = vmatprep.mubr.msk.bf16.mxu1 %vm4663_vm0, %v4662_v11 }
 0x22f   : > { %3833 = vmatmul.mubr.msk.bf16.gmra.mrb[4].mxu0 %vm1441_vm5, %v2500_v6 }
 0x230   : > { %3836 = vmatprep.mubr.msk.bf16.mxu0 %vm4663_vm0, %v4662_v11 }
 0x233   : > { %3741 = vmatmul.mubr.msk.bf16.vlgmr.msra.gmra.mrb[0].mxu1 %vm1441_vm5, %v4246_v14 }
 0x234   : > { %3871 = vmatpush3.bf16.msra.mxu1 %v3005_v15  ;;  %3744 = vmatprep.mubr.msk.bf16.mxu1 %vm4663_vm0, %v4662_v11 }
 0x237   : > { %3837 = vmatmul.mubr.msk.bf16.gmra.mrb[8].mxu0 %vm1441_vm5, %v2502_v17 }
 0x238   : > { %3840 = vmatprep.mubr.msk.bf16.mxu0 %vm4663_vm0, %v4662_v11 }
 0x23b   : > { %3745 = vmatmul.mubr.msk.bf16.gmra.mrb[4].mxu1 %vm1441_vm5, %v4248_v19 }
 0x23c   : > { %3748 = vmatprep.mubr.msk.bf16.mxu1 %vm4663_vm0, %v4662_v11 }
 0x23f   : > { %3841 = vmatmul.mubr.msk.bf16.gmra.mrb[12].mxu0 %vm1441_vm5, %v2504_v23 }
 0x240   : > { %3844 = vmatprep.mubr.msk.bf16.mxu0 %vm4663_vm0, %v4662_v11 }
 0x243   : > { %3749 = vmatmul.mubr.msk.bf16.gmra.mrb[8].mxu1 %vm1441_vm5, %v4250_v25 }
 0x244   : > { %3752 = vmatprep.mubr.msk.bf16.mxu1 %vm4663_vm0, %v4662_v11 }
 0x247   : > { %3845 = vmatmul.mubr.msk.bf16.gmra.mrb[16].mxu0 %vm1441_vm5, %v2506_v27 }
 0x248   : > { %3850 = vmatprep.mubr.msk.bf16.mxu0 %vm4663_vm0, %v4662_v11 }
 0x24b   : > { %3753 = vmatmul.mubr.msk.bf16.gmra.mrb[12].mxu1 %vm1441_vm5, %v4252_v28 }
 0x24c   : > { %3756 = vmatprep.mubr.msk.bf16.mxu1 %vm4663_vm0, %v4662_v11 }
 0x24f   : > { %3851 = vmatmul.mubr.msk.bf16.vlgmr.msra.gmra.mrb[0].mxu0 %vm1441_vm5, %v5407_v42  ;;  %v4257_v42 = vld [vmem:[#allocation2 + $0x2c] ss:$0 sps:$4 sm:$0x33]  }
 0x250   : > { %3854 = vmatprep.mubr.msk.bf16.mxu0 %vm4663_vm0, %v4662_v11  ;;  %v2660_v34 = vshrl.u32 %v4257_v42, 16  ;;  %v2663_v36 = vshll.u32 %v4257_v42, 16 }
 0x252   : > { %v2665_v37 = vrot.slane %v2663_v36, 2 }
 0x253   : > { %3757 = vmatmul.mubr.msk.bf16.gmra.mrb[16].mxu1 %vm1441_vm5, %v4253_v29 }
 0x254   : > { %3872 = vmatprep.mubr.msk.bf16.mxu1 %vm4663_vm0, %v4662_v11 }
 0x257   : > { %3855 = vmatmul.mubr.msk.bf16.gmra.mrb[4].mxu0 %vm1441_vm5, %v5423_v54  ;;  %v2662_v54 = vrot.slane %v2660_v34, 1 }
 0x258   : > { %3858 = vmatprep.mubr.msk.bf16.mxu0 %vm4663_vm0, %v4662_v11 }
 0x259   : > { %v2666_v38 = vor.u32 %v2665_v37, %v2662_v54 }
 0x25b   : > { %3873 = vmatmul.mubr.msk.bf16.vlgmr.msra.gmra.mrb[20].mxu1 %vm1441_vm5, %v4254_v30  ;;  %v2667_v39 = vsel %vm2614_vm7, %v5438_v4, %v2666_v38 }
 0x25c   : > { %3876 = vmatprep.mubr.msk.bf16.mxu1 %vm4663_vm0, %v4662_v11 }
 0x25f   : > { %3859 = vmatmul.mubr.msk.bf16.gmra.mrb[8].mxu0 %vm1441_vm5, %v5434_v2  ;;  %v4256_v2 = vld [vmem:[#allocation2 + $0xac] sm:$0xff]  }
 0x260   : > { %3862 = vmatprep.mubr.msk.bf16.mxu0 %vm4663_vm0, %v4662_v11 }
 0x263   : > { %3877 = vmatmul.mubr.msk.bf16.gmra.mrb[24].mxu1 %vm1441_vm5, %v4255_v31 }
 0x264   : > { %3880 = vmatprep.mubr.msk.bf16.mxu1 %vm4663_vm0, %v4662_v11 }
 0x267   : > { %3863 = vmatmul.mubr.msk.bf16.gmra.mrb[12].mxu0 %vm1441_vm5, %v5446_v12  ;;  %v4259_v12 = vld [vmem:[#allocation2 + $0xbc] sm:$0xff]  }
 0x268   : > { %3866 = vmatprep.mubr.msk.bf16.mxu0 %vm4663_vm0, %v4662_v11 }
 0x26b   : > { %3881 = vmatmul.mubr.msk.bf16.gmra.mrb[28].mxu1 %vm1441_vm5, %v4256_v2 }
 0x26c   : > { %3884 = vmatprep.mubr.msk.bf16.mxu1 %vm4663_vm0, %v4662_v11 }
 0x26f   : > { %3867 = vmatmul.mubr.msk.bf16.gmra.mrb[16].mxu0 %vm1441_vm5, %v2667_v39 }
 0x273   : > { %3885 = vmatmul.mubr.msk.bf16.gmra.mrb[32].mxu1 %vm1441_vm5, %v4258_v41 }
 0x274   : > { %3888 = vmatprep.mubr.msk.bf16.mxu1 %vm4663_vm0, %v4662_v11 }
 0x27b   : > { %3889 = vmatmul.mubr.msk.bf16.gmra.mrb[36].mxu1 %vm1441_vm5, %v4259_v12 }
 0x306   : > { %v1927_v40 = vpop.f32.mrb[0].mxu1 }
 0x307   : > { %v3742_v43 = vpop.f32.mrb[1].mxu1 }
 0x308   : > { %v1930_v35 = vpop.f32.mrb[2].mxu1 }
 0x309   : > { %v3743_v44 = vpop.f32.mrb[3].mxu1 }
 0x30e   : > { %v1935_v45 = vpop.f32.mrb[4].mxu1 }
 0x30f   : > { %v3746_v5 = vpop.f32.mrb[5].mxu1 }
 0x310   : > { %v1938_v49 = vpop.f32.mrb[6].mxu1 }
 0x311   : > { %v3747_v50 = vpop.f32.mrb[7].mxu1 }
 0x316   : > { %v1943_v4 = vpop.f32.mrb[8].mxu1 }
 0x317   : > { %v3750_v47 = vpop.f32.mrb[9].mxu1 }
 0x318   : > { %v1946_v51 = vpop.f32.mrb[10].mxu1 }
 0x319   : > { %v3751_v52 = vpop.f32.mrb[11].mxu1 }
 0x31e   : > { %v5553_v53 = vpop.f32.mrb[12].mxu1 }
 0x31f   : > { %v3754_v55 = vpop.f32.mrb[13].mxu1 }
 0x320   : > { %v5555_v56 = vpop.f32.mrb[14].mxu1 }
 0x321   : > { %v3755_v11 = vpop.f32.mrb[15].mxu1 }
 0x322   : > { %v2720_v57 = vpop.f32.mrb[0].mxu0 }
 0x323   : > { %v3892_v58 = vadd.f32 %v2720_v57, %v1927_v40  ;;  %v3852_v61 = vpop.f32.mrb[1].mxu0 }
 0x324   : > { %v2723_v63 = vpop.f32.mrb[2].mxu0 }
 0x325   : > { %v2776_v0 = vmul.f32 %v3892_v58, %v5557_v13  ;;  %v3893_v1 = vadd.f32 %v2723_v63, %v1930_v35  ;;  %v3853_v3 = vpop.f32.mrb[3].mxu0 }
 0x326   : > { %v5562_v6 = vpop.f32.mrb[16].mxu1 }
 0x327   : > { %v2793_v8 = vadd.f32 %v5559_v62, %v2776_v0  ;;  %v2777_v10 = vmul.f32 %v3893_v1, %v5557_v13  ;;  %v3758_v14 = vpop.f32.mrb[17].mxu1 }
 0x328   : > { %v5566_v15 = vpop.f32.mrb[18].mxu1 }
 0x329   : > { %v2803_v16 = vmax.f32 %v2793_v8, 0.0  ;;  %v2794_v17 = vadd.f32 %v5559_v62, %v2777_v10  ;;  %v3759_v18 = vpop.f32.mrb[19].mxu1 }
 0x32a   : > { %v2728_v19 = vpop.f32.mrb[4].mxu0 }
 0x32b   : > { %v2804_v22 = vmax.f32 %v2794_v17, 0.0  ;;  %v3894_v23 = vadd.f32 %v2728_v19, %v1935_v45  ;;  %v3856_v24 = vpop.f32.mrb[5].mxu0  ;;  %v2873_v26 = vmul.f32 %v5370_v7, %v2803_v16 }
 0x32c   : > { %v2731_v25 = vpop.f32.mrb[6].mxu0 }
 0x32d   : > { %v2874_v27 = vmul.f32 %v5384_v21, %v2804_v22  ;;  %v2778_v28 = vmul.f32 %v3894_v23, %v5557_v13  ;;  %v3895_v29 = vadd.f32 %v2731_v25, %v1938_v49  ;;  %v3857_v30 = vpop.f32.mrb[7].mxu0 }
 0x32e   : > { %v3041_v42 = vpop.f32.mrb[20].mxu1 }
 0x32f   : > { %v3585_v31 = vpack.c.bf16 %v2874_v27, %v2873_v26  ;;  %v2795_v34 = vadd.f32 %v5559_v62, %v2778_v28  ;;  %v2779_v36 = vmul.f32 %v3895_v29, %v5557_v13  ;;  %3080 = vst [vmem:[%s5575_s9] sm:$0xff] %v3041_v42  ;;  %v3874_v54 = vpop.f32.mrb[21].mxu1 }
 0x330   : > { %v3044_v37 = vpop.f32.mrb[22].mxu1 }
 0x331   : > { %3607 = vst [vmem:[%s5076_s16 + $0x8] sm:$0xff] %v3585_v31   ;;  %v2805_v7 = vmax.f32 %v2795_v34, 0.0  ;;  %v2796_v21 = vadd.f32 %v5559_v62, %v2779_v36  ;;  %3081 = vst [vmem:[%s5575_s9 + $0x8] sm:$0xff] %v3044_v37  ;;  %v3875_v2 = vpop.f32.mrb[23].mxu1 }
 0x332   : > { %v2736_v38 = vpop.f32.mrb[8].mxu0 }
 0x333   : > { %v2806_v39 = vmax.f32 %v2796_v21, 0.0  ;;  %v3896_v41 = vadd.f32 %v2736_v38, %v1943_v4  ;;  %v3860_v12 = vpop.f32.mrb[9].mxu0  ;;  %v2875_v43 = vmul.f32 %v5382_v20, %v2805_v7 }
 0x334   : > { %v2739_v40 = vpop.f32.mrb[10].mxu0 }
 0x335   : > { %v2876_v35 = vmul.f32 %v5397_v33, %v2806_v39  ;;  %v2780_v44 = vmul.f32 %v3896_v41, %v5557_v13  ;;  %v3897_v45 = vadd.f32 %v2739_v40, %v1946_v51  ;;  %v3861_v5 = vpop.f32.mrb[11].mxu0 }
 0x336   : > { %v3049_v49 = vpop.f32.mrb[24].mxu1 }
 0x337   : > { %v3590_v50 = vpack.c.bf16 %v2876_v35, %v2875_v43  ;;  %v2797_v47 = vadd.f32 %v5559_v62, %v2780_v44  ;;  %v2781_v52 = vmul.f32 %v3897_v45, %v5557_v13  ;;  %3082 = vst [vmem:[%s5575_s9 + $0x10] sm:$0xff] %v3049_v49  ;;  %v3878_v55 = vpop.f32.mrb[25].mxu1 }
 0x338   : > { %v3052_v4 = vpop.f32.mrb[26].mxu1 }
 0x339   : > { %3608 = vst [vmem:[%s5076_s16 + $0x10] sm:$0xff] %v3590_v50   ;;  %v2807_v11 = vmax.f32 %v2797_v47, 0.0  ;;  %v2798_v57 = vadd.f32 %v5559_v62, %v2781_v52  ;;  %3083 = vst [vmem:[%s5575_s9 + $0x18] sm:$0xff] %v3052_v4  ;;  %v3879_v20 = vpop.f32.mrb[27].mxu1 }
 0x33a   : > { %v2744_v33 = vpop.f32.mrb[12].mxu0 }
 0x33b   : > { %v2808_v58 = vmax.f32 %v2798_v57, 0.0  ;;  %v3898_v51 = vadd.f32 %v2744_v33, %v5553_v53  ;;  %v3864_v61 = vpop.f32.mrb[13].mxu0  ;;  %v2877_v0 = vmul.f32 %v5395_v32, %v2807_v11 }
 0x33c   : > { %v2747_v63 = vpop.f32.mrb[14].mxu0 }
 0x33d   : > { %v2878_v1 = vmul.f32 %v5415_v48, %v2808_v58  ;;  %v2782_v3 = vmul.f32 %v3898_v51, %v5557_v13  ;;  %v3899_v8 = vadd.f32 %v2747_v63, %v5555_v56  ;;  %v3865_v10 = vpop.f32.mrb[15].mxu0 }
 0x33e   : > { %v3057_v14 = vpop.f32.mrb[28].mxu1 }
 0x33f   : > { %v3595_v16 = vpack.c.bf16 %v2878_v1, %v2877_v0  ;;  %v2799_v17 = vadd.f32 %v5559_v62, %v2782_v3  ;;  %v2783_v18 = vmul.f32 %v3899_v8, %v5557_v13  ;;  %3084 = vst [vmem:[%s5575_s9 + $0x20] sm:$0xff] %v3057_v14  ;;  %v3882_v53 = vpop.f32.mrb[29].mxu1 }
 0x340   : > { %v3060_v19 = vpop.f32.mrb[30].mxu1 }
 0x341   : > { %3609 = vst [vmem:[%s5076_s16 + $0x18] sm:$0xff] %v3595_v16   ;;  %v2809_v22 = vmax.f32 %v2799_v17, 0.0  ;;  %v2800_v32 = vadd.f32 %v5559_v62, %v2783_v18  ;;  %3085 = vst [vmem:[%s5575_s9 + $0x28] sm:$0xff] %v3060_v19  ;;  %v3883_v48 = vpop.f32.mrb[31].mxu1 }
 0x342   : > { %v2752_v23 = vpop.f32.mrb[16].mxu0 }
 0x343   : > { %v2810_v56 = vmax.f32 %v2800_v32, 0.0  ;;  %v3900_v24 = vadd.f32 %v2752_v23, %v5562_v6  ;;  %v3868_v25 = vpop.f32.mrb[17].mxu0  ;;  %v2879_v27 = vmul.f32 %v5413_v46, %v2809_v22 }
 0x344   : > { %v2755_v26 = vpop.f32.mrb[18].mxu0 }
 0x345   : > { %v2880_v28 = vmul.f32 %v5430_v60, %v2810_v56  ;;  %v2784_v29 = vmul.f32 %v3900_v24, %v5557_v13  ;;  %v3901_v30 = vadd.f32 %v2755_v26, %v5566_v15  ;;  %v3869_v42 = vpop.f32.mrb[19].mxu0 }
 0x346   : > { %v3065_v31 = vpop.f32.mrb[32].mxu1 }
 0x347   : > { %v3600_v34 = vpack.c.bf16 %v2880_v28, %v2879_v27  ;;  %v2801_v6 = vadd.f32 %v5559_v62, %v2784_v29  ;;  %v2785_v36 = vmul.f32 %v3901_v30, %v5557_v13  ;;  %3086 = vst [vmem:[%s5575_s9 + $0x30] sm:$0xff] %v3065_v31  ;;  %v3886_v54 = vpop.f32.mrb[33].mxu1 }
 0x348   : > { %v3068_v46 = vpop.f32.mrb[34].mxu1 }
 0x349   : > { %3610 = vst [vmem:[%s5076_s16 + $0x20] sm:$0xff] %v3600_v34   ;;  %v2811_v60 = vmax.f32 %v2801_v6, 0.0  ;;  %v2802_v37 = vadd.f32 %v5559_v62, %v2785_v36  ;;  %3087 = vst [vmem:[%s5575_s9 + $0x38] sm:$0xff] %v3068_v46  ;;  %v3887_v15 = vpop.f32.mrb[35].mxu1 }
 0x34b   : > { %v2812_v7 = vmax.f32 %v2802_v37, 0.0  ;;  %v2881_v13 = vmul.f32 %v5428_v59, %v2811_v60 }
 0x34d   : > { %v2882_v21 = vmul.f32 %v5442_v9, %v2812_v7 }
 0x34e   : > { %v3073_v62 = vpop.f32.mrb[36].mxu1 }
 0x34f   : > { %v3605_v2 = vpack.c.bf16 %v2882_v21, %v2881_v13  ;;  %3088 = vst [vmem:[%s5575_s9 + $0x40] sm:$0xff] %v3073_v62  ;;  %v3890_v38 = vpop.f32.mrb[37].mxu1 }
 0x350   : > { %v3076_v39 = vpop.f32.mrb[38].mxu1 }
 0x351   : > { %3611 = vst [vmem:[%s5076_s16 + $0x28] sm:$0xff] %v3605_v2   ;;  %3089 = vst [vmem:[%s5575_s9 + $0x48] sm:$0xff] %v3076_v39  ;;  %v3891_v59 = vpop.f32.mrb[39].mxu1 }
 0x352   : > { %4529 = shalt.err (!%p4526_p8)
}
 0x353   : > { %s4530_s16 = scalar_lea.hbm %s5623_s27, 960  ;;  %s4534_s30 = scalar_lea.hbm %s5758_s11, 1920 }
 0x354   : > { %p4531_p3 = scmp.ne.s32.totalorder %s5623_s27, %s4530_s16  ;;  %p4535_p13 = scmp.lt.u32.totalorder %s5623_s27, %s5758_s11 }
 0x355   : > { %p4536_p1 = scmp.lt.u32.totalorder %s4534_s30, %s4530_s16  ;;  %p4538_p2 = scmp.lt.u32.totalorder %s4530_s16, %s5623_s27 }
 0x356   : > { %p4532_p12 = pnand %p4531_p3, %p5760_p9 }
 0x357   : > { %p4537_p4 = por %p4536_p1, %p4535_p13 }
 0x358   : > { %p4533_p6 = pneg %p4532_p12 }
 0x359   : > { %p4539_p10 = por %p4538_p2, %p4537_p4 }
 0x35b   : > { %p4540_p11 = pnand %p4539_p10, %p4533_p6 }
 0x35d   : > { %4543 = shalt.err (!%p4540_p11)
}
 0x35e   : > { %s4665_s0 = smov 64   ;;  %s4666_s1 = smov 4  }
 0x35f   : > { %4083 = dma.vmem_to_hbm [thread:$0]  (%p5760_p9), %s5625_s22, 960, %s5623_s27, %s3091_s19, %s4665_s0, %s4665_s0, %s4666_s1  }
 0x360   : > { %s3096_s3 = scalar_lea.sflag [#allocation20], %s5043_s25  ;;  %s4544_s9 = scalar_lea.vmem %s5614_s10, 1280 }
 0x361   : > { %p4545_p0 = scmp.ne.s32.totalorder %s5614_s10, %s4544_s9  ;;  %s4667_s16 = smov [#allocation19]  }
 0x362   : > { %s4548_s24 = sshll.u32 %s4667_s16, 4  ;;  %s4549_s24 = int_to_ptr.vmem [resolvable:$false] %s4548_s24 }
 0x363   : > { %p4546_p7 = pnand %p4545_p0, %p5760_p9  ;;  %s4550_s30 = scalar_lea.vmem %s4549_s24, 2560 }
 0x364   : > { %p4551_p8 = scmp.lt.s32.totalorder %s5614_s10, %s4549_s24  ;;  %p4552_p3 = scmp.lt.s32.totalorder %s4550_s30, %s4544_s9 }
 0x365   : > { %p4547_p5 = pneg %p4546_p7 }
 0x366   : > { %p4553_p12 = por %p4552_p3, %p4551_p8 }
 0x368   : > { %p4554_p6 = pnand %p4553_p12, %p4547_p5 }
 0x36a   : > { %4557 = shalt.err (!%p4554_p6)
}
 0x36b   : > { %s4558_s22 = scalar_lea.hbm %s5631_s29, 1280  ;;  %s4562_s12 = scalar_lea.hbm %s5759_s20, 2560 }
 0x36c   : > { %p4559_p13 = scmp.ne.s32.totalorder %s5631_s29, %s4558_s22  ;;  %p4563_p2 = scmp.lt.u32.totalorder %s5631_s29, %s5759_s20 }
 0x36d   : > { %p4564_p10 = scmp.lt.u32.totalorder %s4562_s12, %s4558_s22  ;;  %p4566_p0 = scmp.lt.u32.totalorder %s4558_s22, %s5631_s29 }
 0x36e   : > { %p4560_p1 = pnand %p4559_p13, %p5760_p9 }
 0x36f   : > { %p4565_p11 = por %p4564_p10, %p4563_p2 }
 0x370   : > { %p4561_p4 = pneg %p4560_p1 }
 0x371   : > { %p4567_p7 = por %p4566_p0, %p4565_p11 }
 0x373   : > { %p4568_p5 = pnand %p4567_p7, %p4561_p4 }
 0x375   : > { %4571 = shalt.err (!%p4568_p5)
}
 0x376   : > { %s4668_s1 = smov 128   ;;  %s4669_s9 = smov 8  }
 0x377   : > { %4084 = dma.vmem_to_hbm [thread:$0]  (%p5760_p9), %s5614_s10, 1280, %s5631_s29, %s3096_s3, %s4668_s1, %s4668_s1, %s4669_s9  }
 0x378 PF: > { %s3142_s16 = sand.u32 1, %s4626_s13   ;;  %p5761_p8 = scmp.ne.s32.totalorder %s5750_s28, 0 }
 0x379   : > { %p5762_p3 = scmp.ge.s32.totalorder %s4646_s18, 2  ;;  %s3143_s24 = scalar_lea.sflag [#allocation5], %s3142_s16 }
 0x37b   : > { %p4117_p12 = pnand %p5762_p3, %p5761_p8 }
 0x37d   : > { %4617 = dma.done.wait (!%p4117_p12), %s3143_s24, 960  }
 0x37e   : > { %4619 = vsyncadd (!%p4117_p12), %s3143_s24, 4294966336  ;;  %s3152_s30 = scalar_lea.sflag [#allocation20], %s3142_s16 }
 0x37f   : > { %4621 = dma.done.wait (!%p4117_p12), %s3152_s30, 1280  }
 0x380   : > { %4623 = vsyncadd (!%p4117_p12), %s3152_s30, 4294966016  ;;  %s34_s18 = sadd.s32 1, %s4646_s18   ;;  %s5763_s13 = smov %s4630_s14 }
 0x381   : > { %p31_p6 = scmp.ge.s32.totalorder %s34_s18, 4   ;;  %s5764_s14 = smov %s4634_s15 }
 0x382   : > { %s5765_s15 = smov %s4987_s26  ;;  %s5766_s16 = smov %s4642_s17 }
 0x383   : > { %s5767_s17 = smov %s5769_s21  ;;  %33 = sbr.rel (!%p31_p6) target bundleno = 19 (0x13), region = 165 }
 0x38a   :  { %3157 = vsyncpa [#allocation4], 1 }
 0x38b   :  { %3159 = vsyncpa [#allocation4 + $0x1], 1 }
 0x38c   :  { %3160 = vsyncpa [#allocation7], 1 }
 0x38d   :  { %3161 = vsyncpa [#allocation10], 1 }
 0x38e   :  { %3162 = vsyncpa [#allocation13], 1 }
 0x38f   :  { %3163 = vsyncpa [#allocation16], 1 }
 0x390   :  { %3164 = vsyncpa [#allocation5], 1 }
 0x391   :  { %3166 = vsyncpa [#allocation5 + $0x1], 1 }
 0x392   :  { %3167 = vsyncpa [#allocation20], 1 }
 0x393   :  { %3169 = vsyncpa [#allocation20 + $0x1], 1 }

</bundles_post_ra>
